<compile_context>
chip_gen: v7x
topology: tpu7x:2x2x1
jax: 0.10.0
libtpu: 0.0.40
codegen_flags: <defaults>
</compile_context>

<pallas_src>
import functools

import jax
import jax.numpy as jnp
from jax.experimental import pallas as pl
from jax.experimental.pallas import tpu as pltpu

EPS = 1e-5


# ----------------------------------------------------------------------------
# generation-aware VMEM budgeting
# ----------------------------------------------------------------------------
def _tpu_vmem_capacity_bytes():
    try:
        return int(pltpu.get_tpu_info().vmem_capacity_bytes)
    except Exception:
        return 128 * 2 ** 20  # v5e/v6e default


def _vmem_limit_conv(Tp, Fp, Ctot, ci, gr, kh, kw, tile_t, Fo, cap):
    xblk = Tp * Fp * Ctot * 2                              # bf16 padded input block
    wblk = kh * kw * ci * gr * 2
    # gr-minor output block is lane-padded to 128 in VMEM
    yblk = tile_t * ((Fo + 7) // 8) * 8 * 128 * 4
    sblk = 8 * 128 * 4
    work = tile_t * Fo * (2 * ci + 4 * gr) * 2             # tap loads + f32 accumulator
    est = 2 * (xblk + wblk + yblk + sblk) + work
    return int(min(cap, max(16 * 2 ** 20, 2 * est)))


# ----------------------------------------------------------------------------
# Kernel A: conv (per-tap MXU matmuls, bf16 in / f32 accum)
#           + per-tile centered BatchNorm partial statistics, single pass
# ----------------------------------------------------------------------------
def _conv_stats_kernel(x_ref, w_ref, y_ref, s_ref, *, kh, kw, ci):
    # x_ref : [1, Tp, Fp, Ctot] bf16  padded channels-last dense-connect buffer
    # w_ref : [kh, kw, ci, gr]  bf16  weights over the ci active prefix channels
    # y_ref : [1, tT, Fo, gr]   f32   conv output tile (no bias; BN cancels it)
    # s_ref : [1, 1, 2, gr]     f32   per-tile [sum, centered sum of squares]
    _, tT, Fo, gr = y_ref.shape
    rows = tT * Fo
    t0 = pl.multiple_of(pl.program_id(1) * tT, tT)

    acc = None
    for i in range(kh):
        for j in range(kw):
            # only the ci active (prefix) channels take part: K = kh*kw*ci
            tap = x_ref[0, pl.ds(t0 + i, tT), j:j + Fo, :ci]       # [tT, Fo, ci]
            p = jnp.dot(tap.reshape(rows, ci), w_ref[i, j],
                        preferred_element_type=jnp.float32)        # [rows, gr]
            acc = p if acc is None else acc + p

    y_ref[...] = acc.reshape(1, tT, Fo, gr)

    # centered per-tile partial stats (combined Chan-style outside the kernel)
    s = jnp.sum(acc, axis=0, keepdims=True)                        # [1, gr]
    mu = s * (1.0 / rows)
    d = acc - mu
    ssc = jnp.sum(d * d, axis=0, keepdims=True)                    # [1, gr]
    s_ref[...] = jnp.concatenate([s, ssc], axis=0).reshape(1, 1, 2, gr)


# ----------------------------------------------------------------------------
# Kernel B: BatchNorm (precomputed scale/shift) + ReLU, lane-dense, big blocks
# ----------------------------------------------------------------------------
def _bn_relu_kernel(y_ref, scale_ref, shift_ref, o_ref):
    # y_ref/o_ref: [1, To, Fo*gr] lane-dense; scale/shift: [1, 1, Fo*gr]
    z = jnp.maximum(y_ref[...] * scale_ref[...] + shift_ref[...], 0.0)
    o_ref[...] = z.astype(o_ref.dtype)


# ----------------------------------------------------------------------------
# Per-layer wrapper
# ----------------------------------------------------------------------------
def tfc_layer(xbuf, w_act, gamma, beta, *, To, Fo, tile_t, out_dtype, vmem_cap):
    """One dense TFC layer.

    xbuf  : [B, Tp, Fp, Ctot] bf16 persistent padded channels-last buffer
    w_act : [kh, kw, ci, gr]  bf16 weights over the ci active prefix channels
    Returns the post BN+ReLU activation as [B, To, Fo*gr] in `out_dtype`.
    """
    B, Tp, Fp, Ctot = xbuf.shape
    kh, kw, ci, gr = w_act.shape
    FG = Fo * gr
    nT = To // tile_t
    n = B * To * Fo

    # ---- kernel A: conv + partial BN stats ---------------------------------
    kernel_a = functools.partial(_conv_stats_kernel, kh=kh, kw=kw, ci=ci)
    flops_a = int(2 * n * kh * kw * ci * gr)
    bytes_a = int(B * Tp * Fp * Ctot * 2 + kh * kw * ci * gr * 2
                  + n * gr * 4 + B * nT * 2 * gr * 4)
    y, stats = pl.pallas_call(
        kernel_a,
        grid=(B, nT),
        out_shape=(jax.ShapeDtypeStruct((B, To, Fo, gr), jnp.float32),
                   jax.ShapeDtypeStruct((B, nT, 2, gr), jnp.float32)),
        in_specs=[
            # full padded (T, F) slab per batch element; block index is constant
            # over the t axis so it is fetched once per b and reused.
            # TODO(synk): pl.Buffered(1) / haloed T-F windows here for v7x.
            pl.BlockSpec((1, Tp, Fp, Ctot), lambda b, t: (b, 0, 0, 0)),
            pl.BlockSpec((kh, kw, ci, gr), lambda b, t: (0, 0, 0, 0)),
        ],
        out_specs=(
            pl.BlockSpec((1, tile_t, Fo, gr), lambda b, t: (b, t, 0, 0)),
            pl.BlockSpec((1, 1, 2, gr), lambda b, t: (b, t, 0, 0)),
        ),
        compiler_params=pltpu.CompilerParams(
            dimension_semantics=("parallel", "parallel"),
            vmem_limit_bytes=_vmem_limit_conv(Tp, Fp, Ctot, ci, gr, kh, kw,
                                              tile_t, Fo, vmem_cap),
        ),
        cost_estimate=pl.CostEstimate(flops=flops_a, transcendentals=0,
                                      bytes_accessed=bytes_a),
    )(xbuf, w_act)

    # ---- BatchNorm2d training-mode batch stats (Chan-style combination) ----
    n_t = float(tile_t * Fo)
    sum_t = stats[:, :, 0, :]                                      # [B, nT, gr]
    ssc_t = stats[:, :, 1, :]
    mean = jnp.sum(sum_t, axis=(0, 1)) / n                         # [gr]
    mu_t = sum_t / n_t
    m2 = jnp.sum(ssc_t, axis=(0, 1)) + n_t * jnp.sum((mu_t - mean) ** 2, axis=(0, 1))
    var = jnp.maximum(m2 / n, 0.0)
    inv_std = jax.lax.rsqrt(var + EPS)
    scale = gamma * inv_std
    shift = beta - mean * scale          # (a conv bias would cancel here exactly)
    scale_fg = jnp.tile(scale, Fo).reshape(1, 1, FG)
    shift_fg = jnp.tile(shift, Fo).reshape(1, 1, FG)

    # ---- kernel B: BN + ReLU, lane-dense (To, Fo*gr) block per batch element
    # TODO(synk): also tile the To axis if To*Fo*gr per block outgrows VMEM.
    y_dense = y.reshape(B, To, FG)       # free bitcast (row-major contiguous)
    out_isz = jnp.dtype(out_dtype).itemsize
    bytes_b = int(B * To * FG * (4 + out_isz) + 2 * FG * 4)
    vmem_b = int(min(vmem_cap, max(16 * 2 ** 20, 4 * To * FG * (4 + out_isz))))
    out = pl.pallas_call(
        _bn_relu_kernel,
        grid=(B,),
        out_shape=jax.ShapeDtypeStruct((B, To, FG), out_dtype),
        in_specs=[
            pl.BlockSpec((1, To, FG), lambda b: (b, 0, 0)),
            pl.BlockSpec((1, 1, FG), lambda b: (0, 0, 0)),
            pl.BlockSpec((1, 1, FG), lambda b: (0, 0, 0)),
        ],
        out_specs=pl.BlockSpec((1, To, FG), lambda b: (b, 0, 0)),
        compiler_params=pltpu.CompilerParams(
            dimension_semantics=("parallel",),
            vmem_limit_bytes=vmem_b),
        cost_estimate=pl.CostEstimate(flops=int(3 * B * To * FG), transcendentals=0,
                                      bytes_accessed=bytes_b),
    )(y_dense, scale_fg, shift_fg)
    return out


# ----------------------------------------------------------------------------
# TFC forward
# ----------------------------------------------------------------------------
def _choose_tile_t(To, Fo, tile_t, vmem_cap):
    if tile_t is not None:
        tt = max(1, min(int(tile_t), To))
        while To % tt:
            tt -= 1
        return tt
    # auto: largest divisor of To keeping the flattened row count per tile bounded.
    # 128-MiB-VMEM parts (v5e/v6e) can afford much bigger tiles than v7x (64 MiB).
    row_cap = 8192 if vmem_cap >= 80 * 2 ** 20 else 2048
    best = 1
    for d in range(1, To + 1):
        if To % d == 0 and d * Fo <= row_cap:
            best = d
    return best


def _to_buffer_order(w, layer_idx, c0, gr):
    """Permute a layer's torch-concat (newest-first) input-channel axis into the
    oldest-first buffer order [original input, out_0, ..., out_{i-1}]."""
    i = layer_idx
    if i == 0:
        return w
    chunks = [w[:, :, i * gr:, :]]                                  # original input
    chunks += [w[:, :, (i - 1 - j) * gr:(i - j) * gr, :] for j in range(i)]
    return jnp.concatenate(chunks, axis=2)


@functools.partial(jax.jit, static_argnames=("kt", "kf", "tile_t"))
def tfc_forward(x_nchw, params, kt, kf, tile_t=None):
    """[B, in_channels, T, F] -> [B, gr, T, F] (PyTorch TFC forward, BN batch stats)."""
    B, c0, T, F = x_nchw.shape
    L = len(params)
    gr = params[0][0].shape[-1]

    # PyTorch Conv2d on [B, C, T, F]: kernel=(kf, kt) over (T, F); padding=(kt//2, kf//2).
    kh, kw = kf, kt
    pt, pf = kt // 2, kf // 2
    To = T + 2 * pt - kh + 1
    Fo = F + 2 * pf - kw + 1
    if L > 1:
        assert To == T and Fo == F, "dense connection needs a 'same' conv"
    Tp, Fp = T + 2 * pt, F + 2 * pf

    vmem_cap = (_tpu_vmem_capacity_bytes() * 3) // 4
    tile = _choose_tile_t(To, Fo, tile_t, vmem_cap)

    # Persistent padded channels-last bf16 buffer holding the dense-connect concat,
    # oldest-first: layer i reads the lane-aligned prefix of ci = c0 + i*gr channels.
    Ctot = c0 + (L - 1) * gr
    x = jnp.transpose(x_nchw, (0, 2, 3, 1)).astype(jnp.bfloat16)       # [B, T, F, c0]
    xbuf = jnp.zeros((B, Tp, Fp, Ctot), jnp.bfloat16)
    xbuf = jax.lax.dynamic_update_slice(xbuf, x, (0, pt, pf, 0))

    out = None
    for i, (w, _bias, gamma, beta) in enumerate(params):
        ci = c0 + i * gr
        # active-channel weights in buffer order (no zero extension to Ctot);
        # the conv bias is dropped: training-mode BN cancels it exactly.
        w_buf = _to_buffer_order(w, i, c0, gr).astype(jnp.bfloat16)    # [kh, kw, ci, gr]
        last = (i + 1 == L)
        out = tfc_layer(xbuf, w_buf, gamma, beta, To=To, Fo=Fo, tile_t=tile,
                        out_dtype=jnp.float32 if last else jnp.bfloat16,
                        vmem_cap=vmem_cap)
        if not last:
            # dense connection: append this layer's bf16 activations to the buffer.
            # TODO(synk): replace with an aliased in-kernel writeback (see header).
            out4 = out.reshape(B, To, Fo, gr)
            xbuf = jax.lax.dynamic_update_slice(xbuf, out4, (0, pt, pf, ci))
    return jnp.transpose(out.reshape(B, To, Fo, gr), (0, 3, 1, 2))     # back to NCHW


# ----------------------------------------------------------------------------
# Pure-JAX reference (mirrors torch structure; identical bf16 matmul inputs)
# ----------------------------------------------------------------------------
def ref_forward(x_nchw, params, kt, kf):
    kh, kw = kf, kt
    pt, pf = kt // 2, kf // 2

    def layer(x, w, b, gamma, beta):
        B, T, F, C = x.shape
        To = T + 2 * pt - kh + 1
        Fo = F + 2 * pf - kw + 1
        xp = jnp.pad(x, ((0, 0), (pt, pt), (pf, pf), (0, 0)))
        cols = [xp[:, i:i + To, j:j + Fo, :] for i in range(kh) for j in range(kw)]
        patch = jnp.concatenate(cols, axis=-1).astype(jnp.bfloat16)
        wk = w.reshape(kh * kw * C, -1).astype(jnp.bfloat16)
        gr = wk.shape[-1]
        y = jnp.dot(patch.reshape(-1, kh * kw * C), wk,
                    preferred_element_type=jnp.float32).reshape(B, To, Fo, gr)
        y = y + b.reshape(1, 1, 1, -1)
        mean = y.mean(axis=(0, 1, 2), keepdims=True)
        var = ((y - mean) ** 2).mean(axis=(0, 1, 2), keepdims=True)
        yn = (y - mean) * jax.lax.rsqrt(var + EPS)
        yn = yn * gamma.reshape(1, 1, 1, -1) + beta.reshape(1, 1, 1, -1)
        return jnp.maximum(yn, 0.0)

    x = jnp.transpose(x_nchw, (0, 2, 3, 1)).astype(jnp.float32)
    w, b, g, be = params[0]
    x_ = layer(x, w, b, g, be)
    for (w, b, g, be) in params[1:]:
        x = jnp.concatenate([x_, x], axis=-1)          # torch.cat((x_, x), dim=1)
        x_ = layer(x, w, b, g, be)
    return jnp.transpose(x_, (0, 3, 1, 2))


# ----------------------------------------------------------------------------
# Deterministic synthetic parameters (mirrors the module's __init__ shapes);
# layer i weight is HWIO [kf, kt, c_i, gr] with its input-channel axis ordered
# as torch's concat: [newest output, ..., oldest output, original input].
# ----------------------------------------------------------------------------
def init_params(key, in_channels, num_layers, gr, kt, kf):
    params = []
    c = in_channels
    for _ in range(num_layers):
        key, kw_, kb, kg, kbe = jax.random.split(key, 5)
        fan_in = c * kf * kt
        bound = 1.0 / (fan_in ** 0.5)
        w = jax.random.uniform(kw_, (kf, kt, c, gr), jnp.float32, -bound, bound)
        b = jax.random.uniform(kb, (gr,), jnp.float32, -bound, bound)
        gamma = 1.0 + 0.1 * jax.random.normal(kg, (gr,), jnp.float32)
        beta = 0.1 * jax.random.normal(kbe, (gr,), jnp.float32)
        params.append((w, b, gamma, beta))
        c += gr
    return tuple(params)


if __name__ == "__main__":
    # Small shapes consistent with the module: [B, in_channels, T, F]
    B, in_channels, T, F = 2, 4, 16, 16
    num_layers, gr, kt, kf = 3, 8, 3, 3

    key = jax.random.PRNGKey(0)
    key, kx = jax.random.split(key)
    x = jax.random.normal(kx, (B, in_channels, T, F), jnp.float32)
    params = init_params(key, in_channels, num_layers, gr, kt, kf)

    # tile_t=8 -> conv grid (B, 2): exercises the multi-tile (t0 > 0) path at test size.
    out = tfc_forward(x, params, kt=kt, kf=kf, tile_t=8)
    out = jax.block_until_ready(out)
    assert out.shape == (B, gr, T, F), out.shape

    ref = jax.block_until_ready(ref_forward(x, params, kt, kf))
    assert bool(jnp.all(jnp.isfinite(out)))
    err = float(jnp.max(jnp.abs(out - ref)))
    assert jnp.allclose(out, ref, rtol=2e-3, atol=2e-3), err
    print("KERNEL_OK")
</pallas_src>

<mosaic_0001>
module attributes {stable_mosaic.version = 11 : i64} {
  func.func @_conv_stats_kernel(%arg0: i32, %arg1: i32, %arg2: memref<1x18x18x20xbf16, #tpu.memory_space<vmem>>, %arg3: memref<3x3x4x8xbf16, #tpu.memory_space<vmem>>, %arg4: memref<1x8x16x8xf32, #tpu.memory_space<vmem>>, %arg5: memref<1x1x2x8xf32, #tpu.memory_space<vmem>>) attributes {dimension_semantics = [#tpu.dimension_semantics<parallel>, #tpu.dimension_semantics<parallel>], iteration_bounds = array<i64: 2, 2>, scalar_prefetch = 0 : i64, scratch_operands = 0 : i64, tpu.core_type = #tpu.core_type<tc>, window_params = [{transform_indices = @transform_0, window_bounds = array<i64: 1, 18, 18, 20>}, {pipeline_mode = #tpu.pipeline_mode<synchronous>, transform_indices = @transform_1, window_bounds = array<i64: 3, 3, 4, 8>}, {transform_indices = @transform_2, window_bounds = array<i64: 1, 8, 16, 8>}, {transform_indices = @transform_3, window_bounds = array<i64: 1, 1, 2, 8>}]} {
    %c8_i32 = arith.constant 8 : i32
    %0 = arith.muli %arg1, %c8_i32 : i32
    %1 = tpu.assume_multiple %0, 8 : i32
    %c0_i32 = arith.constant 0 : i32
    %2 = arith.addi %1, %c0_i32 : i32
    %c0 = arith.constant 0 : index
    %3 = arith.index_cast %2 : i32 to index
    %c0_0 = arith.constant 0 : index
    %c0_1 = arith.constant 0 : index
    %4 = vector.load %arg2[%c0, %3, %c0_0, %c0_1] : memref<1x18x18x20xbf16, #tpu.memory_space<vmem>>, vector<1x8x16x4xbf16>
    %5 = vector.shape_cast %4 : vector<1x8x16x4xbf16> to vector<8x16x4xbf16>
    %6 = vector.shape_cast %5 : vector<8x16x4xbf16> to vector<128x4xbf16>
    %c0_2 = arith.constant 0 : index
    %c0_3 = arith.constant 0 : index
    %c0_4 = arith.constant 0 : index
    %c0_5 = arith.constant 0 : index
    %7 = vector.load %arg3[%c0_2, %c0_3, %c0_4, %c0_5] : memref<3x3x4x8xbf16, #tpu.memory_space<vmem>>, vector<1x1x4x8xbf16>
    %8 = vector.shape_cast %7 : vector<1x1x4x8xbf16> to vector<4x8xbf16>
    %cst = arith.constant dense<0.000000e+00> : vector<128x8xf32>
    %9 = tpu.matmul %6, %8, %cst {dimension_numbers = #tpu.dot_dimension_numbers<[1], [0], [0], [1], [0, 0, 1, 1], [], []>} : vector<128x4xbf16>, vector<4x8xbf16>, vector<128x8xf32> -> vector<128x8xf32>
    %c0_i32_6 = arith.constant 0 : i32
    %10 = arith.addi %1, %c0_i32_6 : i32
    %c0_7 = arith.constant 0 : index
    %11 = arith.index_cast %10 : i32 to index
    %c1 = arith.constant 1 : index
    %c0_8 = arith.constant 0 : index
    %12 = vector.load %arg2[%c0_7, %11, %c1, %c0_8] : memref<1x18x18x20xbf16, #tpu.memory_space<vmem>>, vector<1x8x16x4xbf16>
    %13 = vector.shape_cast %12 : vector<1x8x16x4xbf16> to vector<8x16x4xbf16>
    %14 = vector.shape_cast %13 : vector<8x16x4xbf16> to vector<128x4xbf16>
    %c0_9 = arith.constant 0 : index
    %c1_10 = arith.constant 1 : index
    %c0_11 = arith.constant 0 : index
    %c0_12 = arith.constant 0 : index
    %15 = vector.load %arg3[%c0_9, %c1_10, %c0_11, %c0_12] : memref<3x3x4x8xbf16, #tpu.memory_space<vmem>>, vector<1x1x4x8xbf16>
    %16 = vector.shape_cast %15 : vector<1x1x4x8xbf16> to vector<4x8xbf16>
    %cst_13 = arith.constant dense<0.000000e+00> : vector<128x8xf32>
    %17 = tpu.matmul %14, %16, %cst_13 {dimension_numbers = #tpu.dot_dimension_numbers<[1], [0], [0], [1], [0, 0, 1, 1], [], []>} : vector<128x4xbf16>, vector<4x8xbf16>, vector<128x8xf32> -> vector<128x8xf32>
    %18 = arith.addf %9, %17 : vector<128x8xf32>
    %c0_i32_14 = arith.constant 0 : i32
    %19 = arith.addi %1, %c0_i32_14 : i32
    %c0_15 = arith.constant 0 : index
    %20 = arith.index_cast %19 : i32 to index
    %c2 = arith.constant 2 : index
    %c0_16 = arith.constant 0 : index
    %21 = vector.load %arg2[%c0_15, %20, %c2, %c0_16] : memref<1x18x18x20xbf16, #tpu.memory_space<vmem>>, vector<1x8x16x4xbf16>
    %22 = vector.shape_cast %21 : vector<1x8x16x4xbf16> to vector<8x16x4xbf16>
    %23 = vector.shape_cast %22 : vector<8x16x4xbf16> to vector<128x4xbf16>
    %c0_17 = arith.constant 0 : index
    %c2_18 = arith.constant 2 : index
    %c0_19 = arith.constant 0 : index
    %c0_20 = arith.constant 0 : index
    %24 = vector.load %arg3[%c0_17, %c2_18, %c0_19, %c0_20] : memref<3x3x4x8xbf16, #tpu.memory_space<vmem>>, vector<1x1x4x8xbf16>
    %25 = vector.shape_cast %24 : vector<1x1x4x8xbf16> to vector<4x8xbf16>
    %cst_21 = arith.constant dense<0.000000e+00> : vector<128x8xf32>
    %26 = tpu.matmul %23, %25, %cst_21 {dimension_numbers = #tpu.dot_dimension_numbers<[1], [0], [0], [1], [0, 0, 1, 1], [], []>} : vector<128x4xbf16>, vector<4x8xbf16>, vector<128x8xf32> -> vector<128x8xf32>
    %27 = arith.addf %18, %26 : vector<128x8xf32>
    %c1_i32 = arith.constant 1 : i32
    %28 = arith.addi %1, %c1_i32 : i32
    %c0_22 = arith.constant 0 : index
    %29 = arith.index_cast %28 : i32 to index
    %c0_23 = arith.constant 0 : index
    %c0_24 = arith.constant 0 : index
    %30 = vector.load %arg2[%c0_22, %29, %c0_23, %c0_24] : memref<1x18x18x20xbf16, #tpu.memory_space<vmem>>, vector<1x8x16x4xbf16>
    %31 = vector.shape_cast %30 : vector<1x8x16x4xbf16> to vector<8x16x4xbf16>
    %32 = vector.shape_cast %31 : vector<8x16x4xbf16> to vector<128x4xbf16>
    %c1_25 = arith.constant 1 : index
    %c0_26 = arith.constant 0 : index
    %c0_27 = arith.constant 0 : index
    %c0_28 = arith.constant 0 : index
    %33 = vector.load %arg3[%c1_25, %c0_26, %c0_27, %c0_28] : memref<3x3x4x8xbf16, #tpu.memory_space<vmem>>, vector<1x1x4x8xbf16>
    %34 = vector.shape_cast %33 : vector<1x1x4x8xbf16> to vector<4x8xbf16>
    %cst_29 = arith.constant dense<0.000000e+00> : vector<128x8xf32>
    %35 = tpu.matmul %32, %34, %cst_29 {dimension_numbers = #tpu.dot_dimension_numbers<[1], [0], [0], [1], [0, 0, 1, 1], [], []>} : vector<128x4xbf16>, vector<4x8xbf16>, vector<128x8xf32> -> vector<128x8xf32>
    %36 = arith.addf %27, %35 : vector<128x8xf32>
    %c1_i32_30 = arith.constant 1 : i32
    %37 = arith.addi %1, %c1_i32_30 : i32
    %c0_31 = arith.constant 0 : index
    %38 = arith.index_cast %37 : i32 to index
    %c1_32 = arith.constant 1 : index
    %c0_33 = arith.constant 0 : index
    %39 = vector.load %arg2[%c0_31, %38, %c1_32, %c0_33] : memref<1x18x18x20xbf16, #tpu.memory_space<vmem>>, vector<1x8x16x4xbf16>
    %40 = vector.shape_cast %39 : vector<1x8x16x4xbf16> to vector<8x16x4xbf16>
    %41 = vector.shape_cast %40 : vector<8x16x4xbf16> to vector<128x4xbf16>
    %c1_34 = arith.constant 1 : index
    %c1_35 = arith.constant 1 : index
    %c0_36 = arith.constant 0 : index
    %c0_37 = arith.constant 0 : index
    %42 = vector.load %arg3[%c1_34, %c1_35, %c0_36, %c0_37] : memref<3x3x4x8xbf16, #tpu.memory_space<vmem>>, vector<1x1x4x8xbf16>
    %43 = vector.shape_cast %42 : vector<1x1x4x8xbf16> to vector<4x8xbf16>
    %cst_38 = arith.constant dense<0.000000e+00> : vector<128x8xf32>
    %44 = tpu.matmul %41, %43, %cst_38 {dimension_numbers = #tpu.dot_dimension_numbers<[1], [0], [0], [1], [0, 0, 1, 1], [], []>} : vector<128x4xbf16>, vector<4x8xbf16>, vector<128x8xf32> -> vector<128x8xf32>
    %45 = arith.addf %36, %44 : vector<128x8xf32>
    %c1_i32_39 = arith.constant 1 : i32
    %46 = arith.addi %1, %c1_i32_39 : i32
    %c0_40 = arith.constant 0 : index
    %47 = arith.index_cast %46 : i32 to index
    %c2_41 = arith.constant 2 : index
    %c0_42 = arith.constant 0 : index
    %48 = vector.load %arg2[%c0_40, %47, %c2_41, %c0_42] : memref<1x18x18x20xbf16, #tpu.memory_space<vmem>>, vector<1x8x16x4xbf16>
    %49 = vector.shape_cast %48 : vector<1x8x16x4xbf16> to vector<8x16x4xbf16>
    %50 = vector.shape_cast %49 : vector<8x16x4xbf16> to vector<128x4xbf16>
    %c1_43 = arith.constant 1 : index
    %c2_44 = arith.constant 2 : index
    %c0_45 = arith.constant 0 : index
    %c0_46 = arith.constant 0 : index
    %51 = vector.load %arg3[%c1_43, %c2_44, %c0_45, %c0_46] : memref<3x3x4x8xbf16, #tpu.memory_space<vmem>>, vector<1x1x4x8xbf16>
    %52 = vector.shape_cast %51 : vector<1x1x4x8xbf16> to vector<4x8xbf16>
    %cst_47 = arith.constant dense<0.000000e+00> : vector<128x8xf32>
    %53 = tpu.matmul %50, %52, %cst_47 {dimension_numbers = #tpu.dot_dimension_numbers<[1], [0], [0], [1], [0, 0, 1, 1], [], []>} : vector<128x4xbf16>, vector<4x8xbf16>, vector<128x8xf32> -> vector<128x8xf32>
    %54 = arith.addf %45, %53 : vector<128x8xf32>
    %c2_i32 = arith.constant 2 : i32
    %55 = arith.addi %1, %c2_i32 : i32
    %c0_48 = arith.constant 0 : index
    %56 = arith.index_cast %55 : i32 to index
    %c0_49 = arith.constant 0 : index
    %c0_50 = arith.constant 0 : index
    %57 = vector.load %arg2[%c0_48, %56, %c0_49, %c0_50] : memref<1x18x18x20xbf16, #tpu.memory_space<vmem>>, vector<1x8x16x4xbf16>
    %58 = vector.shape_cast %57 : vector<1x8x16x4xbf16> to vector<8x16x4xbf16>
    %59 = vector.shape_cast %58 : vector<8x16x4xbf16> to vector<128x4xbf16>
    %c2_51 = arith.constant 2 : index
    %c0_52 = arith.constant 0 : index
    %c0_53 = arith.constant 0 : index
    %c0_54 = arith.constant 0 : index
    %60 = vector.load %arg3[%c2_51, %c0_52, %c0_53, %c0_54] : memref<3x3x4x8xbf16, #tpu.memory_space<vmem>>, vector<1x1x4x8xbf16>
    %61 = vector.shape_cast %60 : vector<1x1x4x8xbf16> to vector<4x8xbf16>
    %cst_55 = arith.constant dense<0.000000e+00> : vector<128x8xf32>
    %62 = tpu.matmul %59, %61, %cst_55 {dimension_numbers = #tpu.dot_dimension_numbers<[1], [0], [0], [1], [0, 0, 1, 1], [], []>} : vector<128x4xbf16>, vector<4x8xbf16>, vector<128x8xf32> -> vector<128x8xf32>
    %63 = arith.addf %54, %62 : vector<128x8xf32>
    %c2_i32_56 = arith.constant 2 : i32
    %64 = arith.addi %1, %c2_i32_56 : i32
    %c0_57 = arith.constant 0 : index
    %65 = arith.index_cast %64 : i32 to index
    %c1_58 = arith.constant 1 : index
    %c0_59 = arith.constant 0 : index
    %66 = vector.load %arg2[%c0_57, %65, %c1_58, %c0_59] : memref<1x18x18x20xbf16, #tpu.memory_space<vmem>>, vector<1x8x16x4xbf16>
    %67 = vector.shape_cast %66 : vector<1x8x16x4xbf16> to vector<8x16x4xbf16>
    %68 = vector.shape_cast %67 : vector<8x16x4xbf16> to vector<128x4xbf16>
    %c2_60 = arith.constant 2 : index
    %c1_61 = arith.constant 1 : index
    %c0_62 = arith.constant 0 : index
    %c0_63 = arith.constant 0 : index
    %69 = vector.load %arg3[%c2_60, %c1_61, %c0_62, %c0_63] : memref<3x3x4x8xbf16, #tpu.memory_space<vmem>>, vector<1x1x4x8xbf16>
    %70 = vector.shape_cast %69 : vector<1x1x4x8xbf16> to vector<4x8xbf16>
    %cst_64 = arith.constant dense<0.000000e+00> : vector<128x8xf32>
    %71 = tpu.matmul %68, %70, %cst_64 {dimension_numbers = #tpu.dot_dimension_numbers<[1], [0], [0], [1], [0, 0, 1, 1], [], []>} : vector<128x4xbf16>, vector<4x8xbf16>, vector<128x8xf32> -> vector<128x8xf32>
    %72 = arith.addf %63, %71 : vector<128x8xf32>
    %c2_i32_65 = arith.constant 2 : i32
    %73 = arith.addi %1, %c2_i32_65 : i32
    %c0_66 = arith.constant 0 : index
    %74 = arith.index_cast %73 : i32 to index
    %c2_67 = arith.constant 2 : index
    %c0_68 = arith.constant 0 : index
    %75 = vector.load %arg2[%c0_66, %74, %c2_67, %c0_68] : memref<1x18x18x20xbf16, #tpu.memory_space<vmem>>, vector<1x8x16x4xbf16>
    %76 = vector.shape_cast %75 : vector<1x8x16x4xbf16> to vector<8x16x4xbf16>
    %77 = vector.shape_cast %76 : vector<8x16x4xbf16> to vector<128x4xbf16>
    %c2_69 = arith.constant 2 : index
    %c2_70 = arith.constant 2 : index
    %c0_71 = arith.constant 0 : index
    %c0_72 = arith.constant 0 : index
    %78 = vector.load %arg3[%c2_69, %c2_70, %c0_71, %c0_72] : memref<3x3x4x8xbf16, #tpu.memory_space<vmem>>, vector<1x1x4x8xbf16>
    %79 = vector.shape_cast %78 : vector<1x1x4x8xbf16> to vector<4x8xbf16>
    %cst_73 = arith.constant dense<0.000000e+00> : vector<128x8xf32>
    %80 = tpu.matmul %77, %79, %cst_73 {dimension_numbers = #tpu.dot_dimension_numbers<[1], [0], [0], [1], [0, 0, 1, 1], [], []>} : vector<128x4xbf16>, vector<4x8xbf16>, vector<128x8xf32> -> vector<128x8xf32>
    %81 = arith.addf %72, %80 : vector<128x8xf32>
    %82 = vector.shape_cast %81 : vector<128x8xf32> to vector<1x8x16x8xf32>
    %c0_74 = arith.constant 0 : index
    %c0_75 = arith.constant 0 : index
    %c0_76 = arith.constant 0 : index
    %c0_77 = arith.constant 0 : index
    %83 = vector.load %arg4[%c0_74, %c0_75, %c0_76, %c0_77] : memref<1x8x16x8xf32, #tpu.memory_space<vmem>>, vector<1x8x16x8xf32>
    tpu.vector_store %arg4[%c0_74, %c0_75, %c0_76, %c0_77], %82 {strides = array<i32>} : memref<1x8x16x8xf32, #tpu.memory_space<vmem>>, vector<1x8x16x8xf32>,
    %cst_78 = arith.constant dense<0.000000e+00> : vector<8xf32>
    %84 = vector.multi_reduction <add>, %81, %cst_78 [0] : vector<128x8xf32> to vector<8xf32>
    %85 = vector.shape_cast %84 : vector<8xf32> to vector<1x8xf32>
    %cst_79 = arith.constant 7.812500e-03 : f32
    %86 = vector.broadcast %cst_79 : f32 to vector<1x8xf32>
    %87 = arith.mulf %85, %86 : vector<1x8xf32>
    %88 = vector.broadcast %87 : vector<1x8xf32> to vector<128x8xf32>
    %89 = arith.subf %81, %88 : vector<128x8xf32>
    %90 = arith.mulf %89, %89 : vector<128x8xf32>
    %cst_80 = arith.constant dense<0.000000e+00> : vector<8xf32>
    %91 = vector.multi_reduction <add>, %90, %cst_80 [0] : vector<128x8xf32> to vector<8xf32>
    %92 = vector.shape_cast %91 : vector<8xf32> to vector<1x8xf32>
    %93 = tpu.concatenate %85, %92 in 0 : vector<1x8xf32>, vector<1x8xf32> -> vector<2x8xf32>
    %94 = vector.shape_cast %93 : vector<2x8xf32> to vector<1x1x2x8xf32>
    %c0_81 = arith.constant 0 : index
    %c0_82 = arith.constant 0 : index
    %c0_83 = arith.constant 0 : index
    %c0_84 = arith.constant 0 : index
    %95 = vector.load %arg5[%c0_81, %c0_82, %c0_83, %c0_84] : memref<1x1x2x8xf32, #tpu.memory_space<vmem>>, vector<1x1x2x8xf32>
    tpu.vector_store %arg5[%c0_81, %c0_82, %c0_83, %c0_84], %94 {strides = array<i32>} : memref<1x1x2x8xf32, #tpu.memory_space<vmem>>, vector<1x1x2x8xf32>,
    return
  }
  func.func @transform_0(%arg0: i32, %arg1: i32) -> (i32, i32, i32, i32) {
    %c0_i32 = arith.constant 0 : i32
    %c0_i32_0 = arith.constant 0 : i32
    %c0_i32_1 = arith.constant 0 : i32
    %c0_i32_2 = arith.constant 0 : i32
    return %arg0, %c0_i32, %c0_i32_0, %c0_i32_1 : i32, i32, i32, i32
  }
  func.func @transform_1(%arg0: i32, %arg1: i32) -> (i32, i32, i32, i32) {
    %c0_i32 = arith.constant 0 : i32
    %c0_i32_0 = arith.constant 0 : i32
    %c0_i32_1 = arith.constant 0 : i32
    %c0_i32_2 = arith.constant 0 : i32
    %c0_i32_3 = arith.constant 0 : i32
    return %c0_i32, %c0_i32_0, %c0_i32_1, %c0_i32_2 : i32, i32, i32, i32
  }
  func.func @transform_2(%arg0: i32, %arg1: i32) -> (i32, i32, i32, i32) {
    %c0_i32 = arith.constant 0 : i32
    %c0_i32_0 = arith.constant 0 : i32
    %c0_i32_1 = arith.constant 0 : i32
    return %arg0, %arg1, %c0_i32, %c0_i32_0 : i32, i32, i32, i32
  }
  func.func @transform_3(%arg0: i32, %arg1: i32) -> (i32, i32, i32, i32) {
    %c0_i32 = arith.constant 0 : i32
    %c0_i32_0 = arith.constant 0 : i32
    %c0_i32_1 = arith.constant 0 : i32
    return %arg0, %arg1, %c0_i32, %c0_i32_0 : i32, i32, i32, i32
  }
}

module attributes {stable_mosaic.version = 11 : i64} {
  func.func @_bn_relu_kernel(%arg0: i32, %arg1: memref<1x16x128xf32, #tpu.memory_space<vmem>>, %arg2: memref<1x1x128xf32, #tpu.memory_space<vmem>>, %arg3: memref<1x1x128xf32, #tpu.memory_space<vmem>>, %arg4: memref<1x16x128xbf16, #tpu.memory_space<vmem>>) attributes {dimension_semantics = [#tpu.dimension_semantics<parallel>], iteration_bounds = array<i64: 2>, scalar_prefetch = 0 : i64, scratch_operands = 0 : i64, tpu.core_type = #tpu.core_type<tc>, window_params = [{transform_indices = @transform_0, window_bounds = array<i64: 1, 16, 128>}, {pipeline_mode = #tpu.pipeline_mode<synchronous>, transform_indices = @transform_1, window_bounds = array<i64: 1, 1, 128>}, {pipeline_mode = #tpu.pipeline_mode<synchronous>, transform_indices = @transform_2, window_bounds = array<i64: 1, 1, 128>}, {transform_indices = @transform_3, window_bounds = array<i64: 1, 16, 128>}]} {
    %c0 = arith.constant 0 : index
    %c0_0 = arith.constant 0 : index
    %c0_1 = arith.constant 0 : index
    %0 = vector.load %arg1[%c0, %c0_0, %c0_1] : memref<1x16x128xf32, #tpu.memory_space<vmem>>, vector<1x16x128xf32>
    %c0_2 = arith.constant 0 : index
    %c0_3 = arith.constant 0 : index
    %c0_4 = arith.constant 0 : index
    %1 = vector.load %arg2[%c0_2, %c0_3, %c0_4] : memref<1x1x128xf32, #tpu.memory_space<vmem>>, vector<1x1x128xf32>
    %2 = vector.broadcast %1 : vector<1x1x128xf32> to vector<1x16x128xf32>
    %3 = arith.mulf %0, %2 : vector<1x16x128xf32>
    %c0_5 = arith.constant 0 : index
    %c0_6 = arith.constant 0 : index
    %c0_7 = arith.constant 0 : index
    %4 = vector.load %arg3[%c0_5, %c0_6, %c0_7] : memref<1x1x128xf32, #tpu.memory_space<vmem>>, vector<1x1x128xf32>
    %5 = vector.broadcast %4 : vector<1x1x128xf32> to vector<1x16x128xf32>
    %6 = arith.addf %3, %5 : vector<1x16x128xf32>
    %cst = arith.constant 0.000000e+00 : f32
    %7 = vector.broadcast %cst : f32 to vector<1x16x128xf32>
    %8 = arith.maximumf %6, %7 : vector<1x16x128xf32>
    %9 = arith.truncf %8 : vector<1x16x128xf32> to vector<1x16x128xbf16>
    %c0_8 = arith.constant 0 : index
    %c0_9 = arith.constant 0 : index
    %c0_10 = arith.constant 0 : index
    %10 = vector.load %arg4[%c0_8, %c0_9, %c0_10] : memref<1x16x128xbf16, #tpu.memory_space<vmem>>, vector<1x16x128xbf16>
    tpu.vector_store %arg4[%c0_8, %c0_9, %c0_10], %9 {strides = array<i32>} : memref<1x16x128xbf16, #tpu.memory_space<vmem>>, vector<1x16x128xbf16>,
    return
  }
  func.func @transform_0(%arg0: i32) -> (i32, i32, i32) {
    %c0_i32 = arith.constant 0 : i32
    %c0_i32_0 = arith.constant 0 : i32
    %c0_i32_1 = arith.constant 0 : i32
    return %arg0, %c0_i32, %c0_i32_0 : i32, i32, i32
  }
  func.func @transform_1(%arg0: i32) -> (i32, i32, i32) {
    %c0_i32 = arith.constant 0 : i32
    %c0_i32_0 = arith.constant 0 : i32
    %c0_i32_1 = arith.constant 0 : i32
    %c0_i32_2 = arith.constant 0 : i32
    return %c0_i32, %c0_i32_0, %c0_i32_1 : i32, i32, i32
  }
  func.func @transform_2(%arg0: i32) -> (i32, i32, i32) {
    %c0_i32 = arith.constant 0 : i32
    %c0_i32_0 = arith.constant 0 : i32
    %c0_i32_1 = arith.constant 0 : i32
    %c0_i32_2 = arith.constant 0 : i32
    return %c0_i32, %c0_i32_0, %c0_i32_1 : i32, i32, i32
  }
  func.func @transform_3(%arg0: i32) -> (i32, i32, i32) {
    %c0_i32 = arith.constant 0 : i32
    %c0_i32_0 = arith.constant 0 : i32
    %c0_i32_1 = arith.constant 0 : i32
    return %arg0, %c0_i32, %c0_i32_0 : i32, i32, i32
  }
}

module attributes {stable_mosaic.version = 11 : i64} {
  func.func @_conv_stats_kernel(%arg0: i32, %arg1: i32, %arg2: memref<1x18x18x20xbf16, #tpu.memory_space<vmem>>, %arg3: memref<3x3x12x8xbf16, #tpu.memory_space<vmem>>, %arg4: memref<1x8x16x8xf32, #tpu.memory_space<vmem>>, %arg5: memref<1x1x2x8xf32, #tpu.memory_space<vmem>>) attributes {dimension_semantics = [#tpu.dimension_semantics<parallel>, #tpu.dimension_semantics<parallel>], iteration_bounds = array<i64: 2, 2>, scalar_prefetch = 0 : i64, scratch_operands = 0 : i64, tpu.core_type = #tpu.core_type<tc>, window_params = [{transform_indices = @transform_0, window_bounds = array<i64: 1, 18, 18, 20>}, {pipeline_mode = #tpu.pipeline_mode<synchronous>, transform_indices = @transform_1, window_bounds = array<i64: 3, 3, 12, 8>}, {transform_indices = @transform_2, window_bounds = array<i64: 1, 8, 16, 8>}, {transform_indices = @transform_3, window_bounds = array<i64: 1, 1, 2, 8>}]} {
    %c8_i32 = arith.constant 8 : i32
    %0 = arith.muli %arg1, %c8_i32 : i32
    %1 = tpu.assume_multiple %0, 8 : i32
    %c0_i32 = arith.constant 0 : i32
    %2 = arith.addi %1, %c0_i32 : i32
    %c0 = arith.constant 0 : index
    %3 = arith.index_cast %2 : i32 to index
    %c0_0 = arith.constant 0 : index
    %c0_1 = arith.constant 0 : index
    %4 = vector.load %arg2[%c0, %3, %c0_0, %c0_1] : memref<1x18x18x20xbf16, #tpu.memory_space<vmem>>, vector<1x8x16x12xbf16>
    %5 = vector.shape_cast %4 : vector<1x8x16x12xbf16> to vector<8x16x12xbf16>
    %6 = vector.shape_cast %5 : vector<8x16x12xbf16> to vector<128x12xbf16>
    %c0_2 = arith.constant 0 : index
    %c0_3 = arith.constant 0 : index
    %c0_4 = arith.constant 0 : index
    %c0_5 = arith.constant 0 : index
    %7 = vector.load %arg3[%c0_2, %c0_3, %c0_4, %c0_5] : memref<3x3x12x8xbf16, #tpu.memory_space<vmem>>, vector<1x1x12x8xbf16>
    %8 = vector.shape_cast %7 : vector<1x1x12x8xbf16> to vector<12x8xbf16>
    %cst = arith.constant dense<0.000000e+00> : vector<128x8xf32>
    %9 = tpu.matmul %6, %8, %cst {dimension_numbers = #tpu.dot_dimension_numbers<[1], [0], [0], [1], [0, 0, 1, 1], [], []>} : vector<128x12xbf16>, vector<12x8xbf16>, vector<128x8xf32> -> vector<128x8xf32>
    %c0_i32_6 = arith.constant 0 : i32
    %10 = arith.addi %1, %c0_i32_6 : i32
    %c0_7 = arith.constant 0 : index
    %11 = arith.index_cast %10 : i32 to index
    %c1 = arith.constant 1 : index
    %c0_8 = arith.constant 0 : index
    %12 = vector.load %arg2[%c0_7, %11, %c1, %c0_8] : memref<1x18x18x20xbf16, #tpu.memory_space<vmem>>, vector<1x8x16x12xbf16>
    %13 = vector.shape_cast %12 : vector<1x8x16x12xbf16> to vector<8x16x12xbf16>
    %14 = vector.shape_cast %13 : vector<8x16x12xbf16> to vector<128x12xbf16>
    %c0_9 = arith.constant 0 : index
    %c1_10 = arith.constant 1 : index
    %c0_11 = arith.constant 0 : index
    %c0_12 = arith.constant 0 : index
    %15 = vector.load %arg3[%c0_9, %c1_10, %c0_11, %c0_12] : memref<3x3x12x8xbf16, #tpu.memory_space<vmem>>, vector<1x1x12x8xbf16>
    %16 = vector.shape_cast %15 : vector<1x1x12x8xbf16> to vector<12x8xbf16>
    %cst_13 = arith.constant dense<0.000000e+00> : vector<128x8xf32>
    %17 = tpu.matmul %14, %16, %cst_13 {dimension_numbers = #tpu.dot_dimension_numbers<[1], [0], [0], [1], [0, 0, 1, 1], [], []>} : vector<128x12xbf16>, vector<12x8xbf16>, vector<128x8xf32> -> vector<128x8xf32>
    %18 = arith.addf %9, %17 : vector<128x8xf32>
    %c0_i32_14 = arith.constant 0 : i32
    %19 = arith.addi %1, %c0_i32_14 : i32
    %c0_15 = arith.constant 0 : index
    %20 = arith.index_cast %19 : i32 to index
    %c2 = arith.constant 2 : index
    %c0_16 = arith.constant 0 : index
    %21 = vector.load %arg2[%c0_15, %20, %c2, %c0_16] : memref<1x18x18x20xbf16, #tpu.memory_space<vmem>>, vector<1x8x16x12xbf16>
    %22 = vector.shape_cast %21 : vector<1x8x16x12xbf16> to vector<8x16x12xbf16>
    %23 = vector.shape_cast %22 : vector<8x16x12xbf16> to vector<128x12xbf16>
    %c0_17 = arith.constant 0 : index
    %c2_18 = arith.constant 2 : index
    %c0_19 = arith.constant 0 : index
    %c0_20 = arith.constant 0 : index
    %24 = vector.load %arg3[%c0_17, %c2_18, %c0_19, %c0_20] : memref<3x3x12x8xbf16, #tpu.memory_space<vmem>>, vector<1x1x12x8xbf16>
    %25 = vector.shape_cast %24 : vector<1x1x12x8xbf16> to vector<12x8xbf16>
    %cst_21 = arith.constant dense<0.000000e+00> : vector<128x8xf32>
    %26 = tpu.matmul %23, %25, %cst_21 {dimension_numbers = #tpu.dot_dimension_numbers<[1], [0], [0], [1], [0, 0, 1, 1], [], []>} : vector<128x12xbf16>, vector<12x8xbf16>, vector<128x8xf32> -> vector<128x8xf32>
    %27 = arith.addf %18, %26 : vector<128x8xf32>
    %c1_i32 = arith.constant 1 : i32
    %28 = arith.addi %1, %c1_i32 : i32
    %c0_22 = arith.constant 0 : index
    %29 = arith.index_cast %28 : i32 to index
    %c0_23 = arith.constant 0 : index
    %c0_24 = arith.constant 0 : index
    %30 = vector.load %arg2[%c0_22, %29, %c0_23, %c0_24] : memref<1x18x18x20xbf16, #tpu.memory_space<vmem>>, vector<1x8x16x12xbf16>
    %31 = vector.shape_cast %30 : vector<1x8x16x12xbf16> to vector<8x16x12xbf16>
    %32 = vector.shape_cast %31 : vector<8x16x12xbf16> to vector<128x12xbf16>
    %c1_25 = arith.constant 1 : index
    %c0_26 = arith.constant 0 : index
    %c0_27 = arith.constant 0 : index
    %c0_28 = arith.constant 0 : index
    %33 = vector.load %arg3[%c1_25, %c0_26, %c0_27, %c0_28] : memref<3x3x12x8xbf16, #tpu.memory_space<vmem>>, vector<1x1x12x8xbf16>
    %34 = vector.shape_cast %33 : vector<1x1x12x8xbf16> to vector<12x8xbf16>
    %cst_29 = arith.constant dense<0.000000e+00> : vector<128x8xf32>
    %35 = tpu.matmul %32, %34, %cst_29 {dimension_numbers = #tpu.dot_dimension_numbers<[1], [0], [0], [1], [0, 0, 1, 1], [], []>} : vector<128x12xbf16>, vector<12x8xbf16>, vector<128x8xf32> -> vector<128x8xf32>
    %36 = arith.addf %27, %35 : vector<128x8xf32>
    %c1_i32_30 = arith.constant 1 : i32
    %37 = arith.addi %1, %c1_i32_30 : i32
    %c0_31 = arith.constant 0 : index
    %38 = arith.index_cast %37 : i32 to index
    %c1_32 = arith.constant 1 : index
    %c0_33 = arith.constant 0 : index
    %39 = vector.load %arg2[%c0_31, %38, %c1_32, %c0_33] : memref<1x18x18x20xbf16, #tpu.memory_space<vmem>>, vector<1x8x16x12xbf16>
    %40 = vector.shape_cast %39 : vector<1x8x16x12xbf16> to vector<8x16x12xbf16>
    %41 = vector.shape_cast %40 : vector<8x16x12xbf16> to vector<128x12xbf16>
    %c1_34 = arith.constant 1 : index
    %c1_35 = arith.constant 1 : index
    %c0_36 = arith.constant 0 : index
    %c0_37 = arith.constant 0 : index
    %42 = vector.load %arg3[%c1_34, %c1_35, %c0_36, %c0_37] : memref<3x3x12x8xbf16, #tpu.memory_space<vmem>>, vector<1x1x12x8xbf16>
    %43 = vector.shape_cast %42 : vector<1x1x12x8xbf16> to vector<12x8xbf16>
    %cst_38 = arith.constant dense<0.000000e+00> : vector<128x8xf32>
    %44 = tpu.matmul %41, %43, %cst_38 {dimension_numbers = #tpu.dot_dimension_numbers<[1], [0], [0], [1], [0, 0, 1, 1], [], []>} : vector<128x12xbf16>, vector<12x8xbf16>, vector<128x8xf32> -> vector<128x8xf32>
    %45 = arith.addf %36, %44 : vector<128x8xf32>
    %c1_i32_39 = arith.constant 1 : i32
    %46 = arith.addi %1, %c1_i32_39 : i32
    %c0_40 = arith.constant 0 : index
    %47 = arith.index_cast %46 : i32 to index
    %c2_41 = arith.constant 2 : index
    %c0_42 = arith.constant 0 : index
    %48 = vector.load %arg2[%c0_40, %47, %c2_41, %c0_42] : memref<1x18x18x20xbf16, #tpu.memory_space<vmem>>, vector<1x8x16x12xbf16>
    %49 = vector.shape_cast %48 : vector<1x8x16x12xbf16> to vector<8x16x12xbf16>
    %50 = vector.shape_cast %49 : vector<8x16x12xbf16> to vector<128x12xbf16>
    %c1_43 = arith.constant 1 : index
    %c2_44 = arith.constant 2 : index
    %c0_45 = arith.constant 0 : index
    %c0_46 = arith.constant 0 : index
    %51 = vector.load %arg3[%c1_43, %c2_44, %c0_45, %c0_46] : memref<3x3x12x8xbf16, #tpu.memory_space<vmem>>, vector<1x1x12x8xbf16>
    %52 = vector.shape_cast %51 : vector<1x1x12x8xbf16> to vector<12x8xbf16>
    %cst_47 = arith.constant dense<0.000000e+00> : vector<128x8xf32>
    %53 = tpu.matmul %50, %52, %cst_47 {dimension_numbers = #tpu.dot_dimension_numbers<[1], [0], [0], [1], [0, 0, 1, 1], [], []>} : vector<128x12xbf16>, vector<12x8xbf16>, vector<128x8xf32> -> vector<128x8xf32>
    %54 = arith.addf %45, %53 : vector<128x8xf32>
    %c2_i32 = arith.constant 2 : i32
    %55 = arith.addi %1, %c2_i32 : i32
    %c0_48 = arith.constant 0 : index
    %56 = arith.index_cast %55 : i32 to index
    %c0_49 = arith.constant 0 : index
    %c0_50 = arith.constant 0 : index
    %57 = vector.load %arg2[%c0_48, %56, %c0_49, %c0_50] : memref<1x18x18x20xbf16, #tpu.memory_space<vmem>>, vector<1x8x16x12xbf16>
    %58 = vector.shape_cast %57 : vector<1x8x16x12xbf16> to vector<8x16x12xbf16>
    %59 = vector.shape_cast %58 : vector<8x16x12xbf16> to vector<128x12xbf16>
    %c2_51 = arith.constant 2 : index
    %c0_52 = arith.constant 0 : index
    %c0_53 = arith.constant 0 : index
    %c0_54 = arith.constant 0 : index
    %60 = vector.load %arg3[%c2_51, %c0_52, %c0_53, %c0_54] : memref<3x3x12x8xbf16, #tpu.memory_space<vmem>>, vector<1x1x12x8xbf16>
    %61 = vector.shape_cast %60 : vector<1x1x12x8xbf16> to vector<12x8xbf16>
    %cst_55 = arith.constant dense<0.000000e+00> : vector<128x8xf32>
    %62 = tpu.matmul %59, %61, %cst_55 {dimension_numbers = #tpu.dot_dimension_numbers<[1], [0], [0], [1], [0, 0, 1, 1], [], []>} : vector<128x12xbf16>, vector<12x8xbf16>, vector<128x8xf32> -> vector<128x8xf32>
    %63 = arith.addf %54, %62 : vector<128x8xf32>
    %c2_i32_56 = arith.constant 2 : i32
    %64 = arith.addi %1, %c2_i32_56 : i32
    %c0_57 = arith.constant 0 : index
    %65 = arith.index_cast %64 : i32 to index
    %c1_58 = arith.constant 1 : index
    %c0_59 = arith.constant 0 : index
    %66 = vector.load %arg2[%c0_57, %65, %c1_58, %c0_59] : memref<1x18x18x20xbf16, #tpu.memory_space<vmem>>, vector<1x8x16x12xbf16>
    %67 = vector.shape_cast %66 : vector<1x8x16x12xbf16> to vector<8x16x12xbf16>
    %68 = vector.shape_cast %67 : vector<8x16x12xbf16> to vector<128x12xbf16>
    %c2_60 = arith.constant 2 : index
    %c1_61 = arith.constant 1 : index
    %c0_62 = arith.constant 0 : index
    %c0_63 = arith.constant 0 : index
    %69 = vector.load %arg3[%c2_60, %c1_61, %c0_62, %c0_63] : memref<3x3x12x8xbf16, #tpu.memory_space<vmem>>, vector<1x1x12x8xbf16>
    %70 = vector.shape_cast %69 : vector<1x1x12x8xbf16> to vector<12x8xbf16>
    %cst_64 = arith.constant dense<0.000000e+00> : vector<128x8xf32>
    %71 = tpu.matmul %68, %70, %cst_64 {dimension_numbers = #tpu.dot_dimension_numbers<[1], [0], [0], [1], [0, 0, 1, 1], [], []>} : vector<128x12xbf16>, vector<12x8xbf16>, vector<128x8xf32> -> vector<128x8xf32>
    %72 = arith.addf %63, %71 : vector<128x8xf32>
    %c2_i32_65 = arith.constant 2 : i32
    %73 = arith.addi %1, %c2_i32_65 : i32
    %c0_66 = arith.constant 0 : index
    %74 = arith.index_cast %73 : i32 to index
    %c2_67 = arith.constant 2 : index
    %c0_68 = arith.constant 0 : index
    %75 = vector.load %arg2[%c0_66, %74, %c2_67, %c0_68] : memref<1x18x18x20xbf16, #tpu.memory_space<vmem>>, vector<1x8x16x12xbf16>
    %76 = vector.shape_cast %75 : vector<1x8x16x12xbf16> to vector<8x16x12xbf16>
    %77 = vector.shape_cast %76 : vector<8x16x12xbf16> to vector<128x12xbf16>
    %c2_69 = arith.constant 2 : index
    %c2_70 = arith.constant 2 : index
    %c0_71 = arith.constant 0 : index
    %c0_72 = arith.constant 0 : index
    %78 = vector.load %arg3[%c2_69, %c2_70, %c0_71, %c0_72] : memref<3x3x12x8xbf16, #tpu.memory_space<vmem>>, vector<1x1x12x8xbf16>
    %79 = vector.shape_cast %78 : vector<1x1x12x8xbf16> to vector<12x8xbf16>
    %cst_73 = arith.constant dense<0.000000e+00> : vector<128x8xf32>
    %80 = tpu.matmul %77, %79, %cst_73 {dimension_numbers = #tpu.dot_dimension_numbers<[1], [0], [0], [1], [0, 0, 1, 1], [], []>} : vector<128x12xbf16>, vector<12x8xbf16>, vector<128x8xf32> -> vector<128x8xf32>
    %81 = arith.addf %72, %80 : vector<128x8xf32>
    %82 = vector.shape_cast %81 : vector<128x8xf32> to vector<1x8x16x8xf32>
    %c0_74 = arith.constant 0 : index
    %c0_75 = arith.constant 0 : index
    %c0_76 = arith.constant 0 : index
    %c0_77 = arith.constant 0 : index
    %83 = vector.load %arg4[%c0_74, %c0_75, %c0_76, %c0_77] : memref<1x8x16x8xf32, #tpu.memory_space<vmem>>, vector<1x8x16x8xf32>
    tpu.vector_store %arg4[%c0_74, %c0_75, %c0_76, %c0_77], %82 {strides = array<i32>} : memref<1x8x16x8xf32, #tpu.memory_space<vmem>>, vector<1x8x16x8xf32>,
    %cst_78 = arith.constant dense<0.000000e+00> : vector<8xf32>
    %84 = vector.multi_reduction <add>, %81, %cst_78 [0] : vector<128x8xf32> to vector<8xf32>
    %85 = vector.shape_cast %84 : vector<8xf32> to vector<1x8xf32>
    %cst_79 = arith.constant 7.812500e-03 : f32
    %86 = vector.broadcast %cst_79 : f32 to vector<1x8xf32>
    %87 = arith.mulf %85, %86 : vector<1x8xf32>
    %88 = vector.broadcast %87 : vector<1x8xf32> to vector<128x8xf32>
    %89 = arith.subf %81, %88 : vector<128x8xf32>
    %90 = arith.mulf %89, %89 : vector<128x8xf32>
    %cst_80 = arith.constant dense<0.000000e+00> : vector<8xf32>
    %91 = vector.multi_reduction <add>, %90, %cst_80 [0] : vector<128x8xf32> to vector<8xf32>
    %92 = vector.shape_cast %91 : vector<8xf32> to vector<1x8xf32>
    %93 = tpu.concatenate %85, %92 in 0 : vector<1x8xf32>, vector<1x8xf32> -> vector<2x8xf32>
    %94 = vector.shape_cast %93 : vector<2x8xf32> to vector<1x1x2x8xf32>
    %c0_81 = arith.constant 0 : index
    %c0_82 = arith.constant 0 : index
    %c0_83 = arith.constant 0 : index
    %c0_84 = arith.constant 0 : index
    %95 = vector.load %arg5[%c0_81, %c0_82, %c0_83, %c0_84] : memref<1x1x2x8xf32, #tpu.memory_space<vmem>>, vector<1x1x2x8xf32>
    tpu.vector_store %arg5[%c0_81, %c0_82, %c0_83, %c0_84], %94 {strides = array<i32>} : memref<1x1x2x8xf32, #tpu.memory_space<vmem>>, vector<1x1x2x8xf32>,
    return
  }
  func.func @transform_0(%arg0: i32, %arg1: i32) -> (i32, i32, i32, i32) {
    %c0_i32 = arith.constant 0 : i32
    %c0_i32_0 = arith.constant 0 : i32
    %c0_i32_1 = arith.constant 0 : i32
    %c0_i32_2 = arith.constant 0 : i32
    return %arg0, %c0_i32, %c0_i32_0, %c0_i32_1 : i32, i32, i32, i32
  }
  func.func @transform_1(%arg0: i32, %arg1: i32) -> (i32, i32, i32, i32) {
    %c0_i32 = arith.constant 0 : i32
    %c0_i32_0 = arith.constant 0 : i32
    %c0_i32_1 = arith.constant 0 : i32
    %c0_i32_2 = arith.constant 0 : i32
    %c0_i32_3 = arith.constant 0 : i32
    return %c0_i32, %c0_i32_0, %c0_i32_1, %c0_i32_2 : i32, i32, i32, i32
  }
  func.func @transform_2(%arg0: i32, %arg1: i32) -> (i32, i32, i32, i32) {
    %c0_i32 = arith.constant 0 : i32
    %c0_i32_0 = arith.constant 0 : i32
    %c0_i32_1 = arith.constant 0 : i32
    return %arg0, %arg1, %c0_i32, %c0_i32_0 : i32, i32, i32, i32
  }
  func.func @transform_3(%arg0: i32, %arg1: i32) -> (i32, i32, i32, i32) {
    %c0_i32 = arith.constant 0 : i32
    %c0_i32_0 = arith.constant 0 : i32
    %c0_i32_1 = arith.constant 0 : i32
    return %arg0, %arg1, %c0_i32, %c0_i32_0 : i32, i32, i32, i32
  }
}

module attributes {stable_mosaic.version = 11 : i64} {
  func.func @_conv_stats_kernel(%arg0: i32, %arg1: i32, %arg2: memref<1x18x18x20xbf16, #tpu.memory_space<vmem>>, %arg3: memref<3x3x20x8xbf16, #tpu.memory_space<vmem>>, %arg4: memref<1x8x16x8xf32, #tpu.memory_space<vmem>>, %arg5: memref<1x1x2x8xf32, #tpu.memory_space<vmem>>) attributes {dimension_semantics = [#tpu.dimension_semantics<parallel>, #tpu.dimension_semantics<parallel>], iteration_bounds = array<i64: 2, 2>, scalar_prefetch = 0 : i64, scratch_operands = 0 : i64, tpu.core_type = #tpu.core_type<tc>, window_params = [{transform_indices = @transform_0, window_bounds = array<i64: 1, 18, 18, 20>}, {pipeline_mode = #tpu.pipeline_mode<synchronous>, transform_indices = @transform_1, window_bounds = array<i64: 3, 3, 20, 8>}, {transform_indices = @transform_2, window_bounds = array<i64: 1, 8, 16, 8>}, {transform_indices = @transform_3, window_bounds = array<i64: 1, 1, 2, 8>}]} {
    %c8_i32 = arith.constant 8 : i32
    %0 = arith.muli %arg1, %c8_i32 : i32
    %1 = tpu.assume_multiple %0, 8 : i32
    %c0_i32 = arith.constant 0 : i32
    %2 = arith.addi %1, %c0_i32 : i32
    %c0 = arith.constant 0 : index
    %3 = arith.index_cast %2 : i32 to index
    %c0_0 = arith.constant 0 : index
    %c0_1 = arith.constant 0 : index
    %4 = vector.load %arg2[%c0, %3, %c0_0, %c0_1] : memref<1x18x18x20xbf16, #tpu.memory_space<vmem>>, vector<1x8x16x20xbf16>
    %5 = vector.shape_cast %4 : vector<1x8x16x20xbf16> to vector<8x16x20xbf16>
    %6 = vector.shape_cast %5 : vector<8x16x20xbf16> to vector<128x20xbf16>
    %c0_2 = arith.constant 0 : index
    %c0_3 = arith.constant 0 : index
    %c0_4 = arith.constant 0 : index
    %c0_5 = arith.constant 0 : index
    %7 = vector.load %arg3[%c0_2, %c0_3, %c0_4, %c0_5] : memref<3x3x20x8xbf16, #tpu.memory_space<vmem>>, vector<1x1x20x8xbf16>
    %8 = vector.shape_cast %7 : vector<1x1x20x8xbf16> to vector<20x8xbf16>
    %cst = arith.constant dense<0.000000e+00> : vector<128x8xf32>
    %9 = tpu.matmul %6, %8, %cst {dimension_numbers = #tpu.dot_dimension_numbers<[1], [0], [0], [1], [0, 0, 1, 1], [], []>} : vector<128x20xbf16>, vector<20x8xbf16>, vector<128x8xf32> -> vector<128x8xf32>
    %c0_i32_6 = arith.constant 0 : i32
    %10 = arith.addi %1, %c0_i32_6 : i32
    %c0_7 = arith.constant 0 : index
    %11 = arith.index_cast %10 : i32 to index
    %c1 = arith.constant 1 : index
    %c0_8 = arith.constant 0 : index
    %12 = vector.load %arg2[%c0_7, %11, %c1, %c0_8] : memref<1x18x18x20xbf16, #tpu.memory_space<vmem>>, vector<1x8x16x20xbf16>
    %13 = vector.shape_cast %12 : vector<1x8x16x20xbf16> to vector<8x16x20xbf16>
    %14 = vector.shape_cast %13 : vector<8x16x20xbf16> to vector<128x20xbf16>
    %c0_9 = arith.constant 0 : index
    %c1_10 = arith.constant 1 : index
    %c0_11 = arith.constant 0 : index
    %c0_12 = arith.constant 0 : index
    %15 = vector.load %arg3[%c0_9, %c1_10, %c0_11, %c0_12] : memref<3x3x20x8xbf16, #tpu.memory_space<vmem>>, vector<1x1x20x8xbf16>
    %16 = vector.shape_cast %15 : vector<1x1x20x8xbf16> to vector<20x8xbf16>
    %cst_13 = arith.constant dense<0.000000e+00> : vector<128x8xf32>
    %17 = tpu.matmul %14, %16, %cst_13 {dimension_numbers = #tpu.dot_dimension_numbers<[1], [0], [0], [1], [0, 0, 1, 1], [], []>} : vector<128x20xbf16>, vector<20x8xbf16>, vector<128x8xf32> -> vector<128x8xf32>
    %18 = arith.addf %9, %17 : vector<128x8xf32>
    %c0_i32_14 = arith.constant 0 : i32
    %19 = arith.addi %1, %c0_i32_14 : i32
    %c0_15 = arith.constant 0 : index
    %20 = arith.index_cast %19 : i32 to index
    %c2 = arith.constant 2 : index
    %c0_16 = arith.constant 0 : index
    %21 = vector.load %arg2[%c0_15, %20, %c2, %c0_16] : memref<1x18x18x20xbf16, #tpu.memory_space<vmem>>, vector<1x8x16x20xbf16>
    %22 = vector.shape_cast %21 : vector<1x8x16x20xbf16> to vector<8x16x20xbf16>
    %23 = vector.shape_cast %22 : vector<8x16x20xbf16> to vector<128x20xbf16>
    %c0_17 = arith.constant 0 : index
    %c2_18 = arith.constant 2 : index
    %c0_19 = arith.constant 0 : index
    %c0_20 = arith.constant 0 : index
    %24 = vector.load %arg3[%c0_17, %c2_18, %c0_19, %c0_20] : memref<3x3x20x8xbf16, #tpu.memory_space<vmem>>, vector<1x1x20x8xbf16>
    %25 = vector.shape_cast %24 : vector<1x1x20x8xbf16> to vector<20x8xbf16>
    %cst_21 = arith.constant dense<0.000000e+00> : vector<128x8xf32>
    %26 = tpu.matmul %23, %25, %cst_21 {dimension_numbers = #tpu.dot_dimension_numbers<[1], [0], [0], [1], [0, 0, 1, 1], [], []>} : vector<128x20xbf16>, vector<20x8xbf16>, vector<128x8xf32> -> vector<128x8xf32>
    %27 = arith.addf %18, %26 : vector<128x8xf32>
    %c1_i32 = arith.constant 1 : i32
    %28 = arith.addi %1, %c1_i32 : i32
    %c0_22 = arith.constant 0 : index
    %29 = arith.index_cast %28 : i32 to index
    %c0_23 = arith.constant 0 : index
    %c0_24 = arith.constant 0 : index
    %30 = vector.load %arg2[%c0_22, %29, %c0_23, %c0_24] : memref<1x18x18x20xbf16, #tpu.memory_space<vmem>>, vector<1x8x16x20xbf16>
    %31 = vector.shape_cast %30 : vector<1x8x16x20xbf16> to vector<8x16x20xbf16>
    %32 = vector.shape_cast %31 : vector<8x16x20xbf16> to vector<128x20xbf16>
    %c1_25 = arith.constant 1 : index
    %c0_26 = arith.constant 0 : index
    %c0_27 = arith.constant 0 : index
    %c0_28 = arith.constant 0 : index
    %33 = vector.load %arg3[%c1_25, %c0_26, %c0_27, %c0_28] : memref<3x3x20x8xbf16, #tpu.memory_space<vmem>>, vector<1x1x20x8xbf16>
    %34 = vector.shape_cast %33 : vector<1x1x20x8xbf16> to vector<20x8xbf16>
    %cst_29 = arith.constant dense<0.000000e+00> : vector<128x8xf32>
    %35 = tpu.matmul %32, %34, %cst_29 {dimension_numbers = #tpu.dot_dimension_numbers<[1], [0], [0], [1], [0, 0, 1, 1], [], []>} : vector<128x20xbf16>, vector<20x8xbf16>, vector<128x8xf32> -> vector<128x8xf32>
    %36 = arith.addf %27, %35 : vector<128x8xf32>
    %c1_i32_30 = arith.constant 1 : i32
    %37 = arith.addi %1, %c1_i32_30 : i32
    %c0_31 = arith.constant 0 : index
    %38 = arith.index_cast %37 : i32 to index
    %c1_32 = arith.constant 1 : index
    %c0_33 = arith.constant 0 : index
    %39 = vector.load %arg2[%c0_31, %38, %c1_32, %c0_33] : memref<1x18x18x20xbf16, #tpu.memory_space<vmem>>, vector<1x8x16x20xbf16>
    %40 = vector.shape_cast %39 : vector<1x8x16x20xbf16> to vector<8x16x20xbf16>
    %41 = vector.shape_cast %40 : vector<8x16x20xbf16> to vector<128x20xbf16>
    %c1_34 = arith.constant 1 : index
    %c1_35 = arith.constant 1 : index
    %c0_36 = arith.constant 0 : index
    %c0_37 = arith.constant 0 : index
    %42 = vector.load %arg3[%c1_34, %c1_35, %c0_36, %c0_37] : memref<3x3x20x8xbf16, #tpu.memory_space<vmem>>, vector<1x1x20x8xbf16>
    %43 = vector.shape_cast %42 : vector<1x1x20x8xbf16> to vector<20x8xbf16>
    %cst_38 = arith.constant dense<0.000000e+00> : vector<128x8xf32>
    %44 = tpu.matmul %41, %43, %cst_38 {dimension_numbers = #tpu.dot_dimension_numbers<[1], [0], [0], [1], [0, 0, 1, 1], [], []>} : vector<128x20xbf16>, vector<20x8xbf16>, vector<128x8xf32> -> vector<128x8xf32>
    %45 = arith.addf %36, %44 : vector<128x8xf32>
    %c1_i32_39 = arith.constant 1 : i32
    %46 = arith.addi %1, %c1_i32_39 : i32
    %c0_40 = arith.constant 0 : index
    %47 = arith.index_cast %46 : i32 to index
    %c2_41 = arith.constant 2 : index
    %c0_42 = arith.constant 0 : index
    %48 = vector.load %arg2[%c0_40, %47, %c2_41, %c0_42] : memref<1x18x18x20xbf16, #tpu.memory_space<vmem>>, vector<1x8x16x20xbf16>
    %49 = vector.shape_cast %48 : vector<1x8x16x20xbf16> to vector<8x16x20xbf16>
    %50 = vector.shape_cast %49 : vector<8x16x20xbf16> to vector<128x20xbf16>
    %c1_43 = arith.constant 1 : index
    %c2_44 = arith.constant 2 : index
    %c0_45 = arith.constant 0 : index
    %c0_46 = arith.constant 0 : index
    %51 = vector.load %arg3[%c1_43, %c2_44, %c0_45, %c0_46] : memref<3x3x20x8xbf16, #tpu.memory_space<vmem>>, vector<1x1x20x8xbf16>
    %52 = vector.shape_cast %51 : vector<1x1x20x8xbf16> to vector<20x8xbf16>
    %cst_47 = arith.constant dense<0.000000e+00> : vector<128x8xf32>
    %53 = tpu.matmul %50, %52, %cst_47 {dimension_numbers = #tpu.dot_dimension_numbers<[1], [0], [0], [1], [0, 0, 1, 1], [], []>} : vector<128x20xbf16>, vector<20x8xbf16>, vector<128x8xf32> -> vector<128x8xf32>
    %54 = arith.addf %45, %53 : vector<128x8xf32>
    %c2_i32 = arith.constant 2 : i32
    %55 = arith.addi %1, %c2_i32 : i32
    %c0_48 = arith.constant 0 : index
    %56 = arith.index_cast %55 : i32 to index
    %c0_49 = arith.constant 0 : index
    %c0_50 = arith.constant 0 : index
    %57 = vector.load %arg2[%c0_48, %56, %c0_49, %c0_50] : memref<1x18x18x20xbf16, #tpu.memory_space<vmem>>, vector<1x8x16x20xbf16>
    %58 = vector.shape_cast %57 : vector<1x8x16x20xbf16> to vector<8x16x20xbf16>
    %59 = vector.shape_cast %58 : vector<8x16x20xbf16> to vector<128x20xbf16>
    %c2_51 = arith.constant 2 : index
    %c0_52 = arith.constant 0 : index
    %c0_53 = arith.constant 0 : index
    %c0_54 = arith.constant 0 : index
    %60 = vector.load %arg3[%c2_51, %c0_52, %c0_53, %c0_54] : memref<3x3x20x8xbf16, #tpu.memory_space<vmem>>, vector<1x1x20x8xbf16>
    %61 = vector.shape_cast %60 : vector<1x1x20x8xbf16> to vector<20x8xbf16>
    %cst_55 = arith.constant dense<0.000000e+00> : vector<128x8xf32>
    %62 = tpu.matmul %59, %61, %cst_55 {dimension_numbers = #tpu.dot_dimension_numbers<[1], [0], [0], [1], [0, 0, 1, 1], [], []>} : vector<128x20xbf16>, vector<20x8xbf16>, vector<128x8xf32> -> vector<128x8xf32>
    %63 = arith.addf %54, %62 : vector<128x8xf32>
    %c2_i32_56 = arith.constant 2 : i32
    %64 = arith.addi %1, %c2_i32_56 : i32
    %c0_57 = arith.constant 0 : index
    %65 = arith.index_cast %64 : i32 to index
    %c1_58 = arith.constant 1 : index
    %c0_59 = arith.constant 0 : index
    %66 = vector.load %arg2[%c0_57, %65, %c1_58, %c0_59] : memref<1x18x18x20xbf16, #tpu.memory_space<vmem>>, vector<1x8x16x20xbf16>
    %67 = vector.shape_cast %66 : vector<1x8x16x20xbf16> to vector<8x16x20xbf16>
    %68 = vector.shape_cast %67 : vector<8x16x20xbf16> to vector<128x20xbf16>
    %c2_60 = arith.constant 2 : index
    %c1_61 = arith.constant 1 : index
    %c0_62 = arith.constant 0 : index
    %c0_63 = arith.constant 0 : index
    %69 = vector.load %arg3[%c2_60, %c1_61, %c0_62, %c0_63] : memref<3x3x20x8xbf16, #tpu.memory_space<vmem>>, vector<1x1x20x8xbf16>
    %70 = vector.shape_cast %69 : vector<1x1x20x8xbf16> to vector<20x8xbf16>
    %cst_64 = arith.constant dense<0.000000e+00> : vector<128x8xf32>
    %71 = tpu.matmul %68, %70, %cst_64 {dimension_numbers = #tpu.dot_dimension_numbers<[1], [0], [0], [1], [0, 0, 1, 1], [], []>} : vector<128x20xbf16>, vector<20x8xbf16>, vector<128x8xf32> -> vector<128x8xf32>
    %72 = arith.addf %63, %71 : vector<128x8xf32>
    %c2_i32_65 = arith.constant 2 : i32
    %73 = arith.addi %1, %c2_i32_65 : i32
    %c0_66 = arith.constant 0 : index
    %74 = arith.index_cast %73 : i32 to index
    %c2_67 = arith.constant 2 : index
    %c0_68 = arith.constant 0 : index
    %75 = vector.load %arg2[%c0_66, %74, %c2_67, %c0_68] : memref<1x18x18x20xbf16, #tpu.memory_space<vmem>>, vector<1x8x16x20xbf16>
    %76 = vector.shape_cast %75 : vector<1x8x16x20xbf16> to vector<8x16x20xbf16>
    %77 = vector.shape_cast %76 : vector<8x16x20xbf16> to vector<128x20xbf16>
    %c2_69 = arith.constant 2 : index
    %c2_70 = arith.constant 2 : index
    %c0_71 = arith.constant 0 : index
    %c0_72 = arith.constant 0 : index
    %78 = vector.load %arg3[%c2_69, %c2_70, %c0_71, %c0_72] : memref<3x3x20x8xbf16, #tpu.memory_space<vmem>>, vector<1x1x20x8xbf16>
    %79 = vector.shape_cast %78 : vector<1x1x20x8xbf16> to vector<20x8xbf16>
    %cst_73 = arith.constant dense<0.000000e+00> : vector<128x8xf32>
    %80 = tpu.matmul %77, %79, %cst_73 {dimension_numbers = #tpu.dot_dimension_numbers<[1], [0], [0], [1], [0, 0, 1, 1], [], []>} : vector<128x20xbf16>, vector<20x8xbf16>, vector<128x8xf32> -> vector<128x8xf32>
    %81 = arith.addf %72, %80 : vector<128x8xf32>
    %82 = vector.shape_cast %81 : vector<128x8xf32> to vector<1x8x16x8xf32>
    %c0_74 = arith.constant 0 : index
    %c0_75 = arith.constant 0 : index
    %c0_76 = arith.constant 0 : index
    %c0_77 = arith.constant 0 : index
    %83 = vector.load %arg4[%c0_74, %c0_75, %c0_76, %c0_77] : memref<1x8x16x8xf32, #tpu.memory_space<vmem>>, vector<1x8x16x8xf32>
    tpu.vector_store %arg4[%c0_74, %c0_75, %c0_76, %c0_77], %82 {strides = array<i32>} : memref<1x8x16x8xf32, #tpu.memory_space<vmem>>, vector<1x8x16x8xf32>,
    %cst_78 = arith.constant dense<0.000000e+00> : vector<8xf32>
    %84 = vector.multi_reduction <add>, %81, %cst_78 [0] : vector<128x8xf32> to vector<8xf32>
    %85 = vector.shape_cast %84 : vector<8xf32> to vector<1x8xf32>
    %cst_79 = arith.constant 7.812500e-03 : f32
    %86 = vector.broadcast %cst_79 : f32 to vector<1x8xf32>
    %87 = arith.mulf %85, %86 : vector<1x8xf32>
    %88 = vector.broadcast %87 : vector<1x8xf32> to vector<128x8xf32>
    %89 = arith.subf %81, %88 : vector<128x8xf32>
    %90 = arith.mulf %89, %89 : vector<128x8xf32>
    %cst_80 = arith.constant dense<0.000000e+00> : vector<8xf32>
    %91 = vector.multi_reduction <add>, %90, %cst_80 [0] : vector<128x8xf32> to vector<8xf32>
    %92 = vector.shape_cast %91 : vector<8xf32> to vector<1x8xf32>
    %93 = tpu.concatenate %85, %92 in 0 : vector<1x8xf32>, vector<1x8xf32> -> vector<2x8xf32>
    %94 = vector.shape_cast %93 : vector<2x8xf32> to vector<1x1x2x8xf32>
    %c0_81 = arith.constant 0 : index
    %c0_82 = arith.constant 0 : index
    %c0_83 = arith.constant 0 : index
    %c0_84 = arith.constant 0 : index
    %95 = vector.load %arg5[%c0_81, %c0_82, %c0_83, %c0_84] : memref<1x1x2x8xf32, #tpu.memory_space<vmem>>, vector<1x1x2x8xf32>
    tpu.vector_store %arg5[%c0_81, %c0_82, %c0_83, %c0_84], %94 {strides = array<i32>} : memref<1x1x2x8xf32, #tpu.memory_space<vmem>>, vector<1x1x2x8xf32>,
    return
  }
  func.func @transform_0(%arg0: i32, %arg1: i32) -> (i32, i32, i32, i32) {
    %c0_i32 = arith.constant 0 : i32
    %c0_i32_0 = arith.constant 0 : i32
    %c0_i32_1 = arith.constant 0 : i32
    %c0_i32_2 = arith.constant 0 : i32
    return %arg0, %c0_i32, %c0_i32_0, %c0_i32_1 : i32, i32, i32, i32
  }
  func.func @transform_1(%arg0: i32, %arg1: i32) -> (i32, i32, i32, i32) {
    %c0_i32 = arith.constant 0 : i32
    %c0_i32_0 = arith.constant 0 : i32
    %c0_i32_1 = arith.constant 0 : i32
    %c0_i32_2 = arith.constant 0 : i32
    %c0_i32_3 = arith.constant 0 : i32
    return %c0_i32, %c0_i32_0, %c0_i32_1, %c0_i32_2 : i32, i32, i32, i32
  }
  func.func @transform_2(%arg0: i32, %arg1: i32) -> (i32, i32, i32, i32) {
    %c0_i32 = arith.constant 0 : i32
    %c0_i32_0 = arith.constant 0 : i32
    %c0_i32_1 = arith.constant 0 : i32
    return %arg0, %arg1, %c0_i32, %c0_i32_0 : i32, i32, i32, i32
  }
  func.func @transform_3(%arg0: i32, %arg1: i32) -> (i32, i32, i32, i32) {
    %c0_i32 = arith.constant 0 : i32
    %c0_i32_0 = arith.constant 0 : i32
    %c0_i32_1 = arith.constant 0 : i32
    return %arg0, %arg1, %c0_i32, %c0_i32_0 : i32, i32, i32, i32
  }
}

module attributes {stable_mosaic.version = 11 : i64} {
  func.func @_bn_relu_kernel(%arg0: i32, %arg1: memref<1x16x128xf32, #tpu.memory_space<vmem>>, %arg2: memref<1x1x128xf32, #tpu.memory_space<vmem>>, %arg3: memref<1x1x128xf32, #tpu.memory_space<vmem>>, %arg4: memref<1x16x128xf32, #tpu.memory_space<vmem>>) attributes {dimension_semantics = [#tpu.dimension_semantics<parallel>], iteration_bounds = array<i64: 2>, scalar_prefetch = 0 : i64, scratch_operands = 0 : i64, tpu.core_type = #tpu.core_type<tc>, window_params = [{transform_indices = @transform_0, window_bounds = array<i64: 1, 16, 128>}, {pipeline_mode = #tpu.pipeline_mode<synchronous>, transform_indices = @transform_1, window_bounds = array<i64: 1, 1, 128>}, {pipeline_mode = #tpu.pipeline_mode<synchronous>, transform_indices = @transform_2, window_bounds = array<i64: 1, 1, 128>}, {transform_indices = @transform_3, window_bounds = array<i64: 1, 16, 128>}]} {
    %c0 = arith.constant 0 : index
    %c0_0 = arith.constant 0 : index
    %c0_1 = arith.constant 0 : index
    %0 = vector.load %arg1[%c0, %c0_0, %c0_1] : memref<1x16x128xf32, #tpu.memory_space<vmem>>, vector<1x16x128xf32>
    %c0_2 = arith.constant 0 : index
    %c0_3 = arith.constant 0 : index
    %c0_4 = arith.constant 0 : index
    %1 = vector.load %arg2[%c0_2, %c0_3, %c0_4] : memref<1x1x128xf32, #tpu.memory_space<vmem>>, vector<1x1x128xf32>
    %2 = vector.broadcast %1 : vector<1x1x128xf32> to vector<1x16x128xf32>
    %3 = arith.mulf %0, %2 : vector<1x16x128xf32>
    %c0_5 = arith.constant 0 : index
    %c0_6 = arith.constant 0 : index
    %c0_7 = arith.constant 0 : index
    %4 = vector.load %arg3[%c0_5, %c0_6, %c0_7] : memref<1x1x128xf32, #tpu.memory_space<vmem>>, vector<1x1x128xf32>
    %5 = vector.broadcast %4 : vector<1x1x128xf32> to vector<1x16x128xf32>
    %6 = arith.addf %3, %5 : vector<1x16x128xf32>
    %cst = arith.constant 0.000000e+00 : f32
    %7 = vector.broadcast %cst : f32 to vector<1x16x128xf32>
    %8 = arith.maximumf %6, %7 : vector<1x16x128xf32>
    %c0_8 = arith.constant 0 : index
    %c0_9 = arith.constant 0 : index
    %c0_10 = arith.constant 0 : index
    %9 = vector.load %arg4[%c0_8, %c0_9, %c0_10] : memref<1x16x128xf32, #tpu.memory_space<vmem>>, vector<1x16x128xf32>
    tpu.vector_store %arg4[%c0_8, %c0_9, %c0_10], %8 {strides = array<i32>} : memref<1x16x128xf32, #tpu.memory_space<vmem>>, vector<1x16x128xf32>,
    return
  }
  func.func @transform_0(%arg0: i32) -> (i32, i32, i32) {
    %c0_i32 = arith.constant 0 : i32
    %c0_i32_0 = arith.constant 0 : i32
    %c0_i32_1 = arith.constant 0 : i32
    return %arg0, %c0_i32, %c0_i32_0 : i32, i32, i32
  }
  func.func @transform_1(%arg0: i32) -> (i32, i32, i32) {
    %c0_i32 = arith.constant 0 : i32
    %c0_i32_0 = arith.constant 0 : i32
    %c0_i32_1 = arith.constant 0 : i32
    %c0_i32_2 = arith.constant 0 : i32
    return %c0_i32, %c0_i32_0, %c0_i32_1 : i32, i32, i32
  }
  func.func @transform_2(%arg0: i32) -> (i32, i32, i32) {
    %c0_i32 = arith.constant 0 : i32
    %c0_i32_0 = arith.constant 0 : i32
    %c0_i32_1 = arith.constant 0 : i32
    %c0_i32_2 = arith.constant 0 : i32
    return %c0_i32, %c0_i32_0, %c0_i32_1 : i32, i32, i32
  }
  func.func @transform_3(%arg0: i32) -> (i32, i32, i32) {
    %c0_i32 = arith.constant 0 : i32
    %c0_i32_0 = arith.constant 0 : i32
    %c0_i32_1 = arith.constant 0 : i32
    return %arg0, %c0_i32, %c0_i32_0 : i32, i32, i32
  }
}

</mosaic_0001>

<bundles_post_ra>
// kernel: tile.33
= control target key start
LH: loop header
LB: loop body
LE: loop exit
PB: predicated region body
PF: predicated region fallthrough
CT: control target
= control target key end

     0   :  { %s28_s0 = inlined_call_operand.vmem [shape: f32[8], index: 0, kind: input, shape index: {}]   ;;  %s29_s1 = inlined_call_operand.vmem [shape: f32[16,8], index: 1, kind: output, shape index: {}]  }
   0x1   :  { %v4_v0 = vld [vmem:[%s28_s0] ss:$0 sm:$0xff] }
   0x2   :  { %5 = vst [vmem:[%s29_s1] sm:$0xff] %v4_v0  ;;  %8 = vst [vmem:[%s29_s1 + $0x8] sm:$0xff] %v4_v0 }

// kernel: tile.34
= control target key start
LH: loop header
LB: loop body
LE: loop exit
PB: predicated region body
PF: predicated region fallthrough
CT: control target
= control target key end

     0   :  { %s131_s10 = smov 120   ;;  %s132_s11 = smov 104   ;;  %vm3_vm0 = vcmask 64512   ;;  %vm9_vm1 = vcmask 1048512   ;;  %vm15_vm2 = vcmask 982912   ;;  %vm21_vm3 = vcmask 917312   ;;  %s207_s0 = inlined_call_operand.vmem [shape: f32[16,8], index: 0, kind: input, shape index: {}]   ;;  %s208_s1 = inlined_call_operand.vmem [shape: f32[1,1,128], index: 1, kind: output, shape index: {}]  }
   0x1   :  { %v101_v0 = vld [vmem:[%s207_s0 + $0xf] sm:$0x1]   ;;  %v103_v1 = vld [vmem:[%s207_s0 + $0xd] sm:$0x1]   ;;  %v102_v2 = vld [vmem:[%s207_s0 + $0xe] sm:$0x1]  }
   0x2   :  { %7 = vrot.lane.b32.xlu0 %v101_v0, %s131_s10  ;;  %19 = vrot.lane.b32.xlu1 %v103_v1, %s132_s11  ;;  %v104_v3 = vld [vmem:[%s207_s0 + $0xc] sm:$0x1]   ;;  %s133_s16 = smov 112   ;;  %s134_s17 = smov 96   ;;  %v105_v4 = vld [vmem:[%s207_s0 + $0xb] sm:$0x1]  }
   0x3   :  { %v106_v5 = vld [vmem:[%s207_s0 + $0xa] sm:$0x1]   ;;  %v2_v6 = vld [vmem:[%s207_s0] sm:$0x1]   ;;  %s135_s24 = smov 88   ;;  %s136_s25 = smov 80  }
   0x4   :  { %4 = vst.msk [vmem:[#allocation0] sm:$0x1] %vm3_vm0, %v2_v6   ;;  %v107_v7 = vld [vmem:[%s207_s0 + $0x9] sm:$0x1]   ;;  %v108_v8 = vld [vmem:[%s207_s0 + $0x8] sm:$0x1]  }
   0x5   :  { %s137_s30 = smov 72   ;;  %s138_s2 = smov 64   ;;  %v109_v9 = vld [vmem:[%s207_s0 + $0x7] sm:$0x1]   ;;  %v110_v10 = vld [vmem:[%s207_s0 + $0x6] sm:$0x1]  }
   0x6   :  { %13 = vrot.lane.b32.xlu0 %v102_v2, %s133_s16  ;;  %25 = vrot.lane.b32.xlu1 %v104_v3, %s134_s17  ;;  %s139_s7 = smov 56   ;;  %s140_s8 = smov 48   ;;  %v111_v11 = vld [vmem:[%s207_s0 + $0x5] sm:$0x1]   ;;  %v112_v12 = vld [vmem:[%s207_s0 + $0x4] sm:$0x1]  }
   0x7   :  { %s141_s13 = smov 40   ;;  %s142_s14 = smov 32   ;;  %v113_v13 = vld [vmem:[%s207_s0 + $0x3] sm:$0x1]   ;;  %v114_v14 = vld [vmem:[%s207_s0 + $0x2] sm:$0x1]  }
   0x8   :  { %s143_s19 = smov 24   ;;  %s144_s20 = smov 16   ;;  %v115_v15 = vld [vmem:[%s207_s0 + $0x1] sm:$0x1]   ;;  %vm27_vm4 = vcmask 851712   ;;  %vm33_vm5 = vcmask 786112  }
   0x9   :  { %s145_s0 = smov 8   ;;  %vm39_vm6 = vcmask 720512   ;;  %vm45_vm7 = vcmask 654912   ;;  %vm51_vm8 = vcmask 589312   ;;  %vm57_vm9 = vcmask 523712  }
   0xa   :  { %31 = vrot.lane.b32.xlu0 %v105_v4, %s135_s24  ;;  %37 = vrot.lane.b32.xlu1 %v106_v5, %s136_s25  ;;  %vm63_vm10 = vcmask 458112   ;;  %vm69_vm11 = vcmask 392512   ;;  %vm75_vm12 = vcmask 326912   ;;  %vm81_vm13 = vcmask 261312  }
   0xb   :  { %vm87_vm14 = vcmask 195712   ;;  %vm93_vm15 = vcmask 130112  }
   0xe   :  { %43 = vrot.lane.b32.xlu0 %v107_v7, %s137_s30  ;;  %49 = vrot.lane.b32.xlu1 %v108_v8, %s138_s2 }
  0x12   :  { %55 = vrot.lane.b32.xlu0 %v109_v9, %s139_s7  ;;  %61 = vrot.lane.b32.xlu1 %v110_v10, %s140_s8 }
  0x16   :  { %67 = vrot.lane.b32.xlu0 %v111_v11, %s141_s13  ;;  %73 = vrot.lane.b32.xlu1 %v112_v12, %s142_s14 }
  0x1a   :  { %79 = vrot.lane.b32.xlu0 %v113_v13, %s143_s19  ;;  %85 = vrot.lane.b32.xlu1 %v114_v14, %s144_s20 }
  0x1e   :  { %91 = vrot.lane.b32.xlu0 %v115_v15, %s145_s0 }
  0x74   :  { %v8_v16 = vpop.permute.xlu0 %7   ;;  %v20_v17 = vpop.permute.xlu1 %19  }
  0x75   :  { %10 = vst.msk [vmem:[#allocation0] sm:$0x1] %vm9_vm1, %v8_v16  }
  0x78   :  { %v14_v18 = vpop.permute.xlu0 %13   ;;  %v26_v19 = vpop.permute.xlu1 %25  }
  0x79   :  { %16 = vst.msk [vmem:[#allocation0] sm:$0x1] %vm15_vm2, %v14_v18  }
  0x7a   :  { %22 = vst.msk [vmem:[#allocation0] sm:$0x1] %vm21_vm3, %v20_v17  }
  0x7b   :  { %28 = vst.msk [vmem:[#allocation0] sm:$0x1] %vm27_vm4, %v26_v19  }
  0x7c   :  { %v32_v20 = vpop.permute.xlu0 %31   ;;  %v38_v21 = vpop.permute.xlu1 %37  }
  0x7d   :  { %34 = vst.msk [vmem:[#allocation0] sm:$0x1] %vm33_vm5, %v32_v20  }
  0x7e   :  { %40 = vst.msk [vmem:[#allocation0] sm:$0x1] %vm39_vm6, %v38_v21  }
  0x80   :  { %v44_v22 = vpop.permute.xlu0 %43   ;;  %v50_v23 = vpop.permute.xlu1 %49  }
  0x81   :  { %46 = vst.msk [vmem:[#allocation0] sm:$0x1] %vm45_vm7, %v44_v22  }
  0x82   :  { %52 = vst.msk [vmem:[#allocation0] sm:$0x1] %vm51_vm8, %v50_v23  }
  0x84   :  { %v56_v24 = vpop.permute.xlu0 %55   ;;  %v62_v25 = vpop.permute.xlu1 %61  }
  0x85   :  { %58 = vst.msk [vmem:[#allocation0] sm:$0x1] %vm57_vm9, %v56_v24  }
  0x86   :  { %64 = vst.msk [vmem:[#allocation0] sm:$0x1] %vm63_vm10, %v62_v25  }
  0x88   :  { %v68_v26 = vpop.permute.xlu0 %67   ;;  %v74_v27 = vpop.permute.xlu1 %73  }
  0x89   :  { %70 = vst.msk [vmem:[#allocation0] sm:$0x1] %vm69_vm11, %v68_v26  }
  0x8a   :  { %76 = vst.msk [vmem:[#allocation0] sm:$0x1] %vm75_vm12, %v74_v27  }
  0x8c   :  { %v80_v28 = vpop.permute.xlu0 %79   ;;  %v86_v29 = vpop.permute.xlu1 %85  }
  0x8d   :  { %82 = vst.msk [vmem:[#allocation0] sm:$0x1] %vm81_vm13, %v80_v28  }
  0x8e   :  { %88 = vst.msk [vmem:[#allocation0] sm:$0x1] %vm87_vm14, %v86_v29  }
  0x90   :  { %v92_v30 = vpop.permute.xlu0 %91  }
  0x91   :  { %94 = vst.msk [vmem:[#allocation0] sm:$0x1] %vm93_vm15, %v92_v30  }
  0x98   :  { %v98_v31 = vld [vmem:[#allocation0] sm:$0x1] }
  0x99   :  { %100 = vst [vmem:[%s208_s1] sm:$0x1] %v98_v31 }

// kernel: tfc_forward.7
= control target key start
LH: loop header
LB: loop body
LE: loop exit
PB: predicated region body
PF: predicated region fallthrough
CT: control target
= control target key end

     0   :  { %s318_s12 = smov 0   ;;  %s335_s0 = inlined_call_operand.vmem [shape: f32[2,16,128], index: 0, kind: input, shape index: {}]   ;;  %s336_s1 = inlined_call_operand.vmem [shape: f32[1,1,128], index: 1, kind: input, shape index: {}]   ;;  %s337_s2 = inlined_call_operand.vmem [shape: f32[1,1,128], index: 2, kind: input, shape index: {}]   ;;  %s338_s3 = inlined_call_operand.vmem [shape: bf16[2,16,128], index: 3, kind: output, shape index: {}]  }
   0x1 LB: > { %s258_s13 = sadd.s32 4294967295, %s296_s12   ;;  %p262_p0 = scmp.ge.s32.totalorder %s296_s12, 1  ;;  %s296_s12 = sphi %s318_s12, %s13_s12  }
   0x2   : > { %p137_p1 = scmp.lt.s32.totalorder %s296_s12, 3 }
   0x4   : > { %p138_p2 = pnand %p262_p0, %p137_p1 }
   0x5   : > { %p161_p3 = scmp.lt.s32.totalorder (!%p138_p2), %s258_s13, 1  ;;  %v267_v0 = vld [vmem:[%s336_s1] ss:$0 sm:$0xff] (!%p138_p2) }
   0x6   : > { %141 = sbr.rel (%p138_p2) target bundleno = 26 (0x1a), region = 32  ;;  %v268_v3 = vld [vmem:[%s337_s2] ss:$0 sm:$0xff] (!%p138_p2) }
   0xd   : > { %s340_s13 = smov (!%p161_p3, %s258_s13), 1 }
   0xe   : > { %s273_s14 = sshll.u32 %s340_s13, 4  ;;  %s274_s22 = sshll.u32 %s340_s13, 3 }
   0xf   : > { %s165_s19 = scalar_lea.vmem %s335_s0, %s273_s14  ;;  %s170_s25 = scalar_lea.vmem %s338_s3, %s274_s22 }
  0x10   : > { %v171_v1 = vld [vmem:[%s165_s19] sm:$0xff]  ;;  %v172_v2 = vld [vmem:[%s165_s19 + $0x8] sm:$0xff] }
  0x11   : > { %v180_v4 = vmul.f32 %v267_v0, %v171_v1  ;;  %v181_v5 = vmul.f32 %v267_v0, %v172_v2 }
  0x13   : > { %v189_v6 = vadd.f32 %v268_v3, %v180_v4  ;;  %v190_v7 = vadd.f32 %v268_v3, %v181_v5 }
  0x15   : > { %v191_v8 = vmax.f32 %v189_v6, 0.0  ;;  %v192_v9 = vmax.f32 %v190_v7, 0.0 }
  0x17   : > { %v280_v10 = vpack.c.bf16 %v192_v9, %v191_v8 }
  0x19   : > { %281 = vst [vmem:[%s170_s25] sm:$0xff] %v280_v10  }
  0x1a PF: > { %s13_s12 = sadd.s32 1, %s296_s12  }
  0x1b   : > { %p10_p4 = scmp.ge.s32.totalorder %s13_s12, 4  }
  0x1d   :  { %12 = sbr.rel (!%p10_p4) target bundleno = 1 (0x1), region = 62 }

// kernel: tfc_forward.6
= control target key start
LH: loop header
LB: loop body
LE: loop exit
PB: predicated region body
PF: predicated region fallthrough
CT: control target
= control target key end

     0   :  { %s3761_s12 = smov 0   ;;  %s3763_s13 = smov 0   ;;  %s4798_s0 = inlined_call_operand.vmem [shape: bf16[2,18,18,20], index: 0, kind: input, shape index: {}]   ;;  %s4799_s1 = inlined_call_operand.vmem [shape: bf16[3,3,4,8], index: 1, kind: input, shape index: {}]   ;;  %s4800_s2 = inlined_call_operand.vmem [shape: f32[2,16,16,8], index: 2, kind: output, shape index: {0}]   ;;  %s4801_s3 = inlined_call_operand.vmem [shape: f32[2,2,2,8], index: 3, kind: output, shape index: {1}]  }
   0x1   :  { %s3765_s14 = smov 0   ;;  %s3767_s15 = smov 0  }
   0x2   :  { %s3769_s16 = smov 0  }
   0x3 LB: > { %s23_s17 = sadd.s32 1, %s3731_s14  ;;  %s26_s18 = sadd.s32 1, %s3735_s15  ;;  %s3739_s16 = sphi %s3769_s16, %s14_s16   ;;  %s3735_s15 = sphi %s3767_s15, %s4827_s15   ;;  %s3731_s14 = sphi %s3765_s14, %s4826_s14   ;;  %s3727_s13 = sphi %s3763_s13, %s4825_s13   ;;  %s3723_s12 = sphi %s3761_s12, %s4824_s12  }
   0x4   : > { %p24_p0 = scmp.ge.s32.totalorder %s23_s17, 2  ;;  %p2962_p1 = scmp.ge.s32.totalorder %s3739_s16, 1 }
   0x5   : > { %p156_p2 = scmp.lt.s32.totalorder %s3739_s16, 5 }
   0x6   : > { %s4829_s17 = smov (%p24_p0, %s23_s17), 0  ;;  %s4831_s18 = smov (!%p24_p0, %s26_s18), %s3735_s15 }
   0x7   : > { %p157_p3 = pnand %p2962_p1, %p156_p2  ;;  %p28_p4 = scmp.ge.s32.totalorder %s4831_s18, 2 }
   0x9   : > { %s4833_s18 = smov (%p28_p4, %s4831_s18), 0  ;;  %160 = sbr.rel (%p157_p3) target bundleno = 490 (0x1ea), region = 28 }
  0x10   : > { %v2973_v0 = vld [vmem:[%s4799_s1 + $0x2] sm:$0x3]  ;;  %vm493_vm0 = vcmask 1041408   ;;  %v3090_v1 = vld [vmem:[%s4799_s1 + $0x8] sm:$0x3]  ;;  %p193_p5 = scmp.lt.s32.totalorder %s3727_s13, 1 }
  0x11   : > { %3625 = vmatprep.subr.msk.bf16.mxu1 %vm493_vm0, %v2973_v0  ;;  %3629 = vmatprep.subr.msk.bf16.mxu0 %vm493_vm0, %v3090_v1  ;;  %v495_v2 = vsel %vm493_vm0, %v2973_v0, 0  ;;  %v3803_v3 = vsel %vm493_vm0, %v3090_v1, 0  ;;  %v238_v4 = vld [vmem:[%s4799_s1] sm:$0x3]  ;;  %s3251_s25 = smul.u32 96, %s3723_s12  ;;  %vm468_vm3 = vcmask 31744  }
  0x12   : > { %3334 = vmatpush3.bf16.msra.mxu1 %v495_v2  ;;  %3406 = vmatpush3.bf16.msra.mxu0 %v3803_v3  ;;  %s4835_s13 = smov (!%p193_p5, %s3727_s13), 1  ;;  %v3123_v5 = vld [vmem:[%s4799_s1 + $0xa] sm:$0x3]  ;;  %vm247_vm1 = vsmask.f32 3328  ;;  %v3845_v17 = vsel %vm493_vm0, %v238_v4, 0 }
  0x13   : > { %3626 = vmatprep.subr.msk.bf16.mxu1 %vm493_vm0, %v238_v4  ;;  %s3635_s28 = smul.u32 216, %s4835_s13  ;;  %3631 = vmatprep.subr.msk.bf16.mxu0 %vm493_vm0, %v3123_v5  ;;  %vm248_vm2 = vsmask.f32 7440  ;;  %v3851_v26 = vld [vmem:[%s4799_s1 + $0xc] sm:$0x3]  ;;  %v3868_v37 = vsel %vm493_vm0, %v3123_v5, 0 }
  0x14   : > { %vm3860_vm4 = vmor %vm247_vm1, %vm248_vm2  ;;  %v3872_v41 = vsel %vm493_vm0, %v3851_v26, 0  ;;  %vm782_vm5 = vcmask 1042432   ;;  %vm783_vm6 = vcmask 1046532   ;;  %s2966_s27 = sshll.u32 %s4835_s13, 5  ;;  %vm2683_vm8 = vcmask 64512   ;;  %p211_p7 = scmp.lt.s32.totalorder %s3723_s12, 1 }
  0x15   : > { %s197_s4 = scalar_lea.vmem %s4798_s0, %s3635_s28  ;;  %vm4015_vm7 = vmor %vm782_vm5, %vm783_vm6  ;;  %s2968_s6 = sshll.u32 %s4835_s13, 1  ;;  %vm2807_vm9 = vcmask 1040384   ;;  %vm2809_vm10 = vcmask 58368  }
  0x16   : > { %s3821_s5 = scalar_lea.vmem %s197_s4, %s3251_s25  ;;  %s2964_s25 = sshll.u32 %s3723_s12, 3 }
  0x17   : > { %v3824_v6 = vld [vmem:[%s3821_s5] sm:$0xf]  ;;  %v3827_v7 = vld [vmem:[%s3821_s5 + $0x4] sm:$0xf]  ;;  %v3830_v8 = vld [vmem:[%s3821_s5 + $0x8] sm:$0x1] }
  0x18   : > { %v251_v9 = vshrl.u32 %v3824_v6, 16  ;;  %v254_v10 = vshll.u32 %v3824_v6, 16  ;;  %v260_v11 = vshll.u32 %v3827_v7, 16  ;;  %v264_v12 = vshrl.u32 %v3827_v7, 16  ;;  %v3066_v13 = vld [vmem:[%s3821_s5 + $0xc] sm:$0xf] }
  0x19   : > { %v270_v14 = vshll.u32 %v3830_v8, 16  ;;  %v3839_v15 = vld [vmem:[%s3821_s5 + $0x10] sm:$0xf]  ;;  %v3842_v16 = vld [vmem:[%s3821_s5 + $0x14] sm:$0x1]  ;;  %v1234_v23 = vshrl.u32 %v3066_v13, 16 }
  0x1a   : > { %v253_v18 = vrot.slane %v251_v9, 4  ;;  %v256_v19 = vrot.slane %v254_v10, 5  ;;  %v262_v20 = vrot.slane %v260_v11, 5  ;;  %v266_v21 = vrot.slane %v264_v12, 4  ;;  %v3856_v31 = vld [vmem:[%s3821_s5 + $0xc] sm:$0xf] }
  0x1b   : > { %v272_v22 = vrot.slane %v270_v14, 5  ;;  %v1237_v24 = vshll.u32 %v3066_v13, 16  ;;  %v1243_v25 = vshll.u32 %v3839_v15, 16  ;;  %v1247_v29 = vshrl.u32 %v3839_v15, 16  ;;  %v3865_v36 = vld [vmem:[%s3821_s5 + $0x10] sm:$0xf] }
  0x1c   : > { %v257_v27 = vor.u32 %v256_v19, %v253_v18  ;;  %v267_v28 = vor.u32 %v266_v21, %v262_v20  ;;  %v1253_v30 = vshll.u32 %v3842_v16, 16  ;;  %v1236_v33 = vrot.slane %v1234_v23, 4  ;;  %v3875_v44 = vld [vmem:[%s3821_s5 + $0x14] sm:$0x1]  ;;  %v3069_v55 = vld [vmem:[%s3821_s5 + $0x18] sm:$0xf] }
  0x1d   : > { %v1239_v34 = vrot.slane %v1237_v24, 5  ;;  %v1245_v35 = vrot.slane %v1243_v25, 5  ;;  %v1249_v40 = vrot.slane %v1247_v29, 4  ;;  %v275_v45 = vshrl.u32 %v3856_v31, 16  ;;  %v3888_v60 = vld [vmem:[%s3821_s5 + $0x1c] sm:$0xf] }
  0x1e   : > { %v258_v38 = vrot.slane %v257_v27, 4  ;;  %v268_v39 = vrot.slane %v267_v28, 4  ;;  %v1255_v43 = vrot.slane %v1253_v30, 5  ;;  %v278_v46 = vshll.u32 %v3856_v31, 16  ;;  %v3896_v1 = vld [vmem:[%s3821_s5 + $0x20] sm:$0x1] }
  0x1f   : > { %v1240_v42 = vor.u32 %v1239_v34, %v1236_v33  ;;  %v1250_v49 = vor.u32 %v1249_v40, %v1245_v35  ;;  %v284_v50 = vshll.u32 %v3865_v36, 16  ;;  %v277_v53 = vrot.slane %v275_v45, 4  ;;  %v3904_v21 = vld [vmem:[%s3821_s5 + $0x18] sm:$0xf]  ;;  %v3911_v27 = vld [vmem:[%s3821_s5 + $0x1c] sm:$0xf] }
  0x20   : > { %v263_v47 = vsel %vm3860_vm4, %v258_v38, %v262_v20  ;;  %v273_v48 = vsel %vm3860_vm4, %v268_v39, %v272_v22  ;;  %v280_v54 = vrot.slane %v278_v46, 5  ;;  %v288_v58 = vshrl.u32 %v3865_v36, 16  ;;  %v3919_v38 = vld [vmem:[%s3821_s5 + $0x20] sm:$0x1]  ;;  %p201_p6 = scmp.lt.s32.totalorder %s2964_s25, 15  ;;  %s4839_s12 = smov (!%p211_p7, %s3723_s12), 1 }
  0x21   : > { %v2974_v51 = vcombine.low %v263_v47, %v273_v48  ;;  %v1241_v52 = vrot.slane %v1240_v42, 4  ;;  %v1251_v56 = vrot.slane %v1250_v49, 4  ;;  %v286_v57 = vrot.slane %v284_v50, 5  ;;  %v3072_v47 = vld [vmem:[%s3821_s5 + $0x24] sm:$0xf]  ;;  %s214_s7 = sadd.s32 %s2968_s6, %s4839_s12 }
  0x22   : > { %v294_v59 = vshll.u32 %v3875_v44, 16  ;;  %v1625_v62 = vrot.slane %v3839_v15, 5  ;;  %v1628_v63 = vrot.slane %v3842_v16, 5  ;;  %v281_v0 = vor.u32 %v280_v54, %v277_v53  ;;  %s4837_s25 = smov (!%p201_p6, %s2964_s25), 15  ;;  %s2969_s8 = sshll.u32 %s214_s7, 1 }
  0x23   : > { %3335 = vmatprep.mubr.msk.bf16.mxu1 %vm468_vm3, %v2974_v51  ;;  %v1246_v61 = vsel %vm3860_vm4, %v1241_v52, %v1245_v35  ;;  %v1256_v2 = vsel %vm3860_vm4, %v1251_v56, %v1255_v43  ;;  %v290_v4 = vrot.slane %v288_v58, 4  ;;  %v1258_v9 = vshrl.u32 %v3069_v55, 16  ;;  %v3929_v52 = vld [vmem:[%s3821_s5 + $0x28] sm:$0xf]  ;;  %s2965_s26 = sshll.u32 %s4837_s25, 1  ;;  %s216_s11 = scalar_lea.vmem %s4801_s3, %s2969_s8 }
  0x24   : > { %v296_v5 = vrot.slane %v294_v59, 5  ;;  %v3091_v10 = vcombine.low %v1246_v61, %v1256_v2  ;;  %v282_v11 = vrot.slane %v281_v0, 4  ;;  %v1261_v12 = vshll.u32 %v3069_v55, 16  ;;  %v3941_v61 = vld [vmem:[%s3821_s5 + $0x2c] sm:$0x1]  ;;  %s205_s28 = sadd.s32 %s2966_s27, %s2965_s26 }
  0x25   : > { %v1267_v13 = vshll.u32 %v3888_v60, 16  ;;  %v291_v14 = vor.u32 %v290_v4, %v286_v57  ;;  %v1260_v18 = vrot.slane %v1258_v9, 4  ;;  %v1271_v19 = vshrl.u32 %v3888_v60, 16  ;;  %s2967_s29 = sshll.u32 %s205_s28, 3 }
  0x26   : > { %v1277_v20 = vshll.u32 %v3896_v1, 16  ;;  %3407 = vmatprep.mubr.msk.bf16.mxu0 %vm468_vm3, %v3091_v10  ;;  %v287_v22 = vsel %vm3860_vm4, %v282_v11, %v286_v57  ;;  %v1263_v23 = vrot.slane %v1261_v12, 5  ;;  %v1632_v25 = vrot.slane %v3888_v60, 5  ;;  %v3935_v57 = vld [vmem:[%s4799_s1 + $0x4] sm:$0x3] }
  0x27   : > { %v1269_v24 = vrot.slane %v1267_v13, 5  ;;  %v292_v28 = vrot.slane %v291_v14, 4  ;;  %v1273_v29 = vrot.slane %v1271_v19, 4  ;;  %v1635_v33 = vrot.slane %v3896_v1, 5  ;;  %v3948_v11 = vld [vmem:[%s3821_s5 + $0x24] sm:$0xf] }
  0x28   : > { %v1279_v30 = vrot.slane %v1277_v20, 5  ;;  %v1264_v34 = vor.u32 %v1263_v23, %v1260_v18  ;;  %v3916_v35 = vrot.slane %v1632_v25, 4  ;;  %v299_v39 = vshrl.u32 %v3904_v21, 16  ;;  %v3951_v19 = vld [vmem:[%s3821_s5 + $0x28] sm:$0xf] }
  0x29   : > { %v302_v40 = vshll.u32 %v3904_v21, 16  ;;  %v297_v42 = vsel %vm3860_vm4, %v292_v28, %v296_v5  ;;  %v1274_v43 = vor.u32 %v1273_v29, %v1269_v24  ;;  %v308_v45 = vshll.u32 %v3911_v27, 16  ;;  %v3961_v29 = vld [vmem:[%s3821_s5 + $0x2c] sm:$0x1] }
  0x2a   : > { %v312_v46 = vshrl.u32 %v3911_v27, 16  ;;  %v2975_v48 = vcombine.low %v287_v22, %v297_v42  ;;  %v1265_v49 = vrot.slane %v1264_v34, 4  ;;  %v301_v50 = vrot.slane %v299_v39, 4 }
  0x2b   : > { %v304_v51 = vrot.slane %v302_v40, 5  ;;  %v1275_v53 = vrot.slane %v1274_v43, 4  ;;  %v310_v54 = vrot.slane %v308_v45, 5  ;;  %v318_v56 = vshll.u32 %v3919_v38, 16  ;;  %v3075_v45 = vld [vmem:[%s3821_s5 + $0x30] sm:$0xf] }
  0x2c   : > { %v314_v55 = vrot.slane %v312_v46, 4  ;;  %3336 = vmatmul.mubr.msk.bf16.vlgmr.msra.gmra.mrb[0].mxu1 %vm468_vm3, %v2975_v48  ;;  %v1270_v58 = vsel %vm3860_vm4, %v1265_v49, %v1269_v24  ;;  %v1282_v0 = vshrl.u32 %v3072_v47, 16  ;;  %v1285_v2 = vshll.u32 %v3072_v47, 16 }
  0x2d   : > { %v305_v59 = vor.u32 %v304_v51, %v301_v50  ;;  %3352 = vmatpush3.bf16.msra.mxu1 %v3845_v17  ;;  %v1280_v4 = vsel %vm3860_vm4, %v1275_v53, %v1279_v30  ;;  %v320_v9 = vrot.slane %v318_v56, 5  ;;  %v1291_v10 = vshll.u32 %v3929_v52, 16  ;;  %v3971_v50 = vld [vmem:[%s3821_s5 + $0x34] sm:$0xf] }
  0x2e   : > { %v315_v5 = vor.u32 %v314_v55, %v310_v54  ;;  %v3092_v12 = vcombine.low %v1270_v58, %v1280_v4  ;;  %v1284_v14 = vrot.slane %v1282_v0, 4  ;;  %v1287_v18 = vrot.slane %v1285_v2, 5  ;;  %3627 = vmatprep.subr.msk.bf16.mxu1 %vm493_vm0, %v3935_v57  ;;  %v3981_v58 = vld [vmem:[%s3821_s5 + $0x38] sm:$0x1] }
  0x2f   : > { %v306_v13 = vrot.slane %v305_v59, 4  ;;  %v1293_v20 = vrot.slane %v1291_v10, 5  ;;  %v1295_v22 = vshrl.u32 %v3929_v52, 16  ;;  %v1301_v23 = vshll.u32 %v3941_v61, 16 }
  0x30   : > { %v316_v17 = vrot.slane %v315_v5, 4  ;;  %3408 = vmatmul.mubr.msk.bf16.vlgmr.msra.gmra.mrb[0].mxu0 %vm468_vm3, %v3092_v12  ;;  %v1288_v28 = vor.u32 %v1287_v18, %v1284_v14  ;;  %v323_v30 = vshrl.u32 %v3948_v11, 16  ;;  %v326_v34 = vshll.u32 %v3948_v11, 16  ;;  %v3986_v14 = vld [vmem:[%s3821_s5 + $0x30] sm:$0xf] }
  0x31   : > { %v311_v24 = vsel %vm3860_vm4, %v306_v13, %v310_v54  ;;  %3424 = vmatpush3.bf16.msra.mxu0 %v3868_v37  ;;  %v1297_v40 = vrot.slane %v1295_v22, 4  ;;  %v1303_v42 = vrot.slane %v1301_v23, 5  ;;  %v332_v43 = vshll.u32 %v3951_v19, 16  ;;  %v3992_v23 = vld [vmem:[%s3821_s5 + $0x34] sm:$0xf] }
  0x32   : > { %v321_v39 = vsel %vm3860_vm4, %v316_v17, %v320_v9  ;;  %v1289_v47 = vrot.slane %v1288_v28, 4  ;;  %v325_v48 = vrot.slane %v323_v30, 4  ;;  %v328_v49 = vrot.slane %v326_v34, 5  ;;  %3632 = vmatprep.subr.msk.bf16.mxu0 %vm493_vm0, %v3851_v26 }
  0x33   : > { %v2976_v46 = vcombine.low %v311_v24, %v321_v39  ;;  %v1298_v37 = vor.u32 %v1297_v40, %v1293_v20  ;;  %v334_v51 = vrot.slane %v332_v43, 5  ;;  %v336_v53 = vshrl.u32 %v3951_v19, 16  ;;  %v3997_v39 = vld [vmem:[%s3821_s5 + $0x38] sm:$0x1] }
  0x34   : > { %v342_v54 = vshll.u32 %v3961_v29, 16  ;;  %v1294_v55 = vsel %vm3860_vm4, %v1289_v47, %v1293_v20  ;;  %v329_v56 = vor.u32 %v328_v49, %v325_v48  ;;  %v1306_v59 = vshrl.u32 %v3075_v45, 16 }
  0x35   : > { %3339 = vmatprep.mubr.msk.bf16.mxu1 %vm468_vm3, %v2976_v46  ;;  %v1309_v0 = vshll.u32 %v3075_v45, 16  ;;  %v1299_v2 = vrot.slane %v1298_v37, 4  ;;  %v338_v26 = vrot.slane %v336_v53, 4  ;;  %v1315_v5 = vshll.u32 %v3971_v50, 16  ;;  %v3107_v37 = vld [vmem:[%s3821_s5 + $0xc] sm:$0xe] }
  0x36   : > { %v344_v4 = vrot.slane %v342_v54, 5  ;;  %v330_v9 = vrot.slane %v329_v56, 4  ;;  %v1308_v10 = vrot.slane %v1306_v59, 4  ;;  %v1319_v13 = vshrl.u32 %v3971_v50, 16  ;;  %v4009_v56 = vld [vmem:[%s3821_s5 + $0x3c] sm:$0xf] }
  0x37   : > { %v1311_v12 = vrot.slane %v1309_v0, 5  ;;  %v1304_v18 = vsel %vm3860_vm4, %v1299_v2, %v1303_v42  ;;  %v339_v17 = vor.u32 %v338_v26, %v334_v51  ;;  %v1317_v20 = vrot.slane %v1315_v5, 5 }
  0x38   : > { %v1325_v22 = vshll.u32 %v3981_v58, 16  ;;  %v3093_v24 = vcombine.low %v1294_v55, %v1304_v18  ;;  %v335_v28 = vsel %vm3860_vm4, %v330_v9, %v334_v51  ;;  %v1321_v34 = vrot.slane %v1319_v13, 4  ;;  %v4023_v18 = vld [vmem:[%s3821_s5 + $0x44] sm:$0x1] }
  0x39   : > { %v1312_v30 = vor.u32 %v1311_v12, %v1308_v10  ;;  %v340_v40 = vrot.slane %v339_v17, 4  ;;  %v347_v42 = vshrl.u32 %v3986_v14, 16  ;;  %v350_v45 = vshll.u32 %v3986_v14, 16  ;;  %v3108_v17 = vld [vmem:[%s3821_s5 + $0x18] sm:$0xe] }
  0x3a   : > { %v1327_v43 = vrot.slane %v1325_v22, 5  ;;  %3411 = vmatprep.mubr.msk.bf16.mxu0 %vm468_vm3, %v3093_v24  ;;  %v1322_v47 = vor.u32 %v1321_v34, %v1317_v20  ;;  %v356_v48 = vshll.u32 %v3992_v23, 16  ;;  %v360_v49 = vshrl.u32 %v3992_v23, 16 }
  0x3b   : > { %v1313_v46 = vrot.slane %v1312_v30, 4  ;;  %v345_v51 = vsel %vm3860_vm4, %v340_v40, %v344_v4  ;;  %v349_v53 = vrot.slane %v347_v42, 4  ;;  %v352_v54 = vrot.slane %v350_v45, 5  ;;  %v4020_v4 = vld [vmem:[%s3821_s5 + $0x40] sm:$0xf] }
  0x3c   : > { %v366_v55 = vshll.u32 %v3997_v39, 16  ;;  %v2977_v59 = vcombine.low %v335_v28, %v345_v51  ;;  %v1323_v2 = vrot.slane %v1322_v47, 4  ;;  %v358_v26 = vrot.slane %v356_v48, 5  ;;  %v4034_v30 = vld [vmem:[%s3821_s5 + $0x48] sm:$0xf] }
  0x3d   : > { %v1318_v0 = vsel %vm3860_vm4, %v1313_v46, %v1317_v20  ;;  %v353_v9 = vor.u32 %v352_v54, %v349_v53  ;;  %v362_v10 = vrot.slane %v360_v49, 4  ;;  %v3115_v13 = vrot.slane %v3107_v37, 9 }
  0x3e   : > { %v368_v12 = vrot.slane %v366_v55, 5  ;;  %3340 = vmatmul.mubr.msk.bf16.gmra.mrb[4].mxu1 %vm468_vm3, %v2977_v59  ;;  %v1328_v20 = vsel %vm3860_vm4, %v1323_v2, %v1327_v43  ;;  %v1627_v22 = vrot.slane %v1625_v62, 4  ;;  %v371_v24 = vshrl.u32 %v4009_v56, 16  ;;  %v4054_v55 = vld [vmem:[%s3821_s5 + $0x50] sm:$0x1] }
  0x3f   : > { %v374_v28 = vshll.u32 %v4009_v56, 16  ;;  %v3094_v34 = vcombine.low %v1318_v0, %v1328_v20  ;;  %v354_v40 = vrot.slane %v353_v9, 4  ;;  %v363_v42 = vor.u32 %v362_v10, %v358_v26 }
  0x40   : > { %v1626_v45 = vsel %vm4015_vm7, %v3115_v13, %v1625_v62  ;;  %v1629_v43 = vsel %vm4015_vm7, %v1627_v22, %v1628_v63  ;;  %v373_v46 = vrot.slane %v371_v24, 4  ;;  %v380_v48 = vshll.u32 %v4020_v4, 16  ;;  %v4050_v62 = vld [vmem:[%s3821_s5 + $0x4c] sm:$0xf] }
  0x41   : > { %v376_v47 = vrot.slane %v374_v28, 5  ;;  %3412 = vmatmul.mubr.msk.bf16.gmra.mrb[4].mxu0 %vm468_vm3, %v3094_v34  ;;  %v359_v49 = vsel %vm3860_vm4, %v354_v40, %v358_v26  ;;  %v364_v37 = vrot.slane %v363_v42, 4  ;;  %v3124_v15 = vcombine.low %v1626_v45, %v1629_v43  ;;  %v4072_v28 = vld [vmem:[%s3821_s5 + $0x54] sm:$0xf]  ;;  %v4083_v34 = vld [vmem:[%s4799_s1 + $0xe] sm:$0x3] }
  0x42   : > { %v384_v51 = vshrl.u32 %v4020_v4, 16  ;;  %v382_v53 = vrot.slane %v380_v48, 5  ;;  %v390_v63 = vshll.u32 %v4023_v18, 16  ;;  %v3116_v54 = vrot.slane %v3108_v17, 9 }
  0x43   : > { %v377_v16 = vor.u32 %v376_v47, %v373_v46  ;;  %v369_v59 = vsel %vm3860_vm4, %v364_v37, %v368_v12  ;;  %3425 = vmatprep.mubr.msk.bf16.mxu0 %vm468_vm3, %v3124_v15  ;;  %v1636_v2 = vsel %vm4015_vm7, %v3916_v35, %v1635_v33  ;;  %v395_v26 = vshrl.u32 %v4034_v30, 16  ;;  %v3109_v12 = vld [vmem:[%s3821_s5 + $0x24] sm:$0xe]  ;;  %v4088_v37 = vld [vmem:[%s3821_s5 + $0x58] sm:$0xf] }
  0x44   : > { %v386_v0 = vrot.slane %v384_v51, 4  ;;  %v2978_v9 = vcombine.low %v359_v49, %v369_v59  ;;  %v392_v13 = vrot.slane %v390_v63, 5  ;;  %v1633_v17 = vsel %vm4015_vm7, %v3116_v54, %v1632_v25  ;;  %v4097_v54 = vld [vmem:[%s3821_s5 + $0x5c] sm:$0x1] }
  0x45   : > { %v378_v10 = vrot.slane %v377_v16, 4  ;;  %v3125_v22 = vcombine.low %v1633_v17, %v1636_v2  ;;  %v397_v24 = vrot.slane %v395_v26, 4  ;;  %v398_v1 = vshll.u32 %v4034_v30, 16 }
  0x46   : > { %v387_v20 = vor.u32 %v386_v0, %v382_v53  ;;  %3343 = vmatprep.mubr.msk.bf16.mxu1 %vm468_vm3, %v2978_v9  ;;  %v404_v35 = vshll.u32 %v4050_v62, 16  ;;  %v408_v60 = vshrl.u32 %v4050_v62, 16  ;;  %v414_v25 = vshll.u32 %v4054_v55, 16 }
  0x47   : > { %v383_v33 = vsel %vm3860_vm4, %v378_v10, %v382_v53  ;;  %v400_v42 = vrot.slane %v398_v1, 5  ;;  %v3117_v45 = vrot.slane %v3109_v12, 9  ;;  %v1639_v43 = vrot.slane %v3929_v52, 5  ;;  %v3110_v10 = vld [vmem:[%s3821_s5 + $0x30] sm:$0xe] }
  0x48   : > { %v388_v40 = vrot.slane %v387_v20, 4  ;;  %v406_v46 = vrot.slane %v404_v35, 5  ;;  %v410_v47 = vrot.slane %v408_v60, 4  ;;  %v416_v48 = vrot.slane %v414_v25, 5 }
  0x49   : > { %v1642_v49 = vrot.slane %v3941_v61, 5  ;;  %3426 = vmatmul.mubr.msk.bf16.vlgmr.msra.gmra.mrb[0].mxu0 %vm468_vm3, %v3125_v22  ;;  %v401_v51 = vor.u32 %v400_v42, %v397_v24  ;;  %v1640_v16 = vsel %vm4015_vm7, %v3117_v45, %v1639_v43  ;;  %v1641_v53 = vrot.slane %v1639_v43, 4  ;;  %v4118_v42 = vld [vmem:[%s3821_s5 + $0x40] sm:$0xf]  ;;  %v4121_v45 = vld [vmem:[%s3821_s5 + $0x44] sm:$0x1] }
  0x4a   : > { %v393_v15 = vsel %vm3860_vm4, %v388_v40, %v392_v13  ;;  %3442 = vmatpush3.bf16.msra.mxu0 %v3872_v41  ;;  %v411_v52 = vor.u32 %v410_v47, %v406_v46  ;;  %v419_v61 = vshrl.u32 %v4072_v28, 16  ;;  %v422_v59 = vshll.u32 %v4072_v28, 16 }
  0x4b   : > { %v2979_v63 = vcombine.low %v383_v33, %v393_v15  ;;  %v402_v0 = vrot.slane %v401_v51, 4  ;;  %v1643_v2 = vsel %vm4015_vm7, %v1641_v53, %v1642_v49  ;;  %v428_v26 = vshll.u32 %v4088_v37, 16  ;;  %3633 = vmatprep.subr.msk.bf16.mxu0 %vm493_vm0, %v4083_v34  ;;  %v3111_v33 = vld [vmem:[%s3821_s5 + $0x3c] sm:$0xe] }
  0x4c   : > { %v432_v9 = vshrl.u32 %v4088_v37, 16  ;;  %v412_v41 = vrot.slane %v411_v52, 4  ;;  %v3126_v13 = vcombine.low %v1640_v16, %v1643_v2  ;;  %v421_v17 = vrot.slane %v419_v61, 4  ;;  %v3112_v2 = vld [vmem:[%s3821_s5 + $0x48] sm:$0xe] }
  0x4d   : > { %3344 = vmatmul.mubr.msk.bf16.gmra.mrb[8].mxu1 %vm468_vm3, %v2979_v63  ;;  %v424_v12 = vrot.slane %v422_v59, 5  ;;  %v407_v20 = vsel %vm3860_vm4, %v402_v0, %v406_v46  ;;  %v430_v22 = vrot.slane %v428_v26, 5  ;;  %v438_v1 = vshll.u32 %v4097_v54, 16  ;;  %v4136_v59 = vld [vmem:[%s3821_s5 + $0x4c] sm:$0xf] }
  0x4e   : > { %v434_v24 = vrot.slane %v432_v9, 4  ;;  %v417_v35 = vsel %vm3860_vm4, %v412_v41, %v416_v48  ;;  %3429 = vmatprep.mubr.msk.bf16.mxu0 %vm468_vm3, %v3126_v13  ;;  %v3118_v25 = vrot.slane %v3110_v10, 9  ;;  %v1646_v40 = vrot.slane %v3971_v50, 5  ;;  %v4139_v0 = vld [vmem:[%s3821_s5 + $0x50] sm:$0x1] }
  0x4f   : > { %v425_v60 = vor.u32 %v424_v12, %v421_v17  ;;  %v2980_v43 = vcombine.low %v407_v20, %v417_v35  ;;  %v440_v47 = vrot.slane %v438_v1, 5  ;;  %v1649_v49 = vrot.slane %v3981_v58, 5  ;;  %v4147_v17 = vld [vmem:[%s3821_s5 + $0x58] sm:$0xf]  ;;  %v4150_v12 = vld [vmem:[%s3821_s5 + $0x5c] sm:$0x1] }
  0x50   : > { %v435_v46 = vor.u32 %v434_v24, %v430_v22  ;;  %v1647_v48 = vsel %vm4015_vm7, %v3118_v25, %v1646_v40  ;;  %v1648_v51 = vrot.slane %v1646_v40, 4  ;;  %v3119_v16 = vrot.slane %v3111_v33, 9  ;;  %4811 = vst [vmem:[#allocation2_spill] sm:$0xff] %v4150_v12  ;;  %v4160_v35 = vld [vmem:[%s3821_s5 + $0x64] sm:$0xf] }
  0x51   : > { %v426_v15 = vrot.slane %v425_v60, 4  ;;  %3347 = vmatprep.mubr.msk.bf16.mxu1 %vm468_vm3, %v2980_v43  ;;  %v1653_v53 = vrot.slane %v4118_v42, 5  ;;  %v1656_v63 = vrot.slane %v4121_v45, 5  ;;  %v2990_v61 = vcombine.low %v3824_v6, %v3827_v7  ;;  %v3113_v6 = vld [vmem:[%s3821_s5 + $0x54] sm:$0xe]  ;;  %4812 = vst [vmem:[#allocation3_spill] sm:$0xff] %v4160_v35 }
  0x52   : > { %v436_v50 = vrot.slane %v435_v46, 4  ;;  %v1650_v58 = vsel %vm4015_vm7, %v1648_v51, %v1649_v49  ;;  %v1660_v24 = vrot.slane %v4136_v59, 5  ;;  %v1663_v1 = vrot.slane %v4139_v0, 5  ;;  %v4163_v60 = vld [vmem:[%s3821_s5 + $0x68] sm:$0x1] }
  0x53   : > { %v431_v52 = vsel %vm3860_vm4, %v426_v15, %v430_v22  ;;  %v3127_v9 = vcombine.low %v1647_v48, %v1650_v58  ;;  %v1654_v10 = vsel %vm4015_vm7, %v3119_v16, %v1653_v53  ;;  %v1655_v41 = vrot.slane %v1653_v53, 4  ;;  %4813 = vst [vmem:[#allocation4_spill] sm:$0xff] %v4163_v60 }
  0x54   : > { %v441_v26 = vsel %vm3860_vm4, %v436_v50, %v440_v47  ;;  %v3120_v22 = vrot.slane %v3112_v2, 9  ;;  %v1662_v40 = vrot.slane %v1660_v24, 4  ;;  %v3121_v43 = vrot.slane %v3113_v6, 9  ;;  %v3114_v47 = vld [vmem:[%s3821_s5 + $0x60] sm:$0xe] }
  0x55   : > { %v2981_v13 = vcombine.low %v431_v52, %v441_v26  ;;  %3430 = vmatmul.mubr.msk.bf16.gmra.mrb[4].mxu0 %vm468_vm3, %v3127_v9  ;;  %v1657_v20 = vsel %vm4015_vm7, %v1655_v41, %v1656_v63  ;;  %v1667_v46 = vrot.slane %v4147_v17, 5  ;;  %v794_v49 = vrot.slane %v3865_v36, 5  ;;  %v760_v2 = vld [vmem:[%s3821_s5 + $0x18] sm:$0xe]  ;;  %v4195_v6 = vld [vmem:[%s4799_s1 + $0x6] sm:$0x3] }
  0x56   : > { %v3128_v33 = vcombine.low %v1654_v10, %v1657_v20  ;;  %v1661_v25 = vsel %vm4015_vm7, %v3120_v22, %v1660_v24  ;;  %v1670_v15 = vrot.slane %v4150_v12, 5  ;;  %v1664_v48 = vsel %vm4015_vm7, %v1662_v40, %v1663_v1  ;;  %v762_v1 = vld [vmem:[%s3821_s5 + $0x30] sm:$0xe] }
  0x57   : > { %3348 = vmatmul.mubr.msk.bf16.gmra.mrb[12].mxu1 %vm468_vm3, %v2981_v13  ;;  %v1668_v51 = vsel %vm4015_vm7, %v3121_v43, %v1667_v46  ;;  %v1669_v16 = vrot.slane %v1667_v46, 4  ;;  %v1674_v50 = vrot.slane %v4160_v35, 5  ;;  %v2991_v53 = vcombine.low %v3856_v31, %v3865_v36  ;;  %v761_v36 = vld [vmem:[%s3821_s5 + $0x24] sm:$0xe]  ;;  %v4469_v12 = vld [vmem:[%s3821_s5 + $0x70] sm:$0xf] }
  0x58   : > { %3353 = vmatprep.mubr.msk.bf16.mxu1 %vm468_vm3, %v2990_v61  ;;  %3433 = vmatprep.mubr.msk.bf16.mxu0 %vm468_vm3, %v3128_v33  ;;  %v3129_v63 = vcombine.low %v1661_v25, %v1664_v48  ;;  %v3122_v52 = vrot.slane %v3114_v47, 9  ;;  %v1677_v58 = vrot.slane %v4163_v60, 5  ;;  %v759_v61 = vld [vmem:[%s3821_s5 + $0xc] sm:$0xe]  ;;  %v797_v26 = vrot.slane %v3875_v44, 5 }
  0x59   : > { %v2992_v9 = vcombine.low %v3904_v21, %v3911_v27  ;;  %v1671_v10 = vsel %vm4015_vm7, %v1669_v16, %v1670_v15  ;;  %v1676_v41 = vrot.slane %v1674_v50, 4  ;;  %v892_v13 = vsel %vm493_vm0, %v3935_v57, 0  ;;  %v3681_v16 = vld [vmem:[%s3821_s5 + $0x18] sm:$0xff]   ;;  %v4441_v60 = vld [vmem:[%s3821_s5 + $0x64] sm:$0xf] }
  0x5a   : > { %v3130_v31 = vcombine.low %v1668_v51, %v1671_v10  ;;  %v3007_v44 = vrot.slane %v759_v61, 9  ;;  %v796_v20 = vrot.slane %v794_v49, 4  ;;  %v3008_v21 = vrot.slane %v760_v2, 9  ;;  %4814 = vst [vmem:[#allocation5_spill] sm:$0xff] %v4441_v60 }
  0x5b   : > { %v1675_v22 = vsel %vm4015_vm7, %v3122_v52, %v1674_v50  ;;  %v1678_v57 = vsel %vm4015_vm7, %v1676_v41, %v1677_v58  ;;  %v801_v24 = vrot.slane %v3911_v27, 5  ;;  %v804_v40 = vrot.slane %v3919_v38, 5 }
  0x5c   : > { %v4208_v33 = vsel %vm4015_vm7, %v3007_v44, %v794_v49  ;;  %v4212_v25 = vsel %vm4015_vm7, %v796_v20, %v797_v26  ;;  %v3009_v43 = vrot.slane %v761_v36, 9  ;;  %v3131_v49 = vcombine.low %v1675_v22, %v1678_v57  ;;  %v3175_v26 = vld [vmem:[%s3821_s5 + $0x18] sm:$0xf]  ;;  %v3683_v57 = vld [vmem:[%s3821_s5 + $0x24] sm:$0xff]  }
  0x5d   : > { %3434 = vmatmul.mubr.msk.bf16.gmra.mrb[8].mxu0 %vm468_vm3, %v3129_v63  ;;  %v3016_v27 = vcombine.low %v4208_v33, %v4212_v25  ;;  %v4221_v46 = vsel %vm4015_vm7, %v3008_v21, %v801_v24  ;;  %v803_v47 = vrot.slane %v801_v24, 4  ;;  %v808_v15 = vrot.slane %v3951_v19, 5 }
  0x5e   : > { %3437 = vmatprep.mubr.msk.bf16.mxu0 %vm468_vm3, %v3130_v31  ;;  %v811_v48 = vrot.slane %v3961_v29, 5  ;;  %v3010_v38 = vrot.slane %v762_v1, 9  ;;  %v2993_v51 = vcombine.low %v3948_v11, %v3951_v19  ;;  %v818_v63 = vrot.slane %v3997_v39, 5  ;;  %v763_v19 = vld [vmem:[%s3821_s5 + $0x3c] sm:$0xe] }
  0x5f   : > { %3354 = vmatmul.mubr.msk.bf16.vlgmr.msra.gmra.mrb[0].mxu1 %vm468_vm3, %v2991_v53  ;;  %v4230_v50 = vsel %vm4015_vm7, %v803_v47, %v804_v40  ;;  %v815_v53 = vrot.slane %v3992_v23, 5  ;;  %v2994_v52 = vcombine.low %v3986_v14, %v3992_v23  ;;  %v4240_v58 = vsel %vm4015_vm7, %v3009_v43, %v808_v15  ;;  %v758_v14 = vld [vmem:[%s3821_s5] sm:$0xe]  ;;  %v4268_v31 = vld [vmem:[%s3821_s5 + $0x1c] sm:$0xf] }
  0x60   : > { %3370 = vmatpush3.bf16.msra.mxu1 %v892_v13  ;;  %3357 = vmatprep.mubr.msk.bf16.mxu1 %vm468_vm3, %v2992_v9  ;;  %v3017_v29 = vcombine.low %v4221_v46, %v4230_v50  ;;  %v810_v11 = vrot.slane %v808_v15, 4  ;;  %v787_v61 = vrot.slane %v3827_v7, 5  ;;  %v3011_v10 = vrot.slane %v763_v19, 9  ;;  %v764_v1 = vld [vmem:[%s3821_s5 + $0x48] sm:$0xe] }
  0x61   : > { %3628 = vmatprep.subr.msk.bf16.mxu1 %vm493_vm0, %v4195_v6  ;;  %v4246_v2 = vsel %vm4015_vm7, %v3010_v38, %v815_v53  ;;  %v817_v39 = vrot.slane %v815_v53, 4  ;;  %v790_v41 = vrot.slane %v3830_v8, 5  ;;  %v3006_v36 = vrot.slane %v758_v14, 9  ;;  %v4294_v38 = vld [vmem:[%s4799_s1 + $0x10] sm:$0x3] }
  0x62   : > { %v4252_v23 = vsel %vm4015_vm7, %v810_v11, %v811_v48  ;;  %v789_v44 = vrot.slane %v787_v61, 4  ;;  %v822_v20 = vrot.slane %v4020_v4, 5  ;;  %v825_v21 = vrot.slane %v4023_v18, 5  ;;  %v4315_v14 = vld [vmem:[%s3821_s5 + $0x28] sm:$0xf] }
  0x63   : > { %v4261_v9 = vsel %vm4015_vm7, %v817_v39, %v818_v63  ;;  %v2995_v22 = vcombine.low %v4009_v56, %v4020_v4  ;;  %v2072_v24 = vshrl.u32 %v3175_v26, 16  ;;  %v2075_v8 = vshll.u32 %v3175_v26, 16  ;;  %v3685_v4 = vld [vmem:[%s3821_s5 + $0x30] sm:$0xff]   ;;  %v4417_v46 = vld [vmem:[%s3821_s5 + $0x44] sm:$0x1] }
  0x64   : > { %v2081_v40 = vshll.u32 %v4268_v31, 16  ;;  %v2085_v43 = vshrl.u32 %v4268_v31, 16  ;;  %v4280_v47 = vsel %vm4015_vm7, %v3011_v10, %v822_v20  ;;  %v2314_v18 = vsel %vm493_vm0, %v4083_v34, 0  ;;  %v3193_v7 = vld [vmem:[%s3821_s5 + $0x60] sm:$0xf] }
  0x65   : > { %3438 = vmatmul.mubr.msk.bf16.gmra.mrb[12].mxu0 %vm468_vm3, %v3131_v49  ;;  %v824_v49 = vrot.slane %v822_v20, 4  ;;  %v2996_v56 = vcombine.low %v4034_v30, %v4050_v62  ;;  %v788_v15 = vsel %vm4015_vm7, %v3006_v36, %v787_v61  ;;  %v791_v48 = vsel %vm4015_vm7, %v789_v44, %v790_v41  ;;  %v4302_v30 = vld [vmem:[%s3821_s5 + $0x20] sm:$0x1]  ;;  %v3178_v61 = vld [vmem:[%s3821_s5 + $0x24] sm:$0xf] }
  0x66   : > { %3443 = vmatprep.mubr.msk.bf16.mxu0 %vm468_vm3, %v3681_v16  ;;  %v3012_v34 = vrot.slane %v764_v1, 9  ;;  %v2074_v16 = vrot.slane %v2072_v24, 4  ;;  %v2077_v53 = vrot.slane %v2075_v8, 5  ;;  %v4308_v11 = vrot.slane %v2081_v40, 5  ;;  %v765_v44 = vld [vmem:[%s3821_s5 + $0x54] sm:$0xe] }
  0x67   : > { %3358 = vmatmul.mubr.msk.bf16.gmra.mrb[4].mxu1 %vm468_vm3, %v2993_v51  ;;  %v4298_v51 = vsel %vm4015_vm7, %v824_v49, %v825_v21  ;;  %v2087_v19 = vrot.slane %v2085_v43, 4  ;;  %v832_v39 = vrot.slane %v4054_v55, 5  ;;  %v2997_v10 = vcombine.low %v4072_v28, %v4088_v37  ;;  %v3181_v55 = vld [vmem:[%s3821_s5 + $0x30] sm:$0xf]  ;;  %v3687_v20 = vld [vmem:[%s3821_s5 + $0x3c] sm:$0xff]   ;;  %v3688_v1 = vld [vmem:[%s3821_s5 + $0x48] sm:$0xff]  }
  0x68   : > { %3361 = vmatprep.mubr.msk.bf16.mxu1 %vm468_vm3, %v2994_v52  ;;  %v829_v52 = vrot.slane %v4050_v62, 5  ;;  %v3015_v41 = vcombine.low %v788_v15, %v791_v48  ;;  %v2091_v36 = vshll.u32 %v4302_v30, 16  ;;  %v2078_v21 = vor.u32 %v2077_v53, %v2074_v16  ;;  %v4334_v8 = vld [vmem:[%s3821_s5 + $0x34] sm:$0xf] }
  0x69   : > { %v2088_v28 = vor.u32 %v2087_v19, %v4308_v11  ;;  %v2105_v40 = vshll.u32 %v4315_v14, 16  ;;  %v2109_v43 = vshrl.u32 %v4315_v14, 16  ;;  %v836_v15 = vrot.slane %v4088_v37, 5 }
  0x6a   : > { %v4319_v62 = vsel %vm4015_vm7, %v3012_v34, %v829_v52  ;;  %v831_v26 = vrot.slane %v829_v52, 4  ;;  %v2129_v48 = vshll.u32 %v4334_v8, 16  ;;  %v2133_v34 = vshrl.u32 %v4334_v8, 16 }
  0x6b   : > { %v839_v16 = vrot.slane %v4097_v54, 5  ;;  %v2079_v53 = vrot.slane %v2078_v21, 4  ;;  %v2093_v52 = vrot.slane %v2091_v36, 5  ;;  %v2089_v37 = vrot.slane %v2088_v28, 4  ;;  %v4357_v36 = vld [vmem:[%s3821_s5 + $0x2c] sm:$0x1] }
  0x6c   : > { %v4331_v24 = vsel %vm4015_vm7, %v831_v26, %v832_v39  ;;  %v4353_v26 = vrot.slane %v2105_v40, 5  ;;  %v4364_v21 = vld [vmem:[%s3821_s5 + $0x38] sm:$0x1]  ;;  %v1094_v28 = vsel %vm493_vm0, %v4195_v6, 0 }
  0x6d   : > { %3444 = vmatmul.mubr.msk.bf16.vlgmr.msra.gmra.mrb[0].mxu0 %vm468_vm3, %v3683_v57  ;;  %v2099_v57 = vshll.u32 %v3178_v61, 16  ;;  %v3689_v40 = vld [vmem:[%s3821_s5 + $0x54] sm:$0xff]  }
  0x6e   : > { %3460 = vmatpush3.bf16.msra.mxu0 %v2314_v18  ;;  %3447 = vmatprep.mubr.msk.bf16.mxu0 %vm468_vm3, %v3685_v4  ;;  %v2120_v18 = vshrl.u32 %v3181_v55, 16  ;;  %v3013_v4 = vrot.slane %v765_v44, 9 }
  0x6f   : > { %3362 = vmatmul.mubr.msk.bf16.gmra.mrb[8].mxu1 %vm468_vm3, %v2995_v22  ;;  %3634 = vmatprep.subr.msk.bf16.mxu0 %vm493_vm0, %v4294_v38  ;;  %v2096_v22 = vshrl.u32 %v3178_v61, 16  ;;  %v838_v61 = vrot.slane %v836_v15, 4  ;;  %v2101_v54 = vrot.slane %v2099_v57, 5  ;;  %v2135_v57 = vrot.slane %v2133_v34, 4  ;;  %v3187_v34 = vld [vmem:[%s3821_s5 + $0x48] sm:$0xf] }
  0x70   : > { %3365 = vmatprep.mubr.msk.bf16.mxu1 %vm468_vm3, %v2996_v56  ;;  %v2123_v56 = vshll.u32 %v3181_v55, 16  ;;  %v4349_v19 = vsel %vm4015_vm7, %v3013_v4, %v836_v15  ;;  %v2111_v55 = vrot.slane %v2109_v43, 4  ;;  %v2122_v44 = vrot.slane %v2120_v18, 4  ;;  %v4375_v43 = vld [vmem:[%s3821_s5 + $0x40] sm:$0xf] }
  0x71   : > { %v2098_v39 = vrot.slane %v2096_v22, 4  ;;  %v4366_v22 = vrot.slane %v2129_v48, 5  ;;  %v3690_v18 = vld [vmem:[%s3821_s5 + $0x60] sm:$0xff]   ;;  %v2094_v4 = vsel %vm3860_vm4, %v2089_v37, %v2093_v52  ;;  %v2115_v48 = vshll.u32 %v4357_v36, 16 }
  0x72   : > { %v2168_v52 = vshrl.u32 %v3187_v34, 16  ;;  %v2171_v37 = vshll.u32 %v3187_v34, 16 }
  0x73   : > { %v2102_v15 = vor.u32 %v2101_v54, %v2098_v39  ;;  %v2136_v63 = vor.u32 %v2135_v57, %v4366_v22  ;;  %v3190_v57 = vld [vmem:[%s3821_s5 + $0x54] sm:$0xf] }
  0x74   : > { %v2170_v50 = vrot.slane %v2168_v52, 4  ;;  %v2195_v34 = vshll.u32 %v3190_v57, 16 }
  0x75   : > { %3448 = vmatmul.mubr.msk.bf16.gmra.mrb[4].mxu0 %vm468_vm3, %v3687_v20  ;;  %v2125_v20 = vrot.slane %v2123_v56, 5  ;;  %v2084_v56 = vsel %vm3860_vm4, %v2079_v53, %v4308_v11  ;;  %v2153_v11 = vshll.u32 %v4375_v43, 16  ;;  %v2157_v53 = vshrl.u32 %v4375_v43, 16 }
  0x76   : > { %3451 = vmatprep.mubr.msk.bf16.mxu0 %vm468_vm3, %v3688_v1  ;;  %v2139_v1 = vshll.u32 %v4364_v21, 16  ;;  %v3200_v54 = vcombine.low %v2084_v56, %v2094_v4  ;;  %v2137_v56 = vrot.slane %v2136_v63, 4  ;;  %v4422_v63 = vld [vmem:[%s3821_s5 + $0x50] sm:$0x1] }
  0x77   : > { %3366 = vmatmul.mubr.msk.bf16.gmra.mrb[12].mxu1 %vm468_vm3, %v2997_v10  ;;  %v4361_v10 = vsel %vm4015_vm7, %v838_v61, %v839_v16  ;;  %v4386_v16 = vld [vmem:[%s3821_s5 + $0x4c] sm:$0xf]  ;;  %v2112_v61 = vor.u32 %v2111_v55, %v4353_v26  ;;  %v2126_v6 = vor.u32 %v2125_v20, %v2122_v44  ;;  %v2103_v55 = vrot.slane %v2102_v15, 4 }
  0x78   : > { %3371 = vmatprep.mubr.msk.bf16.mxu1 %vm468_vm3, %v3015_v41  ;;  %v3184_v41 = vld [vmem:[%s3821_s5 + $0x3c] sm:$0xf]  ;;  %v2177_v39 = vshll.u32 %v4386_v16, 16  ;;  %v2117_v44 = vrot.slane %v2115_v48, 5  ;;  %v2181_v20 = vshrl.u32 %v4386_v16, 16  ;;  %v2141_v33 = vrot.slane %v2139_v1, 5 }
  0x79   : > { %v2144_v49 = vshrl.u32 %v3184_v41, 16  ;;  %v2147_v13 = vshll.u32 %v3184_v41, 16  ;;  %v2113_v41 = vrot.slane %v2112_v61, 4  ;;  %v4410_v15 = vrot.slane %v2153_v11, 5 }
  0x7a   : > { %v2159_v48 = vrot.slane %v2157_v53, 4  ;;  %v2192_v1 = vshrl.u32 %v3190_v57, 16  ;;  %v1363_v11 = vshll.u32 %v4136_v59, 16  ;;  %v2108_v53 = vsel %vm3860_vm4, %v2103_v55, %v4353_v26 }
  0x7b   : > { %v2146_v25 = vrot.slane %v2144_v49, 4  ;;  %v2149_v4 = vrot.slane %v2147_v13, 5  ;;  %v4419_v49 = vrot.slane %v2177_v39, 5  ;;  %v2183_v13 = vrot.slane %v2181_v20, 4 }
  0x7c   : > { %v2118_v52 = vsel %vm3860_vm4, %v2113_v41, %v2117_v44  ;;  %v2160_v57 = vor.u32 %v2159_v48, %v4410_v15  ;;  %v2142_v26 = vsel %vm3860_vm4, %v2137_v56, %v2141_v33  ;;  %v2194_v44 = vrot.slane %v2192_v1, 4  ;;  %v4460_v56 = vld [vmem:[%s3821_s5 + $0x5c] sm:$0x1] }
  0x7d   : > { %3452 = vmatmul.mubr.msk.bf16.gmra.mrb[8].mxu0 %vm468_vm3, %v3689_v40  ;;  %v2127_v40 = vrot.slane %v2126_v6, 4  ;;  %v2150_v20 = vor.u32 %v2149_v4, %v2146_v25  ;;  %v2184_v41 = vor.u32 %v2183_v13, %v4419_v49  ;;  %v4816_v33 = vcombine.low %v4246_v2, %v4261_v9 }
  0x7e   : > { %3455 = vmatprep.mubr.msk.bf16.mxu0 %vm468_vm3, %v3690_v18  ;;  %v3691_v18 = vld [vmem:[%s3821_s5 + $0x6c] sm:$0xff]   ;;  %v2216_v4 = vshrl.u32 %v3193_v7, 16  ;;  %v1367_v48 = vshrl.u32 %v4136_v59, 16  ;;  %v3201_v13 = vcombine.low %v2108_v53, %v2118_v52 }
  0x7f   : > { %3372 = vmatmul.mubr.msk.bf16.vlgmr.msra.gmra.mrb[0].mxu1 %vm468_vm3, %v3016_v27  ;;  %v4407_v27 = vld [vmem:[%s3821_s5 + $0x58] sm:$0xf]  ;;  %v2132_v39 = vsel %vm3860_vm4, %v2127_v40, %v4366_v22  ;;  %v4815_v22 = vcombine.low %v4240_v58, %v4252_v23  ;;  %v2197_v40 = vrot.slane %v2195_v34, 5  ;;  %v2219_v58 = vshll.u32 %v3193_v7, 16 }
  0x80   : > { %3388 = vmatpush3.bf16.msra.mxu1 %v1094_v28  ;;  %3375 = vmatprep.mubr.msk.bf16.mxu1 %vm468_vm3, %v3017_v29  ;;  %v3700_v28 = vld [vmem:[%s4799_s1 + $0x8] sm:$0x3]  ;;  %v2173_v29 = vrot.slane %v2171_v37, 5  ;;  %v2201_v61 = vshll.u32 %v4407_v27, 16  ;;  %v2205_v6 = vshrl.u32 %v4407_v27, 16  ;;  %v2568_v37 = vsel %vm493_vm0, %v4294_v38, 0 }
  0x81   : > { %3630 = vmatprep.subr.msk.bf16.mxu1 %vm493_vm0, %v3700_v28  ;;  %v2163_v28 = vshll.u32 %v4417_v46, 16  ;;  %v2187_v38 = vshll.u32 %v4422_v63, 16  ;;  %v2225_v23 = vshll.u32 %v4441_v60, 16  ;;  %v3202_v34 = vcombine.low %v2132_v39, %v2142_v26 }
  0x82   : > { %v2174_v55 = vor.u32 %v2173_v29, %v2170_v50  ;;  %v4453_v25 = vrot.slane %v2201_v61, 5  ;;  %v2151_v50 = vrot.slane %v2150_v20, 4  ;;  %v2161_v29 = vrot.slane %v2160_v57, 4 }
  0x83   : > { %v2165_v1 = vrot.slane %v2163_v28, 5  ;;  %v2189_v9 = vrot.slane %v2187_v38, 5  ;;  %v2185_v61 = vrot.slane %v2184_v41, 4  ;;  %v2211_v7 = vshll.u32 %v4460_v56, 16  ;;  %v4481_v28 = vld [vmem:[%s3821_s5 + $0x68] sm:$0x1] }
  0x84   : > { %v2175_v2 = vrot.slane %v2174_v55, 4  ;;  %v2218_v35 = vrot.slane %v2216_v4, 4  ;;  %v4471_v59 = vrot.slane %v2225_v23, 5  ;;  %v4473_v57 = vrot.slane %v1363_v11, 5 }
  0x85   : > { %3456 = vmatmul.mubr.msk.bf16.gmra.mrb[12].mxu0 %vm468_vm3, %v3691_v18  ;;  %v2207_v18 = vrot.slane %v2205_v6, 4  ;;  %v2198_v6 = vor.u32 %v2197_v40, %v2194_v44  ;;  %v1369_v53 = vrot.slane %v1367_v48, 4  ;;  %v2156_v52 = vsel %vm3860_vm4, %v2151_v50, %v4410_v15 }
  0x86   : > { %3461 = vmatprep.mubr.msk.bf16.mxu0 %vm468_vm3, %v3200_v54  ;;  %v2229_v54 = vshrl.u32 %v4441_v60, 16  ;;  %v2221_v60 = vrot.slane %v2219_v58, 5  ;;  %v2166_v39 = vsel %vm3860_vm4, %v2161_v29, %v2165_v1  ;;  %v2249_v38 = vshll.u32 %v4469_v12, 16  ;;  %v3692_v1 = vld [vmem:[%s3821_s5 + $0xc] sm:$0xff]  }
  0x87   : > { %3376 = vmatmul.mubr.msk.bf16.gmra.mrb[4].mxu1 %vm468_vm3, %v4815_v22  ;;  %v2208_v22 = vor.u32 %v2207_v18, %v4453_v25  ;;  %v2253_v44 = vshrl.u32 %v4469_v12, 16  ;;  %v4817_v11 = vcombine.low %v4280_v47, %v4298_v51  ;;  %v2180_v15 = vsel %vm3860_vm4, %v2175_v2, %v4419_v49 }
  0x88   : > { %3379 = vmatprep.mubr.msk.bf16.mxu1 %vm468_vm3, %v4816_v33  ;;  %v3196_v33 = vld [vmem:[%s3821_s5 + $0x6c] sm:$0xf]  ;;  %v2231_v20 = vrot.slane %v2229_v54, 4  ;;  %v2190_v41 = vsel %vm3860_vm4, %v2185_v61, %v2189_v9  ;;  %v2199_v40 = vrot.slane %v2198_v6, 4  ;;  %v2213_v18 = vrot.slane %v2211_v7, 5 }
  0x89   : > { %v2240_v26 = vshrl.u32 %v3196_v33, 16  ;;  %v2243_v55 = vshll.u32 %v3196_v33, 16  ;;  %v4818_v4 = vcombine.low %v4319_v62, %v4331_v24  ;;  %v2209_v47 = vrot.slane %v2208_v22, 4  ;;  %v3081_v22 = vld [vmem:[%s3821_s5 + $0x48] sm:$0xf] }
  0x8a   : > { %v2222_v51 = vor.u32 %v2221_v60, %v2218_v35  ;;  %v2235_v49 = vshll.u32 %v4481_v28, 16  ;;  %v1370_v58 = vor.u32 %v1369_v53, %v4473_v57  ;;  %v1373_v23 = vshll.u32 %v4139_v0, 16  ;;  %v4510_v60 = vld [vmem:[%s3821_s5 + $0x74] sm:$0x1] }
  0x8b   : > { %v3203_v54 = vcombine.low %v2156_v52, %v2166_v39  ;;  %v2242_v48 = vrot.slane %v2240_v26, 4  ;;  %v2245_v62 = vrot.slane %v2243_v55, 5  ;;  %v4504_v24 = vrot.slane %v2249_v38, 5 }
  0x8c   : > { %v2255_v50 = vrot.slane %v2253_v44, 4  ;;  %v3204_v29 = vcombine.low %v2180_v15, %v2190_v41  ;;  %v2204_v35 = vsel %vm3860_vm4, %v2199_v40, %v4453_v25  ;;  %v2223_v0 = vrot.slane %v2222_v51, 4  ;;  %v3694_v51 = vld [vmem:[%s3821_s5 + $0x24] sm:$0xff]  }
  0x8d   : > { %3462 = vmatmul.mubr.msk.bf16.vlgmr.msra.gmra.mrb[0].mxu0 %vm468_vm3, %v3201_v13  ;;  %v2214_v13 = vsel %vm3860_vm4, %v2209_v47, %v2213_v18  ;;  %v2237_v2 = vrot.slane %v2235_v49, 5  ;;  %v1371_v9 = vrot.slane %v1370_v58, 4  ;;  %v1375_v61 = vrot.slane %v1373_v23, 5 }
  0x8e   : > { %3478 = vmatpush3.bf16.msra.mxu0 %v2568_v37  ;;  %3465 = vmatprep.mubr.msk.bf16.mxu0 %vm468_vm3, %v3202_v34  ;;  %v2232_v37 = vor.u32 %v2231_v20, %v4471_v59  ;;  %v2463_v6 = vrot.slane %v4268_v31, 5  ;;  %v2246_v7 = vor.u32 %v2245_v62, %v2242_v48  ;;  %v2256_v33 = vor.u32 %v2255_v50, %v4504_v24  ;;  %v3216_v20 = vld [vmem:[%s3821_s5 + $0x18] sm:$0xe]  ;;  %v3218_v62 = vld [vmem:[%s3821_s5 + $0x30] sm:$0xe] }
  0x8f   : > { %3380 = vmatmul.mubr.msk.bf16.gmra.mrb[8].mxu1 %vm468_vm3, %v4817_v11  ;;  %v2259_v25 = vshll.u32 %v4510_v60, 16  ;;  %v4819_v53 = vcombine.low %v4349_v19, %v4361_v10  ;;  %v3205_v52 = vcombine.low %v2204_v35, %v2214_v13  ;;  %v2228_v31 = vsel %vm3860_vm4, %v2223_v0, %v4471_v59  ;;  %v3693_v59 = vld [vmem:[%s3821_s5 + $0x18] sm:$0xff]  }
  0x90   : > { %3383 = vmatprep.mubr.msk.bf16.mxu1 %vm468_vm3, %v4818_v4  ;;  %v2233_v34 = vrot.slane %v2232_v37, 4  ;;  %v1354_v26 = vshrl.u32 %v3081_v22, 16  ;;  %v1357_v55 = vshll.u32 %v3081_v22, 16  ;;  %v3224_v19 = vrot.slane %v3216_v20, 9  ;;  %v3078_v4 = vld [vmem:[%s3821_s5 + $0x3c] sm:$0xf] }
  0x91   : > { %v2465_v10 = vrot.slane %v2463_v6, 4  ;;  %v2466_v38 = vrot.slane %v4302_v30, 5  ;;  %v1376_v44 = vsel %vm3860_vm4, %v1371_v9, %v1375_v61  ;;  %v2247_v11 = vrot.slane %v2246_v7, 4  ;;  %v3217_v30 = vld [vmem:[%s3821_s5 + $0x24] sm:$0xe]  ;;  %v3695_v22 = vld [vmem:[%s3821_s5 + $0x30] sm:$0xff]  }
  0x92   : > { %v2238_v39 = vsel %vm3860_vm4, %v2233_v34, %v2237_v2  ;;  %v2257_v15 = vrot.slane %v2256_v33, 4  ;;  %v2261_v41 = vrot.slane %v2259_v25, 5  ;;  %v1356_v40 = vrot.slane %v1354_v26, 4  ;;  %v3696_v20 = vld [vmem:[%s3821_s5 + $0x3c] sm:$0xff]   ;;  %v3084_v26 = vld [vmem:[%s3821_s5 + $0x54] sm:$0xf] }
  0x93   : > { %v3206_v18 = vcombine.low %v2228_v31, %v2238_v39  ;;  %v1359_v47 = vrot.slane %v1357_v55, 5  ;;  %v2464_v37 = vsel %vm4015_vm7, %v3224_v19, %v2463_v6  ;;  %v2467_v49 = vsel %vm4015_vm7, %v2465_v10, %v2466_v38  ;;  %v3220_v38 = vld [vmem:[%s3821_s5 + $0x48] sm:$0xe] }
  0x94   : > { %v2470_v58 = vrot.slane %v4315_v14, 5  ;;  %v2262_v48 = vsel %vm3860_vm4, %v2257_v15, %v2261_v41  ;;  %v2477_v50 = vrot.slane %v4334_v8, 5  ;;  %v1333_v35 = vshll.u32 %v3078_v4, 16 }
  0x95   : > { %3466 = vmatmul.mubr.msk.bf16.gmra.mrb[4].mxu0 %vm468_vm3, %v3203_v54  ;;  %v1360_v23 = vor.u32 %v1359_v47, %v1356_v40  ;;  %v2252_v54 = vsel %vm3860_vm4, %v2247_v11, %v4504_v24  ;;  %v1339_v14 = vshll.u32 %v4118_v42, 16  ;;  %v3225_v24 = vrot.slane %v3217_v30, 9 }
  0x96   : > { %3469 = vmatprep.mubr.msk.bf16.mxu0 %vm468_vm3, %v3204_v29  ;;  %v1330_v29 = vshrl.u32 %v3078_v4, 16  ;;  %v2473_v8 = vrot.slane %v4357_v36, 5  ;;  %v3233_v0 = vcombine.low %v2464_v37, %v2467_v49  ;;  %v2472_v34 = vrot.slane %v2470_v58, 4  ;;  %v3697_v37 = vld [vmem:[%s3821_s5 + $0x48] sm:$0xff]  }
  0x97   : > { %3384 = vmatmul.mubr.msk.bf16.gmra.mrb[12].mxu1 %vm468_vm3, %v4819_v53  ;;  %v1361_v13 = vrot.slane %v1360_v23, 4  ;;  %v3226_v2 = vrot.slane %v3218_v62, 9  ;;  %v3207_v61 = vcombine.low %v2252_v54, %v2262_v48  ;;  %v2479_v6 = vrot.slane %v2477_v50, 4  ;;  %v3698_v23 = vld [vmem:[%s3821_s5 + $0x54] sm:$0xff]  }
  0x98   : > { %3389 = vmatprep.mubr.msk.bf16.mxu1 %vm468_vm3, %v3692_v1  ;;  %v1343_v1 = vshrl.u32 %v4118_v42, 16  ;;  %v2480_v42 = vrot.slane %v4364_v21, 5  ;;  %v1332_v7 = vrot.slane %v1330_v29, 4  ;;  %v1335_v33 = vrot.slane %v1333_v35, 5 }
  0x99   : > { %v1366_v9 = vsel %vm3860_vm4, %v1361_v13, %v4473_v57  ;;  %v4566_v25 = vrot.slane %v1339_v14, 5  ;;  %v2471_v53 = vsel %vm4015_vm7, %v3225_v24, %v2470_v58  ;;  %v2474_v57 = vsel %vm4015_vm7, %v2472_v34, %v2473_v8  ;;  %v3221_v24 = vld [vmem:[%s3821_s5 + $0x54] sm:$0xe]  ;;  %v4820_v8 = vld [vmem:[#allocation5_spill] sm:$0xff] }
  0x9a   : > { %v1345_v36 = vrot.slane %v1343_v1, 4  ;;  %v2478_v21 = vsel %vm4015_vm7, %v3226_v2, %v2477_v50  ;;  %v2484_v31 = vrot.slane %v4375_v43, 5  ;;  %v1349_v39 = vshll.u32 %v4121_v45, 16  ;;  %v3087_v50 = vld [vmem:[%s3821_s5 + $0x60] sm:$0xf] }
  0x9b   : > { %v2481_v55 = vsel %vm4015_vm7, %v2479_v6, %v2480_v42  ;;  %v1336_v19 = vor.u32 %v1335_v33, %v1332_v7  ;;  %v3234_v43 = vcombine.low %v2471_v53, %v2474_v57  ;;  %v2487_v11 = vrot.slane %v4417_v46, 5  ;;  %v4822_v33 = vld [vmem:[#allocation2_spill] sm:$0xff] }
  0x9c   : > { %v1346_v10 = vor.u32 %v1345_v36, %v4566_v25  ;;  %v1378_v15 = vshrl.u32 %v3084_v26, 16  ;;  %v1381_v41 = vshll.u32 %v3084_v26, 16  ;;  %v1387_v40 = vshll.u32 %v4147_v17, 16 }
  0x9d   : > { %3470 = vmatmul.mubr.msk.bf16.gmra.mrb[8].mxu0 %vm468_vm3, %v3205_v52  ;;  %v3219_v52 = vld [vmem:[%s3821_s5 + $0x3c] sm:$0xe]  ;;  %v2486_v4 = vrot.slane %v2484_v31, 4  ;;  %v1351_v47 = vrot.slane %v1349_v39, 5  ;;  %v2494_v58 = vrot.slane %v4422_v63, 5  ;;  %v2498_v63 = vrot.slane %v4407_v27, 5 }
  0x9e   : > { %3473 = vmatprep.mubr.msk.bf16.mxu0 %vm468_vm3, %v3206_v18  ;;  %v3227_v45 = vrot.slane %v3219_v52, 9  ;;  %v3235_v18 = vcombine.low %v2478_v21, %v2481_v55  ;;  %v1347_v49 = vrot.slane %v1346_v10, 4  ;;  %v1380_v46 = vrot.slane %v1378_v15, 4  ;;  %v3222_v27 = vld [vmem:[%s3821_s5 + $0x60] sm:$0xe] }
  0x9f   : > { %3390 = vmatmul.mubr.msk.bf16.vlgmr.msra.gmra.mrb[0].mxu1 %vm468_vm3, %v3693_v59  ;;  %v1391_v59 = vshrl.u32 %v4147_v17, 16  ;;  %v1383_v54 = vrot.slane %v1381_v41, 5  ;;  %v1389_v48 = vrot.slane %v1387_v40, 5  ;;  %v2488_v29 = vsel %vm4015_vm7, %v2486_v4, %v2487_v11  ;;  %v3699_v52 = vld [vmem:[%s3821_s5 + $0x60] sm:$0xff]  }
  0xa0   : > { %3496 = vmatpush3.bf16.msra.mxu1 %v3803_v3  ;;  %3393 = vmatprep.mubr.msk.bf16.mxu1 %vm468_vm3, %v3694_v51  ;;  %v4563_v3 = vcombine.low %v1366_v9, %v1376_v44  ;;  %v2491_v44 = vrot.slane %v4386_v16, 5  ;;  %v3228_v51 = vrot.slane %v3220_v38, 9  ;;  %v1337_v16 = vrot.slane %v1336_v19, 4  ;;  %v4821_v9 = vld [vmem:[#allocation3_spill] sm:$0xff] }
  0xa1   : > { %v1393_v62 = vrot.slane %v1391_v59, 4  ;;  %v2485_v17 = vsel %vm4015_vm7, %v3227_v45, %v2484_v31  ;;  %v1352_v1 = vsel %vm3860_vm4, %v1347_v49, %v1351_v47  ;;  %v1402_v34 = vshrl.u32 %v3087_v50, 16  ;;  %v3223_v47 = vld [vmem:[%s3821_s5 + $0x6c] sm:$0xe]  ;;  %s4662_s5 = scalar_lea.vmem %s4800_s2, %s2967_s29 }
  0xa2   : > { %v2493_v30 = vrot.slane %v2491_v44, 4  ;;  %v2492_v35 = vsel %vm4015_vm7, %v3228_v51, %v2491_v44  ;;  %v1342_v14 = vsel %vm3860_vm4, %v1337_v16, %v4566_v25  ;;  %v1405_v2 = vshll.u32 %v3087_v50, 16 }
  0xa3   : > { %v1415_v6 = vshrl.u32 %v4821_v9, 16  ;;  %v3236_v42 = vcombine.low %v2485_v17, %v2488_v29  ;;  %v1394_v7 = vor.u32 %v1393_v62, %v1389_v48  ;;  %v1397_v25 = vshll.u32 %v4822_v33, 16 }
  0xa4   : > { %v2495_v13 = vsel %vm4015_vm7, %v2493_v30, %v2494_v58  ;;  %v2500_v53 = vrot.slane %v2498_v63, 4  ;;  %v2501_v57 = vrot.slane %v4460_v56, 5  ;;  %v3095_v21 = vcombine.low %v1342_v14, %v1352_v1 }
  0xa5   : > { %3474 = vmatmul.mubr.msk.bf16.gmra.mrb[12].mxu0 %vm468_vm3, %v3207_v61  ;;  %v1411_v61 = vshll.u32 %v4821_v9, 16  ;;  %v3237_v36 = vcombine.low %v2492_v35, %v2495_v13  ;;  %v3230_v31 = vrot.slane %v3222_v27, 9  ;;  %v2508_v26 = vrot.slane %v4481_v28, 5 }
  0xa6   : > { %3479 = vmatprep.mubr.msk.bf16.mxu0 %vm468_vm3, %v3233_v0  ;;  %v2505_v0 = vrot.slane %v4820_v8, 5  ;;  %v1404_v55 = vrot.slane %v1402_v34, 4  ;;  %v1407_v19 = vrot.slane %v1405_v2, 5  ;;  %v1417_v38 = vrot.slane %v1415_v6, 4 }
  0xa7   : > { %3394 = vmatmul.mubr.msk.bf16.gmra.mrb[4].mxu1 %vm468_vm3, %v3695_v22  ;;  %v1384_v22 = vor.u32 %v1383_v54, %v1380_v46  ;;  %v1413_v10 = vrot.slane %v1411_v61, 5  ;;  %v1399_v45 = vrot.slane %v1397_v25, 5  ;;  %v2502_v28 = vsel %vm4015_vm7, %v2500_v53, %v2501_v57 }
  0xa8   : > { %3397 = vmatprep.mubr.msk.bf16.mxu1 %vm468_vm3, %v3696_v20  ;;  %v3229_v20 = vrot.slane %v3221_v24, 9  ;;  %v2507_v39 = vrot.slane %v2505_v0, 4  ;;  %v2506_v11 = vsel %vm4015_vm7, %v3230_v31, %v2505_v0  ;;  %v2512_v15 = vrot.slane %v4469_v12, 5 }
  0xa9   : > { %v1385_v44 = vrot.slane %v1384_v22, 4  ;;  %v1408_v40 = vor.u32 %v1407_v19, %v1404_v55  ;;  %v1418_v59 = vor.u32 %v1417_v38, %v1413_v10  ;;  %v3231_v30 = vrot.slane %v3223_v47, 9 }
  0xaa   : > { %v2499_v56 = vsel %vm4015_vm7, %v3229_v20, %v2498_v63  ;;  %v2509_v41 = vsel %vm4015_vm7, %v2507_v39, %v2508_v26  ;;  %v2514_v12 = vrot.slane %v2512_v15, 4  ;;  %v2515_v58 = vrot.slane %v4510_v60, 5 }
  0xab   : > { %v1390_v51 = vsel %vm3860_vm4, %v1385_v44, %v1389_v48  ;;  %v3238_v16 = vcombine.low %v2499_v56, %v2502_v28  ;;  %v3239_v49 = vcombine.low %v2506_v11, %v2509_v41  ;;  %v1409_v46 = vrot.slane %v1408_v40, 4 }
  0xac   : > { %v1419_v54 = vrot.slane %v1418_v59, 4  ;;  %v2513_v48 = vsel %vm4015_vm7, %v3231_v30, %v2512_v15  ;;  %v2516_v50 = vsel %vm4015_vm7, %v2514_v12, %v2515_v58 }
  0xad   : > { %3480 = vmatmul.mubr.msk.bf16.vlgmr.msra.gmra.mrb[0].mxu0 %vm468_vm3, %v3234_v43  ;;  %v1395_v43 = vrot.slane %v1394_v7, 4  ;;  %v1414_v60 = vsel %vm3860_vm4, %v1409_v46, %v1413_v10  ;;  %v3240_v29 = vcombine.low %v2513_v48, %v2516_v50 }
  0xae   : > { %3483 = vmatprep.mubr.msk.bf16.mxu0 %vm468_vm3, %v3235_v18  ;;  %v4823_v18 = vld [vmem:[#allocation4_spill] sm:$0xff] }
  0xaf   : > { %3398 = vmatmul.mubr.msk.bf16.gmra.mrb[8].mxu1 %vm468_vm3, %v3697_v37  ;;  %v1421_v4 = vshll.u32 %v4823_v18, 16  ;;  %v1400_v37 = vsel %vm3860_vm4, %v1395_v43, %v1399_v45 }
  0xb0   : > { %3401 = vmatprep.mubr.msk.bf16.mxu1 %vm468_vm3, %v3698_v23  ;;  %v3097_v23 = vcombine.low %v1390_v51, %v1400_v37 }
  0xb1   : > { %v1423_v62 = vrot.slane %v1421_v4, 5 }
  0xb3   : > { %v1424_v17 = vsel %vm3860_vm4, %v1419_v54, %v1423_v62 }
  0xb4   : > { %v3098_v35 = vcombine.low %v1414_v60, %v1424_v17 }
  0xb5   : > { %3484 = vmatmul.mubr.msk.bf16.gmra.mrb[4].mxu0 %vm468_vm3, %v3236_v42 }
  0xb6   : > { %3487 = vmatprep.mubr.msk.bf16.mxu0 %vm468_vm3, %v3237_v36 }
  0xb7   : > { %3402 = vmatmul.mubr.msk.bf16.gmra.mrb[12].mxu1 %vm468_vm3, %v3699_v52 }
  0xb8   : > { %3415 = vmatprep.mubr.msk.bf16.mxu1 %vm468_vm3, %v3095_v21 }
  0xbd   : > { %3488 = vmatmul.mubr.msk.bf16.gmra.mrb[8].mxu0 %vm468_vm3, %v3238_v16 }
  0xbe   : > { %3491 = vmatprep.mubr.msk.bf16.mxu0 %vm468_vm3, %v3239_v49 }
  0xbf   : > { %3416 = vmatmul.mubr.msk.bf16.vlgmr.msra.gmra.mrb[8].mxu1 %vm468_vm3, %v4563_v3 }
  0xc0   : > { %3419 = vmatprep.mubr.msk.bf16.mxu1 %vm468_vm3, %v3097_v23 }
  0xc5   : > { %3492 = vmatmul.mubr.msk.bf16.gmra.mrb[12].mxu0 %vm468_vm3, %v3240_v29 }
  0xc7   : > { %3420 = vmatmul.mubr.msk.bf16.gmra.mrb[12].mxu1 %vm468_vm3, %v3098_v35 }
 0x172   : > { %v3391_v3 = vpop.f32.mrb[0].mxu1 }
 0x173   : > { %v1130_v5 = vpop.f32.mrb[1].mxu1 }
 0x174   : > { %v3392_v63 = vpop.f32.mrb[2].mxu1 }
 0x175   : > { %v1133_v14 = vpop.f32.mrb[3].mxu1 }
 0x17a   : > { %v3395_v1 = vpop.f32.mrb[4].mxu1 }
 0x17b   : > { %v1146_v13 = vpop.f32.mrb[5].mxu1 }
 0x17c   : > { %v3396_v32 = vpop.f32.mrb[6].mxu1 }
 0x17d   : > { %v1149_v24 = vpop.f32.mrb[7].mxu1 }
 0x180   : > { %v3481_v8 = vpop.f32.mrb[0].mxu0 }
 0x181   : > { %v4664_v0 = vadd.f32 %v3481_v8, %v3391_v3  ;;  %v2604_v27 = vpop.f32.mrb[1].mxu0 }
 0x182   : > { %v4666_v34 = vadd.f32 %v2604_v27, %v1130_v5  ;;  %v3482_v2 = vpop.f32.mrb[2].mxu0 }
 0x183   : > { %2686 = vst.msk [vmem:[%s4662_s5 + $0x10] sm:$0xff] %vm2683_vm8, %v4664_v0  ;;  %v4671_v9 = vadd.f32 %v3482_v2, %v3392_v63  ;;  %v2607_v61 = vpop.f32.mrb[3].mxu0  ;;  %v2703_v33 = vsel %vm2683_vm8, %v4664_v0, 0.0 }
 0x184   : > { %2684 = vst.msk [vmem:[%s4662_s5] sm:$0xff] %vm2683_vm8, %v4666_v34  ;;  %v4676_v6 = vadd.f32 %v2607_v61, %v1133_v14  ;;  %v2700_v42 = vsel %vm2683_vm8, %v4666_v34, 0.0 }
 0x185   : > { %2687 = vst.msk [vmem:[%s4662_s5 + $0x18] sm:$0xff] %vm2683_vm8, %v4671_v9  ;;  %v2705_v57 = vsel %vm2683_vm8, %v4671_v9, 0.0 }
 0x186   : > { %2685 = vst.msk [vmem:[%s4662_s5 + $0x8] sm:$0xff] %vm2683_vm8, %v4676_v6  ;;  %v2701_v22 = vsel %vm2683_vm8, %v4676_v6, 0.0 }
 0x187   : > { %v2702_v7 = vadd.f32 %v2701_v22, %v2700_v42 }
 0x188   : > { %v3485_v25 = vpop.f32.mrb[4].mxu0 }
 0x189   : > { %v2704_v36 = vadd.f32 %v2703_v33, %v2702_v7  ;;  %v4690_v20 = vadd.f32 %v3485_v25, %v3395_v1  ;;  %v2620_v53 = vpop.f32.mrb[5].mxu0 }
 0x18a   : > { %v4694_v52 = vadd.f32 %v2620_v53, %v1146_v13  ;;  %v3486_v21 = vpop.f32.mrb[6].mxu0 }
 0x18b   : > { %2690 = vst.msk [vmem:[%s4662_s5 + $0x30] sm:$0xff] %vm2683_vm8, %v4690_v20  ;;  %v2706_v31 = vadd.f32 %v2705_v57, %v2704_v36  ;;  %v4699_v39 = vadd.f32 %v3486_v21, %v3396_v32  ;;  %v2623_v26 = vpop.f32.mrb[7].mxu0  ;;  %v2711_v43 = vsel %vm2683_vm8, %v4690_v20, 0.0 }
 0x18c   : > { %2688 = vst.msk [vmem:[%s4662_s5 + $0x20] sm:$0xff] %vm2683_vm8, %v4694_v52  ;;  %v2707_v55 = vsel %vm2683_vm8, %v4694_v52, 0.0  ;;  %v4706_v19 = vadd.f32 %v2623_v26, %v1149_v24 }
 0x18d   : > { %v2708_v10 = vadd.f32 %v2707_v55, %v2706_v31  ;;  %2691 = vst.msk [vmem:[%s4662_s5 + $0x38] sm:$0xff] %vm2683_vm8, %v4699_v39  ;;  %v2713_v15 = vsel %vm2683_vm8, %v4699_v39, 0.0 }
 0x18e   : > { %2689 = vst.msk [vmem:[%s4662_s5 + $0x28] sm:$0xff] %vm2683_vm8, %v4706_v19  ;;  %v2709_v38 = vsel %vm2683_vm8, %v4706_v19, 0.0 }
 0x18f   : > { %v2710_v44 = vadd.f32 %v2709_v38, %v2708_v10 }
 0x190   : > { %v3489_v45 = vpop.f32.mrb[8].mxu0 }
 0x191   : > { %v2712_v56 = vadd.f32 %v2711_v43, %v2710_v44  ;;  %v2636_v11 = vpop.f32.mrb[9].mxu0 }
 0x192   : > { %v3417_v28 = vpop.f32.mrb[8].mxu1  ;;  %v3490_v59 = vpop.f32.mrb[10].mxu0 }
 0x193   : > { %v4720_v41 = vadd.f32 %v3489_v45, %v3417_v28  ;;  %v1544_v40 = vpop.f32.mrb[9].mxu1  ;;  %v2714_v4 = vadd.f32 %v2713_v15, %v2712_v56  ;;  %v2639_v51 = vpop.f32.mrb[11].mxu0 }
 0x194   : > { %v3506_v18 = vadd.f32 %v2636_v11, %v1544_v40  ;;  %v3418_v47 = vpop.f32.mrb[10].mxu1 }
 0x195   : > { %2694 = vst.msk [vmem:[%s4662_s5 + $0x50] sm:$0xff] %vm2683_vm8, %v4720_v41  ;;  %v3507_v37 = vadd.f32 %v3490_v59, %v3418_v47  ;;  %v1547_v16 = vpop.f32.mrb[11].mxu1  ;;  %v2719_v54 = vsel %vm2683_vm8, %v4720_v41, 0.0 }
 0x196   : > { %2692 = vst.msk [vmem:[%s4662_s5 + $0x40] sm:$0xff] %vm2683_vm8, %v3506_v18  ;;  %v2715_v49 = vsel %vm2683_vm8, %v3506_v18, 0.0  ;;  %v3508_v30 = vadd.f32 %v2639_v51, %v1547_v16 }
 0x197   : > { %v2716_v12 = vadd.f32 %v2715_v49, %v2714_v4  ;;  %2695 = vst.msk [vmem:[%s4662_s5 + $0x58] sm:$0xff] %vm2683_vm8, %v3507_v37  ;;  %v2721_v35 = vsel %vm2683_vm8, %v3507_v37, 0.0 }
 0x198   : > { %2693 = vst.msk [vmem:[%s4662_s5 + $0x48] sm:$0xff] %vm2683_vm8, %v3508_v30  ;;  %v2717_v58 = vsel %vm2683_vm8, %v3508_v30, 0.0  ;;  %v3493_v46 = vpop.f32.mrb[12].mxu0 }
 0x199   : > { %v2718_v23 = vadd.f32 %v2717_v58, %v2716_v12  ;;  %v2652_v48 = vpop.f32.mrb[13].mxu0 }
 0x19a   : > { %v3421_v62 = vpop.f32.mrb[12].mxu1  ;;  %v3494_v29 = vpop.f32.mrb[14].mxu0 }
 0x19b   : > { %v2720_v50 = vadd.f32 %v2719_v54, %v2718_v23  ;;  %v3509_v60 = vadd.f32 %v3493_v46, %v3421_v62  ;;  %v1560_v17 = vpop.f32.mrb[13].mxu1  ;;  %v2655_v63 = vpop.f32.mrb[15].mxu0 }
 0x19c   : > { %v3510_v3 = vadd.f32 %v2652_v48, %v1560_v17  ;;  %v3422_v5 = vpop.f32.mrb[14].mxu1 }
 0x19d   : > { %2698 = vst.msk [vmem:[%s4662_s5 + $0x70] sm:$0xff] %vm2683_vm8, %v3509_v60  ;;  %v2722_v14 = vadd.f32 %v2721_v35, %v2720_v50  ;;  %v3511_v1 = vadd.f32 %v3494_v29, %v3422_v5  ;;  %v1563_v13 = vpop.f32.mrb[15].mxu1  ;;  %v2727_v61 = vsel %vm2683_vm8, %v3509_v60, 0.0 }
 0x19e   : > { %2696 = vst.msk [vmem:[%s4662_s5 + $0x60] sm:$0xff] %vm2683_vm8, %v3510_v3  ;;  %v2723_v32 = vsel %vm2683_vm8, %v3510_v3, 0.0  ;;  %v3512_v24 = vadd.f32 %v2655_v63, %v1563_v13 }
 0x19f   : > { %v2724_v8 = vadd.f32 %v2723_v32, %v2722_v14  ;;  %2699 = vst.msk [vmem:[%s4662_s5 + $0x78] sm:$0xff] %vm2683_vm8, %v3511_v1  ;;  %v2729_v22 = vsel %vm2683_vm8, %v3511_v1, 0.0 }
 0x1a0   : > { %2697 = vst.msk [vmem:[%s4662_s5 + $0x68] sm:$0xff] %vm2683_vm8, %v3512_v24  ;;  %v2725_v27 = vsel %vm2683_vm8, %v3512_v24, 0.0 }
 0x1a1   : > { %v2726_v2 = vadd.f32 %v2725_v27, %v2724_v8 }
 0x1a3   : > { %v2728_v42 = vadd.f32 %v2727_v61, %v2726_v2 }
 0x1a5   : > { %v2730_v7 = vadd.f32 %v2729_v22, %v2728_v42 }
 0x1a7   : > { %v2731_v33 = vrot.slane %v2730_v7, 4 }
 0x1a9   : > { %v2732_v25 = vadd.f32 %v2731_v33, %v2730_v7 }
 0x1ab   : > { %v2733_v36 = vrot.slane %v2732_v25, 2 }
 0x1ad   : > { %v2734_v53 = vadd.f32 %v2733_v36, %v2732_v25 }
 0x1af   : > { %v2735_v57 = vrot.slane %v2734_v53, 1 }
 0x1b1   : > { %v4748_v21 = vadd.f32 %v2735_v57, %v2734_v53 }
 0x1b3   : > { %v2737_v31 = vmul.f32 0.0078125, %v4748_v21 }
 0x1b5   : > { %v2738_v26 = vsub.f32 %v4666_v34, %v2737_v31  ;;  %v2739_v55 = vsub.f32 %v4676_v6, %v2737_v31  ;;  %v2740_v10 = vsub.f32 %v4664_v0, %v2737_v31  ;;  %v2741_v38 = vsub.f32 %v4671_v9, %v2737_v31 }
 0x1b6   : > { %v2742_v44 = vsub.f32 %v4694_v52, %v2737_v31  ;;  %v2743_v43 = vsub.f32 %v4706_v19, %v2737_v31  ;;  %v2744_v45 = vsub.f32 %v4690_v20, %v2737_v31  ;;  %v2745_v56 = vsub.f32 %v4699_v39, %v2737_v31 }
 0x1b7   : > { %v2746_v28 = vsub.f32 %v3506_v18, %v2737_v31  ;;  %v2747_v11 = vsub.f32 %v3508_v30, %v2737_v31  ;;  %v2748_v15 = vsub.f32 %v4720_v41, %v2737_v31  ;;  %v2749_v40 = vsub.f32 %v3507_v37, %v2737_v31 }
 0x1b8   : > { %v2750_v34 = vsub.f32 %v3510_v3, %v2737_v31  ;;  %v2751_v59 = vsub.f32 %v3512_v24, %v2737_v31  ;;  %v2752_v6 = vsub.f32 %v3509_v60, %v2737_v31  ;;  %v2753_v4 = vsub.f32 %v3511_v1, %v2737_v31 }
 0x1b9   : > { %v2754_v0 = vmul.f32 %v2738_v26, %v2738_v26  ;;  %v2755_v47 = vmul.f32 %v2739_v55, %v2739_v55  ;;  %v2756_v9 = vmul.f32 %v2740_v10, %v2740_v10  ;;  %v2757_v51 = vmul.f32 %v2741_v38, %v2741_v38 }
 0x1ba   : > { %v2759_v52 = vmul.f32 %v2743_v43, %v2743_v43  ;;  %v2760_v16 = vmul.f32 %v2744_v45, %v2744_v45  ;;  %v2761_v19 = vmul.f32 %v2745_v56, %v2745_v56  ;;  %v2762_v49 = vmul.f32 %v2746_v28, %v2746_v28 }
 0x1bb   : > { %v2763_v20 = vmul.f32 %v2747_v11, %v2747_v11  ;;  %v2764_v12 = vmul.f32 %v2748_v15, %v2748_v15  ;;  %v2758_v39 = vmul.f32 %v2742_v44, %v2742_v44  ;;  %v2765_v18 = vmul.f32 %v2749_v40, %v2749_v40 }
 0x1bc   : > { %v2766_v30 = vmul.f32 %v2750_v34, %v2750_v34  ;;  %v2767_v58 = vmul.f32 %v2751_v59, %v2751_v59  ;;  %v2768_v41 = vmul.f32 %v2752_v6, %v2752_v6  ;;  %v2769_v37 = vmul.f32 %v2753_v4, %v2753_v4 }
 0x1bd   : > { %v2770_v23 = vsel %vm2683_vm8, %v2754_v0, 0.0  ;;  %v2771_v46 = vsel %vm2683_vm8, %v2755_v47, 0.0  ;;  %v2773_v62 = vsel %vm2683_vm8, %v2756_v9, 0.0  ;;  %v2779_v48 = vsel %vm2683_vm8, %v2759_v52, 0.0 }
 0x1be   : > { %v2772_v54 = vadd.f32 %v2771_v46, %v2770_v23  ;;  %v2781_v50 = vsel %vm2683_vm8, %v2760_v16, 0.0  ;;  %v2783_v60 = vsel %vm2683_vm8, %v2761_v19, 0.0  ;;  %v2785_v17 = vsel %vm2683_vm8, %v2762_v49, 0.0 }
 0x1bf   : > { %v2787_v29 = vsel %vm2683_vm8, %v2763_v20, 0.0  ;;  %v2789_v35 = vsel %vm2683_vm8, %v2764_v12, 0.0  ;;  %v2791_v5 = vsel %vm2683_vm8, %v2765_v18, 0.0  ;;  %v2793_v63 = vsel %vm2683_vm8, %v2766_v30, 0.0 }
 0x1c0   : > { %v2774_v3 = vadd.f32 %v2773_v62, %v2772_v54  ;;  %v2795_v14 = vsel %vm2683_vm8, %v2767_v58, 0.0  ;;  %v2775_v1 = vsel %vm2683_vm8, %v2757_v51, 0.0  ;;  %v2797_v13 = vsel %vm2683_vm8, %v2768_v41, 0.0 }
 0x1c1   : > { %v2799_v32 = vsel %vm2683_vm8, %v2769_v37, 0.0  ;;  %v2777_v8 = vsel %vm2683_vm8, %v2758_v39, 0.0 }
 0x1c2   : > { %v2776_v24 = vadd.f32 %v2775_v1, %v2774_v3 }
 0x1c4   : > { %v2778_v27 = vadd.f32 %v2777_v8, %v2776_v24 }
 0x1c6   : > { %v2780_v2 = vadd.f32 %v2779_v48, %v2778_v27 }
 0x1c8   : > { %v2782_v61 = vadd.f32 %v2781_v50, %v2780_v2 }
 0x1ca   : > { %v2784_v42 = vadd.f32 %v2783_v60, %v2782_v61 }
 0x1cc   : > { %v2786_v22 = vadd.f32 %v2785_v17, %v2784_v42 }
 0x1ce   : > { %v2788_v7 = vadd.f32 %v2787_v29, %v2786_v22 }
 0x1d0   : > { %v2790_v33 = vadd.f32 %v2789_v35, %v2788_v7 }
 0x1d2   : > { %v2792_v25 = vadd.f32 %v2791_v5, %v2790_v33 }
 0x1d4   : > { %v2794_v36 = vadd.f32 %v2793_v63, %v2792_v25 }
 0x1d6   : > { %v2796_v53 = vadd.f32 %v2795_v14, %v2794_v36 }
 0x1d8   : > { %v2798_v57 = vadd.f32 %v2797_v13, %v2796_v53 }
 0x1da   : > { %v2800_v31 = vadd.f32 %v2799_v32, %v2798_v57 }
 0x1dc   : > { %v2801_v26 = vrot.slane %v2800_v31, 4 }
 0x1de   : > { %v2802_v55 = vadd.f32 %v2801_v26, %v2800_v31 }
 0x1e0   : > { %v2803_v10 = vrot.slane %v2802_v55, 2 }
 0x1e2   : > { %v2804_v38 = vadd.f32 %v2803_v10, %v2802_v55 }
 0x1e4   : > { %v2805_v44 = vrot.slane %v2804_v38, 1 }
 0x1e6   : > { %v2806_v43 = vadd.f32 %v2805_v44, %v2804_v38 }
 0x1e8   : > { %v2808_v45 = vsel %vm2807_vm9, %v4748_v21, %v2806_v43 }
 0x1e9   : > { %2810 = vst.msk [vmem:[%s216_s11] sm:$0x3] %vm2809_vm10, %v2808_v45 }
 0x1ea PF: > { %s14_s16 = sadd.s32 1, %s3739_s16   ;;  %s4824_s12 = smov %s3731_s14 }
 0x1eb   : > { %p11_p8 = scmp.ge.s32.totalorder %s14_s16, 6   ;;  %s4825_s13 = smov %s3735_s15 }
 0x1ec   : > { %s4826_s14 = smov %s4829_s17  ;;  %s4827_s15 = smov %s4833_s18 }
 0x1ed   :  { %13 = sbr.rel (!%p11_p8) target bundleno = 3 (0x3), region = 81 }

// kernel: tfc_forward.8
= control target key start
LH: loop header
LB: loop body
LE: loop exit
PB: predicated region body
PF: predicated region fallthrough
CT: control target
= control target key end

     0   :  { %s3841_s12 = smov 0   ;;  %s3843_s13 = smov 0   ;;  %s4878_s0 = inlined_call_operand.vmem [shape: bf16[2,18,18,20], index: 0, kind: input, shape index: {}]   ;;  %s4879_s1 = inlined_call_operand.vmem [shape: bf16[3,3,12,8], index: 1, kind: input, shape index: {}]   ;;  %s4880_s2 = inlined_call_operand.vmem [shape: f32[2,16,16,8], index: 2, kind: output, shape index: {0}]   ;;  %s4881_s3 = inlined_call_operand.vmem [shape: f32[2,2,2,8], index: 3, kind: output, shape index: {1}]  }
   0x1   :  { %s3845_s14 = smov 0   ;;  %s3847_s15 = smov 0  }
   0x2   :  { %s3849_s16 = smov 0  }
   0x3 LB: > { %s23_s17 = sadd.s32 1, %s3811_s14  ;;  %s26_s18 = sadd.s32 1, %s3815_s15  ;;  %s3819_s16 = sphi %s3849_s16, %s14_s16   ;;  %s3815_s15 = sphi %s3847_s15, %s4905_s15   ;;  %s3811_s14 = sphi %s3845_s14, %s4904_s14   ;;  %s3807_s13 = sphi %s3843_s13, %s4903_s13   ;;  %s3803_s12 = sphi %s3841_s12, %s4902_s12  }
   0x4   : > { %p24_p0 = scmp.ge.s32.totalorder %s23_s17, 2  ;;  %p3016_p1 = scmp.ge.s32.totalorder %s3819_s16, 1 }
   0x5   : > { %p156_p2 = scmp.lt.s32.totalorder %s3819_s16, 5 }
   0x6   : > { %s4907_s17 = smov (%p24_p0, %s23_s17), 0  ;;  %s4909_s18 = smov (!%p24_p0, %s26_s18), %s3815_s15 }
   0x7   : > { %p157_p3 = pnand %p3016_p1, %p156_p2  ;;  %p28_p4 = scmp.ge.s32.totalorder %s4909_s18, 2 }
   0x9   : > { %s4911_s18 = smov (%p28_p4, %s4909_s18), 0  ;;  %160 = sbr.rel (%p157_p3) target bundleno = 490 (0x1ea), region = 28 }
  0x10   : > { %v3747_v0 = vld [vmem:[%s4879_s1 + $0x8] sm:$0x3f]   ;;  %vm500_vm0 = vcmask 1045504   ;;  %p193_p5 = scmp.lt.s32.totalorder %s3807_s13, 1  ;;  %v3748_v1 = vld [vmem:[%s4879_s1 + $0x20] sm:$0x3f]  }
  0x11   : > { %3696 = vmatprep.subr.msk.bf16.mxu1 %vm500_vm0, %v3747_v0  ;;  %v502_v2 = vsel %vm500_vm0, %v3747_v0, 0  ;;  %3700 = vmatprep.subr.msk.bf16.mxu0 %vm500_vm0, %v3748_v1  ;;  %v3885_v3 = vsel %vm500_vm0, %v3748_v1, 0  ;;  %s3322_s23 = smul.u32 96, %s3803_s12  ;;  %v3749_v4 = vld [vmem:[%s4879_s1] sm:$0x3f]   ;;  %vm475_vm3 = vcmask 97280  }
  0x12   : > { %3405 = vmatpush3.bf16.msra.mxu1 %v502_v2  ;;  %s4913_s13 = smov (!%p193_p5, %s3807_s13), 1  ;;  %3477 = vmatpush3.bf16.msra.mxu0 %v3885_v3  ;;  %v3750_v5 = vld [vmem:[%s4879_s1 + $0x28] sm:$0x3f]   ;;  %vm248_vm1 = vsmask.f32 3328  ;;  %v3940_v35 = vsel %vm500_vm0, %v3749_v4, 0 }
  0x13   : > { %s3706_s26 = smul.u32 216, %s4913_s13  ;;  %3697 = vmatprep.subr.msk.bf16.mxu1 %vm500_vm0, %v3749_v4  ;;  %vm249_vm2 = vsmask.f32 7440  ;;  %3702 = vmatprep.subr.msk.bf16.mxu0 %vm500_vm0, %v3750_v5  ;;  %v3943_v39 = vsel %vm500_vm0, %v3750_v5, 0  ;;  %vm794_vm5 = vcmask 1042432   ;;  %vm795_vm6 = vcmask 1046532  }
  0x14   : > { %vm3932_vm4 = vmor %vm248_vm1, %vm249_vm2  ;;  %s3018_s25 = sshll.u32 %s3803_s12, 3  ;;  %s3020_s27 = sshll.u32 %s4913_s13, 5  ;;  %vm2737_vm8 = vcmask 64512   ;;  %vm2861_vm9 = vcmask 1040384   ;;  %vm2863_vm10 = vcmask 58368  }
  0x15   : > { %s197_s4 = scalar_lea.vmem %s4878_s0, %s3706_s26  ;;  %vm4091_vm7 = vmor %vm794_vm5, %vm795_vm6  ;;  %p201_p6 = scmp.lt.s32.totalorder %s3018_s25, 15 }
  0x16   : > { %s3900_s5 = scalar_lea.vmem %s197_s4, %s3322_s23  ;;  %p211_p7 = scmp.lt.s32.totalorder %s3803_s12, 1 }
  0x17   : > { %v3904_v6 = vld [vmem:[%s3900_s5] sm:$0xf]  ;;  %v3907_v7 = vld [vmem:[%s3900_s5 + $0x4] sm:$0xf]  ;;  %v3910_v8 = vld [vmem:[%s3900_s5 + $0x8] sm:$0x1] }
  0x18   : > { %v252_v9 = vshrl.u32 %v3904_v6, 16  ;;  %v255_v10 = vshll.u32 %v3904_v6, 16  ;;  %v261_v11 = vshll.u32 %v3907_v7, 16  ;;  %v265_v12 = vshrl.u32 %v3907_v7, 16  ;;  %v3127_v13 = vld [vmem:[%s3900_s5 + $0xc] sm:$0xf] }
  0x19   : > { %v271_v14 = vshll.u32 %v3910_v8, 16  ;;  %v3919_v15 = vld [vmem:[%s3900_s5 + $0x10] sm:$0xf]  ;;  %v3922_v16 = vld [vmem:[%s3900_s5 + $0x14] sm:$0x1]  ;;  %v1258_v22 = vshrl.u32 %v3127_v13, 16 }
  0x1a   : > { %v254_v17 = vrot.slane %v252_v9, 4  ;;  %v257_v18 = vrot.slane %v255_v10, 5  ;;  %v263_v19 = vrot.slane %v261_v11, 5  ;;  %v267_v20 = vrot.slane %v265_v12, 4  ;;  %v3928_v29 = vld [vmem:[%s3900_s5 + $0xc] sm:$0xf] }
  0x1b   : > { %v273_v21 = vrot.slane %v271_v14, 5  ;;  %v1261_v23 = vshll.u32 %v3127_v13, 16  ;;  %v1267_v24 = vshll.u32 %v3919_v15, 16  ;;  %v1271_v27 = vshrl.u32 %v3919_v15, 16  ;;  %v3937_v34 = vld [vmem:[%s3900_s5 + $0x10] sm:$0xf] }
  0x1c   : > { %v258_v25 = vor.u32 %v257_v18, %v254_v17  ;;  %v268_v26 = vor.u32 %v267_v20, %v263_v19  ;;  %v1277_v28 = vshll.u32 %v3922_v16, 16  ;;  %v1260_v31 = vrot.slane %v1258_v22, 4  ;;  %v3946_v42 = vld [vmem:[%s3900_s5 + $0x14] sm:$0x1]  ;;  %v3130_v53 = vld [vmem:[%s3900_s5 + $0x18] sm:$0xf] }
  0x1d   : > { %v1263_v32 = vrot.slane %v1261_v23, 5  ;;  %v1269_v33 = vrot.slane %v1267_v24, 5  ;;  %v1273_v38 = vrot.slane %v1271_v27, 4  ;;  %v276_v43 = vshrl.u32 %v3928_v29, 16  ;;  %v3959_v58 = vld [vmem:[%s3900_s5 + $0x1c] sm:$0xf] }
  0x1e   : > { %v259_v36 = vrot.slane %v258_v25, 4  ;;  %v269_v37 = vrot.slane %v268_v26, 4  ;;  %v1279_v41 = vrot.slane %v1277_v28, 5  ;;  %v279_v44 = vshll.u32 %v3928_v29, 16  ;;  %v3967_v63 = vld [vmem:[%s3900_s5 + $0x20] sm:$0x1] }
  0x1f   : > { %v1264_v40 = vor.u32 %v1263_v32, %v1260_v31  ;;  %v1274_v47 = vor.u32 %v1273_v38, %v1269_v33  ;;  %v285_v48 = vshll.u32 %v3937_v34, 16  ;;  %v278_v51 = vrot.slane %v276_v43, 4  ;;  %v3975_v18 = vld [vmem:[%s3900_s5 + $0x18] sm:$0xf]  ;;  %v3982_v23 = vld [vmem:[%s3900_s5 + $0x1c] sm:$0xf] }
  0x20   : > { %v264_v45 = vsel %vm3932_vm4, %v259_v36, %v263_v19  ;;  %v274_v46 = vsel %vm3932_vm4, %v269_v37, %v273_v21  ;;  %v281_v52 = vrot.slane %v279_v44, 5  ;;  %v289_v56 = vshrl.u32 %v3937_v34, 16  ;;  %v3990_v32 = vld [vmem:[%s3900_s5 + $0x20] sm:$0x1]  ;;  %v3133_v43 = vld [vmem:[%s3900_s5 + $0x24] sm:$0xf] }
  0x21   : > { %v3029_v49 = vcombine.low %v264_v45, %v274_v46  ;;  %v1265_v50 = vrot.slane %v1264_v40, 4  ;;  %v1275_v54 = vrot.slane %v1274_v47, 4  ;;  %v287_v55 = vrot.slane %v285_v48, 5  ;;  %v4002_v44 = vld [vmem:[%s4879_s1 + $0x10] sm:$0x3f]   ;;  %s4915_s25 = smov (!%p201_p6, %s3018_s25), 15 }
  0x22   : > { %v295_v57 = vshll.u32 %v3946_v42, 16  ;;  %v1655_v60 = vrot.slane %v3919_v15, 5  ;;  %v1658_v61 = vrot.slane %v3922_v16, 5  ;;  %v282_v62 = vor.u32 %v281_v52, %v278_v51  ;;  %v4126_v16 = vld [vmem:[%s3900_s5 + $0x4c] sm:$0xf]  ;;  %s3019_s26 = sshll.u32 %s4915_s25, 1 }
  0x23   : > { %3406 = vmatprep.mubr.msk.bf16.mxu1 %vm475_vm3, %v3029_v49  ;;  %v1270_v59 = vsel %vm3932_vm4, %v1265_v50, %v1269_v33  ;;  %v1280_v0 = vsel %vm3932_vm4, %v1275_v54, %v1279_v41  ;;  %v291_v1 = vrot.slane %v289_v56, 4  ;;  %v1282_v4 = vshrl.u32 %v3130_v53, 16  ;;  %v4005_v49 = vld [vmem:[%s3900_s5 + $0x28] sm:$0xf]  ;;  %v4012_v56 = vld [vmem:[%s3900_s5 + $0x2c] sm:$0x1]  ;;  %s205_s28 = sadd.s32 %s3020_s27, %s3019_s26 }
  0x24   : > { %v297_v2 = vrot.slane %v295_v57, 5  ;;  %v3153_v5 = vcombine.low %v1270_v59, %v1280_v0  ;;  %v283_v9 = vrot.slane %v282_v62, 4  ;;  %v1285_v10 = vshll.u32 %v3130_v53, 16  ;;  %s3021_s29 = sshll.u32 %s205_s28, 3  ;;  %s4917_s12 = smov (!%p211_p7, %s3803_s12), 1 }
  0x25   : > { %v1291_v11 = vshll.u32 %v3959_v58, 16  ;;  %v292_v12 = vor.u32 %v291_v1, %v287_v55  ;;  %v1284_v13 = vrot.slane %v1282_v4, 4  ;;  %v1295_v14 = vshrl.u32 %v3959_v58, 16  ;;  %v4019_v4 = vld [vmem:[%s3900_s5 + $0x24] sm:$0xf]  ;;  %s3022_s6 = sshll.u32 %s4913_s13, 1 }
  0x26   : > { %v1301_v17 = vshll.u32 %v3967_v63, 16  ;;  %3478 = vmatprep.mubr.msk.bf16.mxu0 %vm475_vm3, %v3153_v5  ;;  %v288_v19 = vsel %vm3932_vm4, %v283_v9, %v287_v55  ;;  %v1287_v20 = vrot.slane %v1285_v10, 5  ;;  %v1662_v22 = vrot.slane %v3959_v58, 5  ;;  %v4024_v5 = vld [vmem:[%s4879_s1 + $0x30] sm:$0x3f]   ;;  %s214_s7 = sadd.s32 %s3022_s6, %s4917_s12 }
  0x27   : > { %v1293_v21 = vrot.slane %v1291_v11, 5  ;;  %v293_v24 = vrot.slane %v292_v12, 4  ;;  %v1297_v25 = vrot.slane %v1295_v14, 4  ;;  %v1665_v27 = vrot.slane %v3967_v63, 5  ;;  %s3023_s8 = sshll.u32 %s214_s7, 1 }
  0x28   : > { %v1303_v26 = vrot.slane %v1301_v17, 5  ;;  %v1288_v28 = vor.u32 %v1287_v20, %v1284_v13  ;;  %v3987_v31 = vrot.slane %v1662_v22, 4  ;;  %v300_v33 = vshrl.u32 %v3975_v18, 16  ;;  %s216_s11 = scalar_lea.vmem %s4881_s3, %s3023_s8 }
  0x29   : > { %v303_v36 = vshll.u32 %v3975_v18, 16  ;;  %v298_v37 = vsel %vm3932_vm4, %v293_v24, %v297_v2  ;;  %v1298_v38 = vor.u32 %v1297_v25, %v1293_v21  ;;  %v309_v40 = vshll.u32 %v3982_v23, 16  ;;  %v4037_v24 = vld [vmem:[%s3900_s5 + $0x2c] sm:$0x1] }
  0x2a   : > { %v313_v41 = vshrl.u32 %v3982_v23, 16  ;;  %v3030_v45 = vcombine.low %v288_v19, %v298_v37  ;;  %v1289_v46 = vrot.slane %v1288_v28, 4  ;;  %v302_v47 = vrot.slane %v300_v33, 4 }
  0x2b   : > { %v305_v48 = vrot.slane %v303_v36, 5  ;;  %v1299_v50 = vrot.slane %v1298_v38, 4  ;;  %v311_v51 = vrot.slane %v309_v40, 5  ;;  %v319_v53 = vshll.u32 %v3990_v32, 16  ;;  %v3136_v38 = vld [vmem:[%s3900_s5 + $0x30] sm:$0xf] }
  0x2c   : > { %v315_v52 = vrot.slane %v313_v41, 4  ;;  %3407 = vmatmul.mubr.msk.bf16.vlgmr.msra.gmra.mrb[0].mxu1 %vm475_vm3, %v3030_v45  ;;  %v1294_v54 = vsel %vm3932_vm4, %v1289_v46, %v1293_v21  ;;  %v1306_v57 = vshrl.u32 %v3133_v43, 16  ;;  %v1309_v59 = vshll.u32 %v3133_v43, 16  ;;  %v4047_v46 = vld [vmem:[%s3900_s5 + $0x34] sm:$0xf] }
  0x2d   : > { %v306_v55 = vor.u32 %v305_v48, %v302_v47  ;;  %3423 = vmatpush3.bf16.msra.mxu1 %v3940_v35  ;;  %v1304_v62 = vsel %vm3932_vm4, %v1299_v50, %v1303_v26  ;;  %v321_v1 = vrot.slane %v319_v53, 5  ;;  %v1315_v2 = vshll.u32 %v4005_v49, 16  ;;  %v4027_v35 = vld [vmem:[%s3900_s5 + $0x28] sm:$0xf]  ;;  %v4057_v53 = vld [vmem:[%s3900_s5 + $0x38] sm:$0x1] }
  0x2e   : > { %v316_v0 = vor.u32 %v315_v52, %v311_v51  ;;  %v3154_v9 = vcombine.low %v1294_v54, %v1304_v62  ;;  %v1308_v11 = vrot.slane %v1306_v57, 4  ;;  %v1311_v12 = vrot.slane %v1309_v59, 5  ;;  %3698 = vmatprep.subr.msk.bf16.mxu1 %vm500_vm0, %v4002_v44 }
  0x2f   : > { %v307_v10 = vrot.slane %v306_v55, 4  ;;  %v1317_v14 = vrot.slane %v1315_v2, 5  ;;  %v1319_v17 = vshrl.u32 %v4005_v49, 16  ;;  %v1325_v19 = vshll.u32 %v4012_v56, 16 }
  0x30   : > { %v317_v13 = vrot.slane %v316_v0, 4  ;;  %3479 = vmatmul.mubr.msk.bf16.vlgmr.msra.gmra.mrb[0].mxu0 %vm475_vm3, %v3154_v9  ;;  %v1312_v21 = vor.u32 %v1311_v12, %v1308_v11  ;;  %v324_v25 = vshrl.u32 %v4019_v4, 16  ;;  %v327_v26 = vshll.u32 %v4019_v4, 16  ;;  %v4062_v11 = vld [vmem:[%s3900_s5 + $0x30] sm:$0xf] }
  0x31   : > { %v312_v20 = vsel %vm3932_vm4, %v307_v10, %v311_v51  ;;  %3495 = vmatpush3.bf16.msra.mxu0 %v3943_v39  ;;  %v1321_v33 = vrot.slane %v1319_v17, 4  ;;  %v1327_v36 = vrot.slane %v1325_v19, 5  ;;  %v333_v37 = vshll.u32 %v4027_v35, 16  ;;  %v4068_v19 = vld [vmem:[%s3900_s5 + $0x34] sm:$0xf] }
  0x32   : > { %v322_v28 = vsel %vm3932_vm4, %v317_v13, %v321_v1  ;;  %v1313_v41 = vrot.slane %v1312_v21, 4  ;;  %v326_v43 = vrot.slane %v324_v25, 4  ;;  %v329_v45 = vrot.slane %v327_v26, 5  ;;  %3703 = vmatprep.subr.msk.bf16.mxu0 %vm500_vm0, %v4024_v5 }
  0x33   : > { %v3031_v40 = vcombine.low %v312_v20, %v322_v28  ;;  %v1322_v39 = vor.u32 %v1321_v33, %v1317_v14  ;;  %v335_v47 = vrot.slane %v333_v37, 5  ;;  %v337_v48 = vshrl.u32 %v4027_v35, 16  ;;  %v4073_v28 = vld [vmem:[%s3900_s5 + $0x38] sm:$0x1] }
  0x34   : > { %v343_v50 = vshll.u32 %v4037_v24, 16  ;;  %v1318_v51 = vsel %vm3932_vm4, %v1313_v41, %v1317_v14  ;;  %v330_v52 = vor.u32 %v329_v45, %v326_v43  ;;  %v1330_v54 = vshrl.u32 %v3136_v38, 16 }
  0x35   : > { %3410 = vmatprep.mubr.msk.bf16.mxu1 %vm475_vm3, %v3031_v40  ;;  %v1333_v55 = vshll.u32 %v3136_v38, 16  ;;  %v1323_v57 = vrot.slane %v1322_v39, 4  ;;  %v339_v59 = vrot.slane %v337_v48, 4  ;;  %v1339_v0 = vshll.u32 %v4047_v46, 16  ;;  %v3170_v39 = vld [vmem:[%s3900_s5 + $0xc] sm:$0xe] }
  0x36   : > { %v345_v62 = vrot.slane %v343_v50, 5  ;;  %v331_v1 = vrot.slane %v330_v52, 4  ;;  %v1332_v2 = vrot.slane %v1330_v54, 4  ;;  %v1343_v10 = vshrl.u32 %v4047_v46, 16  ;;  %v4085_v52 = vld [vmem:[%s3900_s5 + $0x3c] sm:$0xf] }
  0x37   : > { %v1335_v9 = vrot.slane %v1333_v55, 5  ;;  %v1328_v12 = vsel %vm3932_vm4, %v1323_v57, %v1327_v36  ;;  %v340_v13 = vor.u32 %v339_v59, %v335_v47  ;;  %v1341_v14 = vrot.slane %v1339_v0, 5 }
  0x38   : > { %v1349_v17 = vshll.u32 %v4057_v53, 16  ;;  %v3155_v20 = vcombine.low %v1318_v51, %v1328_v12  ;;  %v336_v21 = vsel %vm3932_vm4, %v331_v1, %v335_v47  ;;  %v1345_v26 = vrot.slane %v1343_v10, 4  ;;  %v4099_v12 = vld [vmem:[%s3900_s5 + $0x44] sm:$0x1] }
  0x39   : > { %v1336_v25 = vor.u32 %v1335_v9, %v1332_v2  ;;  %v341_v33 = vrot.slane %v340_v13, 4  ;;  %v348_v36 = vshrl.u32 %v4062_v11, 16  ;;  %v351_v38 = vshll.u32 %v4062_v11, 16 }
  0x3a   : > { %v1351_v37 = vrot.slane %v1349_v17, 5  ;;  %3482 = vmatprep.mubr.msk.bf16.mxu0 %vm475_vm3, %v3155_v20  ;;  %v1346_v41 = vor.u32 %v1345_v26, %v1341_v14  ;;  %v357_v43 = vshll.u32 %v4068_v19, 16  ;;  %v361_v45 = vshrl.u32 %v4068_v19, 16 }
  0x3b   : > { %v1337_v40 = vrot.slane %v1336_v25, 4  ;;  %v346_v47 = vsel %vm3932_vm4, %v341_v33, %v345_v62  ;;  %v350_v48 = vrot.slane %v348_v36, 4  ;;  %v353_v50 = vrot.slane %v351_v38, 5  ;;  %v4096_v62 = vld [vmem:[%s3900_s5 + $0x40] sm:$0xf] }
  0x3c   : > { %v367_v51 = vshll.u32 %v4073_v28, 16  ;;  %v3032_v54 = vcombine.low %v336_v21, %v346_v47  ;;  %v1347_v57 = vrot.slane %v1346_v41, 4  ;;  %v359_v59 = vrot.slane %v357_v43, 5  ;;  %v3171_v36 = vld [vmem:[%s3900_s5 + $0x18] sm:$0xe] }
  0x3d   : > { %v1342_v55 = vsel %vm3932_vm4, %v1337_v40, %v1341_v14  ;;  %v354_v1 = vor.u32 %v353_v50, %v350_v48  ;;  %v363_v2 = vrot.slane %v361_v45, 4  ;;  %v3178_v10 = vrot.slane %v3170_v39, 9  ;;  %v4119_v43 = vld [vmem:[%s3900_s5 + $0x48] sm:$0xf] }
  0x3e   : > { %v369_v9 = vrot.slane %v367_v51, 5  ;;  %3411 = vmatmul.mubr.msk.bf16.gmra.mrb[4].mxu1 %vm475_vm3, %v3032_v54  ;;  %v1352_v13 = vsel %vm3932_vm4, %v1347_v57, %v1351_v37  ;;  %v1657_v14 = vrot.slane %v1655_v60, 4  ;;  %v372_v17 = vshrl.u32 %v4085_v52, 16  ;;  %v3172_v54 = vld [vmem:[%s3900_s5 + $0x24] sm:$0xe] }
  0x3f   : > { %v375_v20 = vshll.u32 %v4085_v52, 16  ;;  %v3156_v21 = vcombine.low %v1342_v55, %v1352_v13  ;;  %v355_v25 = vrot.slane %v354_v1, 4  ;;  %v364_v26 = vor.u32 %v363_v2, %v359_v59 }
  0x40   : > { %v1656_v33 = vsel %vm4091_vm7, %v3178_v10, %v1655_v60  ;;  %v1659_v37 = vsel %vm4091_vm7, %v1657_v14, %v1658_v61  ;;  %v374_v38 = vrot.slane %v372_v17, 4  ;;  %v381_v41 = vshll.u32 %v4096_v62, 16  ;;  %v4129_v61 = vld [vmem:[%s3900_s5 + $0x50] sm:$0x1]  ;;  %v4148_v14 = vld [vmem:[%s3900_s5 + $0x54] sm:$0xf] }
  0x41   : > { %v377_v40 = vrot.slane %v375_v20, 5  ;;  %3483 = vmatmul.mubr.msk.bf16.gmra.mrb[4].mxu0 %vm475_vm3, %v3156_v21  ;;  %v360_v15 = vsel %vm3932_vm4, %v355_v25, %v359_v59  ;;  %v365_v45 = vrot.slane %v364_v26, 4  ;;  %v3188_v60 = vcombine.low %v1656_v33, %v1659_v37  ;;  %v4164_v25 = vld [vmem:[%s3900_s5 + $0x58] sm:$0xf] }
  0x42   : > { %v385_v39 = vshrl.u32 %v4096_v62, 16  ;;  %v383_v48 = vrot.slane %v381_v41, 5  ;;  %v391_v50 = vshll.u32 %v4099_v12, 16  ;;  %v3179_v51 = vrot.slane %v3171_v36, 9 }
  0x43   : > { %v378_v47 = vor.u32 %v377_v40, %v374_v38  ;;  %v370_v55 = vsel %vm3932_vm4, %v365_v45, %v369_v9  ;;  %3496 = vmatprep.mubr.msk.bf16.mxu0 %vm475_vm3, %v3188_v60  ;;  %v1666_v59 = vsel %vm4091_vm7, %v3987_v31, %v1665_v27  ;;  %v1974_v1 = vsel %vm500_vm0, %v4024_v5, 0  ;;  %v4155_v31 = vld [vmem:[%s4879_s1 + $0x38] sm:$0x3f]  }
  0x44   : > { %v387_v57 = vrot.slane %v385_v39, 4  ;;  %v3033_v2 = vcombine.low %v360_v15, %v370_v55  ;;  %v393_v13 = vrot.slane %v391_v50, 5  ;;  %v1663_v9 = vsel %vm4091_vm7, %v3179_v51, %v1662_v22  ;;  %v4168_v45 = vld [vmem:[%s3900_s5 + $0x5c] sm:$0x1]  ;;  %v3173_v55 = vld [vmem:[%s3900_s5 + $0x30] sm:$0xe] }
  0x45   : > { %v379_v10 = vrot.slane %v378_v47, 4  ;;  %v3189_v63 = vcombine.low %v1663_v9, %v1666_v59  ;;  %v396_v20 = vshrl.u32 %v4119_v43, 16  ;;  %v399_v27 = vshll.u32 %v4119_v43, 16 }
  0x46   : > { %v388_v17 = vor.u32 %v387_v57, %v383_v48  ;;  %3414 = vmatprep.mubr.msk.bf16.mxu1 %vm475_vm3, %v3033_v2  ;;  %v405_v22 = vshll.u32 %v4126_v16, 16  ;;  %v409_v5 = vshrl.u32 %v4126_v16, 16  ;;  %v415_v21 = vshll.u32 %v4129_v61, 16 }
  0x47   : > { %v384_v58 = vsel %vm3932_vm4, %v379_v10, %v383_v48  ;;  %v398_v33 = vrot.slane %v396_v20, 4  ;;  %v401_v36 = vrot.slane %v399_v27, 5  ;;  %v3180_v37 = vrot.slane %v3172_v54, 9  ;;  %v3174_v20 = vld [vmem:[%s3900_s5 + $0x3c] sm:$0xe] }
  0x48   : > { %v389_v26 = vrot.slane %v388_v17, 4  ;;  %v407_v38 = vrot.slane %v405_v22, 5  ;;  %v411_v40 = vrot.slane %v409_v5, 4  ;;  %v417_v41 = vrot.slane %v415_v21, 5 }
  0x49   : > { %v1669_v15 = vrot.slane %v4005_v49, 5  ;;  %3497 = vmatmul.mubr.msk.bf16.vlgmr.msra.gmra.mrb[0].mxu0 %vm475_vm3, %v3189_v63  ;;  %v402_v39 = vor.u32 %v401_v36, %v398_v33  ;;  %v1672_v47 = vrot.slane %v4012_v56, 5  ;;  %v420_v48 = vshrl.u32 %v4148_v14, 16  ;;  %v4184_v56 = vld [vmem:[%s3900_s5 + $0x44] sm:$0x1] }
  0x4a   : > { %v394_v60 = vsel %vm3932_vm4, %v389_v26, %v393_v13  ;;  %3513 = vmatpush3.bf16.msra.mxu0 %v1974_v1  ;;  %v412_v51 = vor.u32 %v411_v40, %v407_v38  ;;  %v423_v2 = vshll.u32 %v4148_v14, 16  ;;  %v429_v10 = vshll.u32 %v4164_v25, 16  ;;  %v4181_v13 = vld [vmem:[%s3900_s5 + $0x40] sm:$0xf] }
  0x4b   : > { %v3034_v50 = vcombine.low %v384_v58, %v394_v60  ;;  %v1670_v49 = vsel %vm4091_vm7, %v3180_v37, %v1669_v15  ;;  %v1671_v54 = vrot.slane %v1669_v15, 4  ;;  %v403_v57 = vrot.slane %v402_v39, 4  ;;  %3704 = vmatprep.subr.msk.bf16.mxu0 %vm500_vm0, %v4155_v31 }
  0x4c   : > { %v422_v59 = vrot.slane %v420_v48, 4  ;;  %v413_v1 = vrot.slane %v412_v51, 4  ;;  %v433_v17 = vshrl.u32 %v4164_v25, 16  ;;  %v439_v63 = vshll.u32 %v4168_v45, 16 }
  0x4d   : > { %3415 = vmatmul.mubr.msk.bf16.gmra.mrb[8].mxu1 %vm475_vm3, %v3034_v50  ;;  %v1673_v9 = vsel %vm4091_vm7, %v1671_v54, %v1672_v47  ;;  %v408_v27 = vsel %vm3932_vm4, %v403_v57, %v407_v38  ;;  %v425_v22 = vrot.slane %v423_v2, 5  ;;  %v431_v5 = vrot.slane %v429_v10, 5  ;;  %v4213_v57 = vld [vmem:[%s3900_s5 + $0x4c] sm:$0xf]  ;;  %v3175_v2 = vld [vmem:[%s3900_s5 + $0x48] sm:$0xe] }
  0x4e   : > { %v3190_v58 = vcombine.low %v1670_v49, %v1673_v9  ;;  %v418_v21 = vsel %vm3932_vm4, %v413_v1, %v417_v41  ;;  %v435_v26 = vrot.slane %v433_v17, 4  ;;  %v441_v33 = vrot.slane %v439_v63, 5  ;;  %v4226_v63 = vld [vmem:[%s3900_s5 + $0x58] sm:$0xf] }
  0x4f   : > { %v3181_v36 = vrot.slane %v3173_v55, 9  ;;  %v3035_v37 = vcombine.low %v408_v27, %v418_v21  ;;  %v426_v40 = vor.u32 %v425_v22, %v422_v59  ;;  %v1676_v15 = vrot.slane %v4047_v46, 5  ;;  %v4216_v59 = vld [vmem:[%s3900_s5 + $0x50] sm:$0x1]  ;;  %v4230_v22 = vld [vmem:[%s3900_s5 + $0x5c] sm:$0x1] }
  0x50   : > { %3500 = vmatprep.mubr.msk.bf16.mxu0 %vm475_vm3, %v3190_v58  ;;  %v1679_v60 = vrot.slane %v4057_v53, 5  ;;  %v436_v38 = vor.u32 %v435_v26, %v431_v5  ;;  %v3182_v39 = vrot.slane %v3174_v20, 9  ;;  %v1683_v47 = vrot.slane %v4181_v13, 5  ;;  %v3176_v20 = vld [vmem:[%s3900_s5 + $0x54] sm:$0xe]  ;;  %4890 = vst [vmem:[#allocation2_spill] sm:$0xff] %v4230_v22 }
  0x51   : > { %v1686_v41 = vrot.slane %v4184_v56, 5  ;;  %3418 = vmatprep.mubr.msk.bf16.mxu1 %vm475_vm3, %v3035_v37  ;;  %v427_v48 = vrot.slane %v426_v40, 4  ;;  %v1677_v50 = vsel %vm4091_vm7, %v3181_v36, %v1676_v15  ;;  %v1678_v51 = vrot.slane %v1676_v15, 4  ;;  %v4239_v36 = vld [vmem:[%s3900_s5 + $0x64] sm:$0xf] }
  0x52   : > { %v437_v46 = vrot.slane %v436_v38, 4  ;;  %v1684_v53 = vsel %vm4091_vm7, %v3182_v39, %v1683_v47  ;;  %v1685_v49 = vrot.slane %v1683_v47, 4  ;;  %v3046_v9 = vcombine.low %v3904_v6, %v3907_v7  ;;  %4891 = vst [vmem:[#allocation3_spill] sm:$0xff] %v4239_v36  ;;  %v3177_v38 = vld [vmem:[%s3900_s5 + $0x60] sm:$0xe] }
  0x53   : > { %v432_v54 = vsel %vm3932_vm4, %v427_v48, %v431_v5  ;;  %v1680_v55 = vsel %vm4091_vm7, %v1678_v51, %v1679_v60  ;;  %v3183_v5 = vrot.slane %v3175_v2, 9  ;;  %v1690_v21 = vrot.slane %v4213_v57, 5  ;;  %v4246_v60 = vld [vmem:[%s3900_s5 + $0x68] sm:$0x1]  ;;  %v772_v2 = vld [vmem:[%s3900_s5 + $0x18] sm:$0xe] }
  0x54   : > { %v442_v10 = vsel %vm3932_vm4, %v437_v46, %v441_v33  ;;  %v3191_v1 = vcombine.low %v1677_v50, %v1680_v55  ;;  %v1687_v17 = vsel %vm4091_vm7, %v1685_v49, %v1686_v41  ;;  %v1693_v6 = vrot.slane %v4216_v59, 5  ;;  %4892 = vst [vmem:[#allocation4_spill] sm:$0xff] %v4246_v60  ;;  %v771_v41 = vld [vmem:[%s3900_s5 + $0xc] sm:$0xe] }
  0x55   : > { %v3036_v27 = vcombine.low %v432_v54, %v442_v10  ;;  %v3192_v58 = vcombine.low %v1684_v53, %v1687_v17  ;;  %v3184_v26 = vrot.slane %v3176_v20, 9  ;;  %v1697_v33 = vrot.slane %v4226_v63, 5 }
  0x56   : > { %3501 = vmatmul.mubr.msk.bf16.gmra.mrb[4].mxu0 %vm475_vm3, %v3191_v1  ;;  %v1691_v37 = vsel %vm4091_vm7, %v3183_v5, %v1690_v21  ;;  %v1692_v40 = vrot.slane %v1690_v21, 4  ;;  %v1700_v15 = vrot.slane %v4230_v22, 5  ;;  %v806_v48 = vrot.slane %v3937_v34, 5  ;;  %v4549_v22 = vld [vmem:[%s3900_s5 + $0x70] sm:$0xf] }
  0x57   : > { %3419 = vmatmul.mubr.msk.bf16.gmra.mrb[12].mxu1 %vm475_vm3, %v3036_v27  ;;  %3504 = vmatprep.mubr.msk.bf16.mxu0 %vm475_vm3, %v3192_v58  ;;  %v1698_v39 = vsel %vm4091_vm7, %v3184_v26, %v1697_v33  ;;  %v1699_v47 = vrot.slane %v1697_v33, 4  ;;  %v3047_v50 = vcombine.low %v3928_v29, %v3937_v34  ;;  %v1704_v46 = vrot.slane %v4239_v36, 5  ;;  %v773_v27 = vld [vmem:[%s3900_s5 + $0x24] sm:$0xe] }
  0x58   : > { %3424 = vmatprep.mubr.msk.bf16.mxu1 %vm475_vm3, %v3046_v9  ;;  %v1694_v51 = vsel %vm4091_vm7, %v1692_v40, %v1693_v6  ;;  %v3185_v54 = vrot.slane %v3177_v38, 9  ;;  %v1707_v55 = vrot.slane %v4246_v60, 5  ;;  %v809_v10 = vrot.slane %v3946_v42, 5  ;;  %v4268_v9 = vld [vmem:[%s4879_s1 + $0x18] sm:$0x3f]  }
  0x59   : > { %v3193_v53 = vcombine.low %v1691_v37, %v1694_v51  ;;  %v1701_v49 = vsel %vm4091_vm7, %v1699_v47, %v1700_v15  ;;  %v3048_v1 = vcombine.low %v3975_v18, %v3982_v23  ;;  %v1706_v34 = vrot.slane %v1704_v46, 4 }
  0x5a   : > { %v3194_v29 = vcombine.low %v1698_v39, %v1701_v49  ;;  %v910_v17 = vsel %vm500_vm0, %v4002_v44, 0  ;;  %v3064_v20 = vrot.slane %v771_v41, 9  ;;  %v808_v58 = vrot.slane %v806_v48, 4  ;;  %v774_v44 = vld [vmem:[%s3900_s5 + $0x30] sm:$0xe] }
  0x5b   : > { %v3065_v42 = vrot.slane %v772_v2, 9  ;;  %v1705_v18 = vsel %vm4091_vm7, %v3185_v54, %v1704_v46  ;;  %v1708_v5 = vsel %vm4091_vm7, %v1706_v34, %v1707_v55  ;;  %v813_v26 = vrot.slane %v3982_v23, 5  ;;  %v775_v49 = vld [vmem:[%s3900_s5 + $0x3c] sm:$0xe]  ;;  %v770_v54 = vld [vmem:[%s3900_s5] sm:$0xe] }
  0x5c   : > { %v4282_v21 = vsel %vm4091_vm7, %v3064_v20, %v806_v48  ;;  %v4288_v6 = vsel %vm4091_vm7, %v808_v58, %v809_v10  ;;  %v816_v33 = vrot.slane %v3990_v32, 5  ;;  %v3066_v37 = vrot.slane %v773_v27, 9  ;;  %v3761_v58 = vld [vmem:[%s3900_s5 + $0x24] sm:$0xff]  }
  0x5d   : > { %v3049_v40 = vcombine.low %v4019_v4, %v4027_v35  ;;  %v3074_v15 = vcombine.low %v4282_v21, %v4288_v6  ;;  %v820_v38 = vrot.slane %v4027_v35, 5  ;;  %v823_v39 = vrot.slane %v4037_v24, 5  ;;  %v3758_v4 = vld [vmem:[%s3900_s5 + $0x18] sm:$0xff]   ;;  %v3770_v21 = vld [vmem:[%s3900_s5 + $0x6c] sm:$0xff]  }
  0x5e   : > { %3505 = vmatmul.mubr.msk.bf16.gmra.mrb[8].mxu0 %vm475_vm3, %v3193_v53  ;;  %v3195_v47 = vcombine.low %v1705_v18, %v1708_v5  ;;  %v4302_v23 = vsel %vm4091_vm7, %v3065_v42, %v813_v26  ;;  %v815_v32 = vrot.slane %v813_v26, 4  ;;  %v3067_v41 = vrot.slane %v774_v44, 9  ;;  %v3242_v42 = vld [vmem:[%s3900_s5 + $0x18] sm:$0xf]  ;;  %v4354_v26 = vld [vmem:[%s3900_s5 + $0x1c] sm:$0xf] }
  0x5f   : > { %3425 = vmatmul.mubr.msk.bf16.vlgmr.msra.gmra.mrb[0].mxu1 %vm475_vm3, %v3047_v50  ;;  %3508 = vmatprep.mubr.msk.bf16.mxu0 %vm475_vm3, %v3194_v29  ;;  %v4307_v48 = vsel %vm4091_vm7, %v3066_v37, %v820_v38  ;;  %v822_v50 = vrot.slane %v820_v38, 4  ;;  %v827_v51 = vrot.slane %v4068_v19, 5  ;;  %v830_v46 = vrot.slane %v4073_v28, 5 }
  0x60   : > { %3441 = vmatpush3.bf16.msra.mxu1 %v910_v17  ;;  %3428 = vmatprep.mubr.msk.bf16.mxu1 %vm475_vm3, %v3048_v1  ;;  %v3050_v35 = vcombine.low %v4062_v11, %v4068_v19  ;;  %v799_v24 = vrot.slane %v3907_v7, 5  ;;  %v4316_v53 = vsel %vm4091_vm7, %v815_v32, %v816_v33  ;;  %v3068_v10 = vrot.slane %v775_v49, 9  ;;  %v776_v33 = vld [vmem:[%s3900_s5 + $0x48] sm:$0xe] }
  0x61   : > { %3699 = vmatprep.subr.msk.bf16.mxu1 %vm500_vm0, %v4268_v9  ;;  %v4324_v2 = vsel %vm4091_vm7, %v822_v50, %v823_v39  ;;  %v4328_v28 = vsel %vm4091_vm7, %v3067_v41, %v827_v51  ;;  %v829_v7 = vrot.slane %v827_v51, 4  ;;  %v3063_v1 = vrot.slane %v770_v54, 9  ;;  %v3245_v51 = vld [vmem:[%s3900_s5 + $0x24] sm:$0xf] }
  0x62   : > { %v834_v34 = vrot.slane %v4096_v62, 5  ;;  %v837_v17 = vrot.slane %v4099_v12, 5  ;;  %v802_v20 = vrot.slane %v3910_v8, 5  ;;  %v801_v27 = vrot.slane %v799_v24, 4  ;;  %v3763_v12 = vld [vmem:[%s3900_s5 + $0x30] sm:$0xff]  }
  0x63   : > { %v4337_v19 = vsel %vm4091_vm7, %v829_v7, %v830_v46  ;;  %v3051_v44 = vcombine.low %v4085_v52, %v4096_v62  ;;  %v2362_v37 = vsel %vm500_vm0, %v4155_v31, 0  ;;  %v3052_v8 = vcombine.low %v4119_v43, %v4126_v16  ;;  %v4373_v31 = vld [vmem:[%s4879_s1 + $0x40] sm:$0x3f]   ;;  %v4387_v46 = vld [vmem:[%s3900_s5 + $0x28] sm:$0xf] }
  0x64   : > { %v4349_v18 = vsel %vm4091_vm7, %v3068_v10, %v834_v34  ;;  %v836_v5 = vrot.slane %v834_v34, 4  ;;  %v803_v52 = vsel %vm4091_vm7, %v801_v27, %v802_v20  ;;  %v2114_v62 = vshrl.u32 %v3242_v42, 16  ;;  %v3248_v7 = vld [vmem:[%s3900_s5 + $0x30] sm:$0xf]  ;;  %v777_v10 = vld [vmem:[%s3900_s5 + $0x54] sm:$0xe] }
  0x65   : > { %v2117_v39 = vshll.u32 %v3242_v42, 16  ;;  %v2127_v32 = vshrl.u32 %v4354_v26, 16  ;;  %v3069_v41 = vrot.slane %v776_v33, 9  ;;  %v844_v50 = vrot.slane %v4129_v61, 5  ;;  %v3767_v42 = vld [vmem:[%s3900_s5 + $0x48] sm:$0xff]  }
  0x66   : > { %3509 = vmatmul.mubr.msk.bf16.gmra.mrb[12].mxu0 %vm475_vm3, %v3195_v47  ;;  %v4366_v38 = vsel %vm4091_vm7, %v836_v5, %v837_v17  ;;  %v2123_v47 = vshll.u32 %v4354_v26, 16  ;;  %v3053_v61 = vcombine.low %v4148_v14, %v4164_v25  ;;  %v2116_v54 = vrot.slane %v2114_v62, 4  ;;  %v4412_v14 = vld [vmem:[%s3900_s5 + $0x20] sm:$0x1]  ;;  %v3254_v43 = vld [vmem:[%s3900_s5 + $0x48] sm:$0xf] }
  0x67   : > { %3429 = vmatmul.mubr.msk.bf16.gmra.mrb[4].mxu1 %vm475_vm3, %v3049_v40  ;;  %3514 = vmatprep.mubr.msk.bf16.mxu0 %vm475_vm3, %v3758_v4  ;;  %v800_v40 = vsel %vm4091_vm7, %v3063_v1, %v799_v24  ;;  %v841_v4 = vrot.slane %v4126_v16, 5  ;;  %v1387_v24 = vshll.u32 %v4213_v57, 16  ;;  %v3765_v1 = vld [vmem:[%s3900_s5 + $0x3c] sm:$0xff]   ;;  %v2119_v34 = vrot.slane %v2117_v39, 5 }
  0x68   : > { %3432 = vmatprep.mubr.msk.bf16.mxu1 %vm475_vm3, %v3050_v35  ;;  %v3073_v49 = vcombine.low %v800_v40, %v803_v52  ;;  %v4401_v17 = vrot.slane %v2123_v47, 5  ;;  %v2129_v20 = vrot.slane %v2127_v32, 4  ;;  %v2138_v5 = vshrl.u32 %v3245_v51, 16 }
  0x69   : > { %v4391_v35 = vsel %vm4091_vm7, %v3069_v41, %v841_v4  ;;  %v843_v16 = vrot.slane %v841_v4, 4  ;;  %v2147_v33 = vshll.u32 %v4387_v46, 16  ;;  %v2165_v40 = vshll.u32 %v3248_v7, 16 }
  0x6a   : > { %v3070_v52 = vrot.slane %v777_v10, 9  ;;  %v848_v47 = vrot.slane %v4164_v25, 5  ;;  %v851_v32 = vrot.slane %v4168_v45, 5  ;;  %v1391_v41 = vshrl.u32 %v4213_v57, 16  ;;  %v3768_v57 = vld [vmem:[%s3900_s5 + $0x54] sm:$0xff]  }
  0x6b   : > { %v4405_v27 = vsel %vm4091_vm7, %v843_v16, %v844_v50  ;;  %v2120_v4 = vor.u32 %v2119_v34, %v2116_v54  ;;  %v2130_v50 = vor.u32 %v2129_v20, %v4401_v17  ;;  %v2140_v16 = vrot.slane %v2138_v5, 4  ;;  %v4435_v54 = vld [vmem:[%s3900_s5 + $0x2c] sm:$0x1]  ;;  %v4443_v5 = vld [vmem:[%s3900_s5 + $0x38] sm:$0x1] }
  0x6c   : > { %v4430_v25 = vsel %vm4091_vm7, %v3070_v52, %v848_v47  ;;  %v850_v45 = vrot.slane %v848_v47, 4  ;;  %v4437_v10 = vrot.slane %v2147_v33, 5  ;;  %v2167_v34 = vrot.slane %v2165_v40, 5 }
  0x6d   : > { %v4439_v20 = vrot.slane %v1387_v24, 5  ;;  %v4451_v47 = vrot.slane %v1391_v41, 4  ;;  %v2121_v33 = vrot.slane %v2120_v4, 4  ;;  %v4457_v24 = vld [vmem:[%s3900_s5 + $0x40] sm:$0xf]  ;;  %v1118_v40 = vsel %vm500_vm0, %v4268_v9, 0 }
  0x6e   : > { %3515 = vmatmul.mubr.msk.bf16.vlgmr.msra.gmra.mrb[0].mxu0 %vm475_vm3, %v3761_v58  ;;  %v4408_v58 = vld [vmem:[%s3900_s5 + $0x34] sm:$0xf]  ;;  %v2181_v4 = vshll.u32 %v4443_v5, 16  ;;  %v2195_v9 = vshll.u32 %v4457_v24, 16 }
  0x6f   : > { %3433 = vmatmul.mubr.msk.bf16.gmra.mrb[8].mxu1 %vm475_vm3, %v3051_v44  ;;  %3531 = vmatpush3.bf16.msra.mxu0 %v2362_v37  ;;  %v2141_v44 = vshll.u32 %v3245_v51, 16  ;;  %v2171_v62 = vshll.u32 %v4408_v58, 16  ;;  %v2175_v39 = vshrl.u32 %v4408_v58, 16  ;;  %v2133_v51 = vshll.u32 %v4412_v14, 16 }
  0x70   : > { %3436 = vmatprep.mubr.msk.bf16.mxu1 %vm475_vm3, %v3052_v8  ;;  %3518 = vmatprep.mubr.msk.bf16.mxu0 %vm475_vm3, %v3763_v12  ;;  %v2151_v8 = vshrl.u32 %v4387_v46, 16  ;;  %v2162_v12 = vshrl.u32 %v3248_v7, 16 }
  0x71   : > { %3705 = vmatprep.subr.msk.bf16.mxu0 %vm500_vm0, %v4373_v31  ;;  %v2143_v7 = vrot.slane %v2141_v44, 5  ;;  %v4445_v44 = vrot.slane %v2171_v62, 5  ;;  %v2177_v52 = vrot.slane %v2175_v39, 4  ;;  %v2131_v62 = vrot.slane %v2130_v50, 4 }
  0x72   : > { %v2135_v37 = vrot.slane %v2133_v51, 5  ;;  %v2157_v39 = vshll.u32 %v4435_v54, 16  ;;  %v2126_v50 = vsel %vm3932_vm4, %v2121_v33, %v4401_v17  ;;  %v2199_v51 = vshrl.u32 %v4457_v24, 16 }
  0x73   : > { %v2144_v29 = vor.u32 %v2143_v7, %v2140_v16  ;;  %v2210_v16 = vshrl.u32 %v3254_v43, 16  ;;  %v2213_v7 = vshll.u32 %v3254_v43, 16  ;;  %v4893_v43 = vcombine.low %v4302_v23, %v4316_v53  ;;  %v4497_v23 = vld [vmem:[%s3900_s5 + $0x58] sm:$0xf]  ;;  %v4500_v53 = vld [vmem:[%s3900_s5 + $0x44] sm:$0x1] }
  0x75   : > { %v2145_v6 = vrot.slane %v2144_v29, 4  ;;  %v2201_v29 = vrot.slane %v2199_v51, 4  ;;  %v2243_v51 = vshll.u32 %v4497_v23, 16 }
  0x76   : > { %3519 = vmatmul.mubr.msk.bf16.gmra.mrb[4].mxu0 %vm475_vm3, %v3765_v1  ;;  %v2153_v1 = vrot.slane %v2151_v8, 4  ;;  %v2178_v8 = vor.u32 %v2177_v52, %v4445_v44 }
  0x77   : > { %3437 = vmatmul.mubr.msk.bf16.gmra.mrb[12].mxu1 %vm475_vm3, %v3053_v61  ;;  %3522 = vmatprep.mubr.msk.bf16.mxu0 %vm475_vm3, %v3767_v42  ;;  %v2164_v61 = vrot.slane %v2162_v12, 4  ;;  %v3769_v42 = vld [vmem:[%s3900_s5 + $0x60] sm:$0xff]   ;;  %v3251_v12 = vld [vmem:[%s3900_s5 + $0x3c] sm:$0xf] }
  0x78   : > { %3442 = vmatprep.mubr.msk.bf16.mxu1 %vm475_vm3, %v3073_v49  ;;  %v4449_v49 = vsel %vm4091_vm7, %v850_v45, %v851_v32  ;;  %v2154_v32 = vor.u32 %v2153_v1, %v4437_v10  ;;  %v4466_v45 = vld [vmem:[%s3900_s5 + $0x4c] sm:$0xf]  ;;  %v2186_v11 = vshrl.u32 %v3251_v12, 16  ;;  %v2189_v55 = vshll.u32 %v3251_v12, 16 }
  0x79   : > { %v2168_v41 = vor.u32 %v2167_v34, %v2164_v61  ;;  %v2136_v1 = vsel %vm3932_vm4, %v2131_v62, %v2135_v37  ;;  %v2159_v61 = vrot.slane %v2157_v39, 5  ;;  %v2223_v17 = vshrl.u32 %v4466_v45, 16  ;;  %v3257_v34 = vld [vmem:[%s3900_s5 + $0x54] sm:$0xf] }
  0x7a   : > { %v2183_v37 = vrot.slane %v2181_v4, 5  ;;  %v2179_v52 = vrot.slane %v2178_v8, 4  ;;  %v2188_v33 = vrot.slane %v2186_v11, 4  ;;  %v2191_v12 = vrot.slane %v2189_v55, 5  ;;  %v4503_v55 = vld [vmem:[%s3900_s5 + $0x50] sm:$0x1] }
  0x7b   : > { %v4490_v62 = vrot.slane %v2195_v9, 5  ;;  %v2212_v39 = vrot.slane %v2210_v16, 4  ;;  %v2234_v8 = vshrl.u32 %v3257_v34, 16  ;;  %v3268_v11 = vcombine.low %v2126_v50, %v2136_v1 }
  0x7c   : > { %v2225_v4 = vrot.slane %v2223_v17, 4  ;;  %v2237_v9 = vshll.u32 %v3257_v34, 16  ;;  %v2247_v16 = vshrl.u32 %v4497_v23, 16  ;;  %v2184_v1 = vsel %vm3932_vm4, %v2179_v52, %v2183_v37 }
  0x7d   : > { %v2205_v17 = vshll.u32 %v4500_v53, 16 }
  0x7e   : > { %3523 = vmatmul.mubr.msk.bf16.gmra.mrb[8].mxu0 %vm475_vm3, %v3768_v57  ;;  %v2219_v57 = vshll.u32 %v4466_v45, 16  ;;  %v2239_v37 = vrot.slane %v2237_v9, 5 }
  0x7f   : > { %3443 = vmatmul.mubr.msk.bf16.vlgmr.msra.gmra.mrb[0].mxu1 %vm475_vm3, %v3074_v15  ;;  %3526 = vmatprep.mubr.msk.bf16.mxu0 %vm475_vm3, %v3769_v42  ;;  %v2155_v15 = vrot.slane %v2154_v32, 4  ;;  %v2169_v42 = vrot.slane %v2168_v41, 4  ;;  %v2215_v32 = vrot.slane %v2213_v7, 5  ;;  %v3260_v7 = vld [vmem:[%s3900_s5 + $0x60] sm:$0xf] }
  0x80   : > { %3459 = vmatpush3.bf16.msra.mxu1 %v1118_v40  ;;  %3446 = vmatprep.mubr.msk.bf16.mxu1 %vm475_vm3, %v4893_v43  ;;  %v3780_v40 = vld [vmem:[%s4879_s1 + $0x20] sm:$0x3f]   ;;  %v4505_v41 = vrot.slane %v2219_v57, 5  ;;  %v2150_v43 = vsel %vm3932_vm4, %v2145_v6, %v4437_v10  ;;  %v2192_v57 = vor.u32 %v2191_v12, %v2188_v33  ;;  %v2229_v6 = vshll.u32 %v4503_v55, 16  ;;  %v4538_v12 = vld [vmem:[%s3900_s5 + $0x5c] sm:$0x1] }
  0x81   : > { %3701 = vmatprep.subr.msk.bf16.mxu1 %vm500_vm0, %v3780_v40  ;;  %v2160_v40 = vsel %vm3932_vm4, %v2155_v15, %v2159_v61  ;;  %v2174_v50 = vsel %vm3932_vm4, %v2169_v42, %v4445_v44  ;;  %v4522_v10 = vld [vmem:[%s3900_s5 + $0x64] sm:$0xf]  ;;  %v2202_v61 = vor.u32 %v2201_v29, %v4490_v62  ;;  %v2216_v34 = vor.u32 %v2215_v32, %v2212_v39 }
  0x82   : > { %v2236_v15 = vrot.slane %v2234_v8, 4  ;;  %v4894_v44 = vcombine.low %v4307_v48, %v4324_v2  ;;  %v2226_v42 = vor.u32 %v2225_v4, %v4505_v41  ;;  %v2258_v52 = vshrl.u32 %v3260_v7, 16 }
  0x83   : > { %v2261_v33 = vshll.u32 %v3260_v7, 16  ;;  %v4540_v29 = vrot.slane %v2243_v51, 5  ;;  %v2249_v48 = vrot.slane %v2247_v16, 4  ;;  %v2267_v2 = vshll.u32 %v4522_v10, 16 }
  0x84   : > { %v2271_v39 = vshrl.u32 %v4522_v10, 16  ;;  %v3269_v32 = vcombine.low %v2150_v43, %v2160_v40  ;;  %v2622_v8 = vsel %vm500_vm0, %v4373_v31, 0  ;;  %v2207_v4 = vrot.slane %v2205_v17, 5 }
  0x85   : > { %v2193_v9 = vrot.slane %v2192_v57, 4  ;;  %v2231_v7 = vrot.slane %v2229_v6, 5  ;;  %v2227_v51 = vrot.slane %v2226_v42, 4  ;;  %v2253_v16 = vshll.u32 %v4538_v12, 16  ;;  %v4558_v57 = vld [vmem:[%s3900_s5 + $0x68] sm:$0x1] }
  0x86   : > { %3527 = vmatmul.mubr.msk.bf16.gmra.mrb[12].mxu0 %vm475_vm3, %v3770_v21  ;;  %v4895_v21 = vcombine.low %v4328_v28, %v4337_v19  ;;  %v2203_v28 = vrot.slane %v2202_v61, 4  ;;  %v2217_v19 = vrot.slane %v2216_v34, 4  ;;  %v2263_v60 = vrot.slane %v2261_v33, 5 }
  0x87   : > { %3447 = vmatmul.mubr.msk.bf16.gmra.mrb[4].mxu1 %vm475_vm3, %v4894_v44  ;;  %3532 = vmatprep.mubr.msk.bf16.mxu0 %vm475_vm3, %v3268_v11  ;;  %v3270_v11 = vcombine.low %v2174_v50, %v2184_v1  ;;  %v3263_v44 = vld [vmem:[%s3900_s5 + $0x6c] sm:$0xf]  ;;  %v2240_v36 = vor.u32 %v2239_v37, %v2236_v15  ;;  %v2250_v43 = vor.u32 %v2249_v48, %v4540_v29  ;;  %v4552_v40 = vrot.slane %v2267_v2, 5 }
  0x88   : > { %3450 = vmatprep.mubr.msk.bf16.mxu1 %vm475_vm3, %v4895_v21  ;;  %v2260_v21 = vrot.slane %v2258_v52, 4  ;;  %v2273_v31 = vrot.slane %v2271_v39, 4  ;;  %v1394_v50 = vor.u32 %v4451_v47, %v4439_v20  ;;  %v1397_v1 = vshll.u32 %v4216_v59, 16 }
  0x89   : > { %v2282_v17 = vshrl.u32 %v3263_v44, 16  ;;  %v2285_v61 = vshll.u32 %v3263_v44, 16  ;;  %v2198_v34 = vsel %vm3932_vm4, %v2193_v9, %v4490_v62  ;;  %v2208_v6 = vsel %vm3932_vm4, %v2203_v28, %v2207_v4 }
  0x8a   : > { %v2291_v15 = vshll.u32 %v4549_v22, 16  ;;  %v2295_v42 = vshrl.u32 %v4549_v22, 16  ;;  %v4896_v59 = vcombine.low %v4349_v18, %v4366_v38  ;;  %v2222_v47 = vsel %vm3932_vm4, %v2217_v19, %v4505_v41 }
  0x8b   : > { %v2232_v62 = vsel %vm3932_vm4, %v2227_v51, %v2231_v7  ;;  %v2255_v37 = vrot.slane %v2253_v16, 5  ;;  %v2264_v52 = vor.u32 %v2263_v60, %v2260_v21  ;;  %v4897_v33 = vcombine.low %v4391_v35, %v4405_v27  ;;  %v3142_v21 = vld [vmem:[%s3900_s5 + $0x48] sm:$0xf] }
  0x8c   : > { %v2241_v18 = vrot.slane %v2240_v36, 4  ;;  %v2251_v38 = vrot.slane %v2250_v43, 4  ;;  %v2274_v48 = vor.u32 %v2273_v31, %v4552_v40  ;;  %v2277_v2 = vshll.u32 %v4558_v57, 16  ;;  %v3772_v36 = vld [vmem:[%s3900_s5 + $0xc] sm:$0xff]   ;;  %v3285_v31 = vld [vmem:[%s3900_s5 + $0x18] sm:$0xe] }
  0x8d   : > { %v2284_v41 = vrot.slane %v2282_v17, 4  ;;  %v2287_v39 = vrot.slane %v2285_v61, 5  ;;  %v4587_v60 = vrot.slane %v2291_v15, 5  ;;  %v2297_v35 = vrot.slane %v2295_v42, 4 }
  0x8e   : > { %3533 = vmatmul.mubr.msk.bf16.vlgmr.msra.gmra.mrb[0].mxu0 %vm475_vm3, %v3269_v32  ;;  %v3271_v32 = vcombine.low %v2198_v34, %v2208_v6  ;;  %v1395_v27 = vrot.slane %v1394_v50, 4  ;;  %v1399_v4 = vrot.slane %v1397_v1, 5  ;;  %v3272_v9 = vcombine.low %v2222_v47, %v2232_v62 }
  0x8f   : > { %3451 = vmatmul.mubr.msk.bf16.gmra.mrb[8].mxu1 %vm475_vm3, %v4896_v59  ;;  %3549 = vmatpush3.bf16.msra.mxu0 %v2622_v8  ;;  %v4585_v8 = vld [vmem:[%s3900_s5 + $0x74] sm:$0x1]  ;;  %v2246_v28 = vsel %vm3932_vm4, %v2241_v18, %v4540_v29  ;;  %v2256_v19 = vsel %vm3932_vm4, %v2251_v38, %v2255_v37  ;;  %v2275_v7 = vrot.slane %v2274_v48, 4  ;;  %v2279_v44 = vrot.slane %v2277_v2, 5  ;;  %v3773_v37 = vld [vmem:[%s3900_s5 + $0x18] sm:$0xff]  }
  0x90   : > { %3454 = vmatprep.mubr.msk.bf16.mxu1 %vm475_vm3, %v4897_v33  ;;  %3536 = vmatprep.mubr.msk.bf16.mxu0 %vm475_vm3, %v3270_v11  ;;  %v2265_v11 = vrot.slane %v2264_v52, 4  ;;  %v2288_v51 = vor.u32 %v2287_v39, %v2284_v41  ;;  %v2301_v16 = vshll.u32 %v4585_v8, 16  ;;  %v2298_v43 = vor.u32 %v2297_v35, %v4587_v60  ;;  %v3774_v33 = vld [vmem:[%s3900_s5 + $0x24] sm:$0xff]   ;;  %v3139_v18 = vld [vmem:[%s3900_s5 + $0x3c] sm:$0xf] }
  0x91   : > { %v2511_v50 = vrot.slane %v4354_v26, 5  ;;  %v4898_v1 = vcombine.low %v4430_v25, %v4449_v49  ;;  %v3273_v29 = vcombine.low %v2246_v28, %v2256_v19  ;;  %v2280_v26 = vsel %vm3932_vm4, %v2275_v7, %v2279_v44  ;;  %v3286_v41 = vld [vmem:[%s3900_s5 + $0x24] sm:$0xe]  ;;  %v3287_v35 = vld [vmem:[%s3900_s5 + $0x30] sm:$0xe] }
  0x92   : > { %v2270_v17 = vsel %vm3932_vm4, %v2265_v11, %v4552_v40  ;;  %v1378_v61 = vshrl.u32 %v3142_v21, 16  ;;  %v1381_v34 = vshll.u32 %v3142_v21, 16  ;;  %v1400_v25 = vsel %vm3932_vm4, %v1395_v27, %v1399_v4  ;;  %v3775_v21 = vld [vmem:[%s3900_s5 + $0x30] sm:$0xff]  }
  0x93   : > { %v2289_v49 = vrot.slane %v2288_v51, 4  ;;  %v2303_v6 = vrot.slane %v2301_v16, 5  ;;  %v3293_v15 = vrot.slane %v3285_v31, 9  ;;  %v2514_v42 = vrot.slane %v4412_v14, 5 }
  0x94   : > { %v2299_v59 = vrot.slane %v2298_v43, 4  ;;  %v2513_v40 = vrot.slane %v2511_v50, 4  ;;  %v1380_v47 = vrot.slane %v1378_v61, 4  ;;  %v1383_v62 = vrot.slane %v1381_v34, 5  ;;  %v3145_v34 = vld [vmem:[%s3900_s5 + $0x54] sm:$0xf] }
  0x95   : > { %v3274_v52 = vcombine.low %v2270_v17, %v2280_v26  ;;  %v2294_v48 = vsel %vm3932_vm4, %v2289_v49, %v4587_v60  ;;  %v2512_v2 = vsel %vm4091_vm7, %v3293_v15, %v2511_v50  ;;  %v2518_v14 = vrot.slane %v4387_v46, 5  ;;  %v3288_v17 = vld [vmem:[%s3900_s5 + $0x3c] sm:$0xe]  ;;  %v3289_v15 = vld [vmem:[%s3900_s5 + $0x48] sm:$0xe] }
  0x96   : > { %3537 = vmatmul.mubr.msk.bf16.gmra.mrb[4].mxu0 %vm475_vm3, %v3271_v32  ;;  %v1384_v38 = vor.u32 %v1383_v62, %v1380_v47  ;;  %v2304_v39 = vsel %vm3932_vm4, %v2299_v59, %v2303_v6  ;;  %v2515_v32 = vsel %vm4091_vm7, %v2513_v40, %v2514_v42  ;;  %v2525_v27 = vrot.slane %v4408_v58, 5 }
  0x97   : > { %3455 = vmatmul.mubr.msk.bf16.gmra.mrb[12].mxu1 %vm475_vm3, %v4898_v1  ;;  %3540 = vmatprep.mubr.msk.bf16.mxu0 %vm475_vm3, %v3272_v9  ;;  %v1354_v60 = vshrl.u32 %v3139_v18, 16  ;;  %v1357_v9 = vshll.u32 %v3139_v18, 16  ;;  %v1363_v46 = vshll.u32 %v4181_v13, 16  ;;  %v1367_v11 = vshrl.u32 %v4181_v13, 16  ;;  %v3776_v1 = vld [vmem:[%s3900_s5 + $0x3c] sm:$0xff]  }
  0x98   : > { %3460 = vmatprep.mubr.msk.bf16.mxu1 %vm475_vm3, %v3772_v36  ;;  %v1385_v4 = vrot.slane %v1384_v38, 4  ;;  %v3294_v36 = vrot.slane %v3286_v41, 9  ;;  %v2520_v28 = vrot.slane %v2518_v14, 4  ;;  %v2521_v19 = vrot.slane %v4435_v54, 5 }
  0x99   : > { %v3295_v7 = vrot.slane %v3287_v35, 9  ;;  %v3275_v51 = vcombine.low %v2294_v48, %v2304_v39  ;;  %v3303_v16 = vcombine.low %v2512_v2, %v2515_v32  ;;  %v2527_v13 = vrot.slane %v2525_v27, 4  ;;  %v3777_v48 = vld [vmem:[%s3900_s5 + $0x48] sm:$0xff]   ;;  %v3778_v39 = vld [vmem:[%s3900_s5 + $0x54] sm:$0xff]  }
  0x9a   : > { %v1390_v58 = vsel %vm3932_vm4, %v1385_v4, %v4439_v20  ;;  %v1356_v43 = vrot.slane %v1354_v60, 4  ;;  %v1359_v31 = vrot.slane %v1357_v9, 5  ;;  %v4646_v50 = vrot.slane %v1363_v46, 5  ;;  %v3148_v4 = vld [vmem:[%s3900_s5 + $0x60] sm:$0xf] }
  0x9b   : > { %v4642_v44 = vcombine.low %v1390_v58, %v1400_v25  ;;  %v1369_v20 = vrot.slane %v1367_v11, 4  ;;  %v2519_v54 = vsel %vm4091_vm7, %v3294_v36, %v2518_v14  ;;  %v2532_v26 = vrot.slane %v4457_v24, 5  ;;  %v3290_v58 = vld [vmem:[%s3900_s5 + $0x54] sm:$0xe] }
  0x9c   : > { %v1373_v61 = vshll.u32 %v4184_v56, 16  ;;  %v1360_v49 = vor.u32 %v1359_v31, %v1356_v43  ;;  %v2539_v42 = vrot.slane %v4466_v45, 5  ;;  %v3296_v56 = vrot.slane %v3288_v17, 9  ;;  %v4900_v31 = vld [vmem:[#allocation2_spill] sm:$0xff] }
  0x9d   : > { %v1370_v6 = vor.u32 %v1369_v20, %v4646_v50  ;;  %v2535_v59 = vrot.slane %v4500_v53, 5  ;;  %v1402_v40 = vshrl.u32 %v3145_v34, 16  ;;  %v1405_v47 = vshll.u32 %v3145_v34, 16 }
  0x9e   : > { %3541 = vmatmul.mubr.msk.bf16.gmra.mrb[8].mxu0 %vm475_vm3, %v3273_v29  ;;  %v2522_v29 = vsel %vm4091_vm7, %v2520_v28, %v2521_v19  ;;  %v1411_v62 = vshll.u32 %v4226_v63, 16  ;;  %v1375_v18 = vrot.slane %v1373_v61, 5  ;;  %v3297_v38 = vrot.slane %v3289_v15, 9 }
  0x9f   : > { %3461 = vmatmul.mubr.msk.bf16.vlgmr.msra.gmra.mrb[0].mxu1 %vm475_vm3, %v3773_v37  ;;  %3544 = vmatprep.mubr.msk.bf16.mxu0 %vm475_vm3, %v3274_v52  ;;  %v3304_v24 = vcombine.low %v2519_v54, %v2522_v29  ;;  %v1415_v37 = vshrl.u32 %v4226_v63, 16  ;;  %v1361_v45 = vrot.slane %v1360_v49, 4  ;;  %v1371_v2 = vrot.slane %v1370_v6, 4 }
  0xa0   : > { %3567 = vmatpush3.bf16.msra.mxu1 %v3885_v3  ;;  %3464 = vmatprep.mubr.msk.bf16.mxu1 %vm475_vm3, %v3774_v33  ;;  %v2528_v3 = vrot.slane %v4443_v5, 5  ;;  %v2526_v5 = vsel %vm4091_vm7, %v3295_v7, %v2525_v27  ;;  %v2534_v33 = vrot.slane %v2532_v26, 4  ;;  %v2541_v41 = vrot.slane %v2539_v42, 4 }
  0xa1   : > { %v2542_v14 = vrot.slane %v4503_v55, 5  ;;  %v1404_v53 = vrot.slane %v1402_v40, 4  ;;  %v1407_v32 = vrot.slane %v1405_v47, 5  ;;  %v1413_v35 = vrot.slane %v1411_v62, 5 }
  0xa2   : > { %v2529_v25 = vsel %vm4091_vm7, %v2527_v13, %v2528_v3  ;;  %v1417_v27 = vrot.slane %v1415_v37, 4  ;;  %v2533_v63 = vsel %vm4091_vm7, %v3296_v56, %v2532_v26  ;;  %v2536_v60 = vsel %vm4091_vm7, %v2534_v33, %v2535_v59  ;;  %v4901_v37 = vld [vmem:[#allocation4_spill] sm:$0xff]  ;;  %v3292_v33 = vld [vmem:[%s3900_s5 + $0x6c] sm:$0xe] }
  0xa3   : > { %v3305_v52 = vcombine.low %v2526_v5, %v2529_v25  ;;  %v2540_v9 = vsel %vm4091_vm7, %v3297_v38, %v2539_v42  ;;  %v2546_v55 = vrot.slane %v4497_v23, 5  ;;  %v1366_v46 = vsel %vm3932_vm4, %v1361_v45, %v4646_v50  ;;  %v3291_v23 = vld [vmem:[%s3900_s5 + $0x60] sm:$0xe] }
  0xa4   : > { %v1376_v11 = vsel %vm3932_vm4, %v1371_v2, %v1375_v18  ;;  %v2543_v36 = vsel %vm4091_vm7, %v2541_v41, %v2542_v14  ;;  %v2553_v28 = vrot.slane %v4522_v10, 5  ;;  %v1426_v19 = vshrl.u32 %v3148_v4, 16  ;;  %v3779_v10 = vld [vmem:[%s3900_s5 + $0x60] sm:$0xff]   ;;  %s4742_s5 = scalar_lea.vmem %s4880_s2, %s3021_s29 }
  0xa5   : > { %v1429_v7 = vshll.u32 %v3148_v4, 16  ;;  %v3306_v3 = vcombine.low %v2533_v63, %v2536_v60  ;;  %v1418_v43 = vor.u32 %v1417_v27, %v1413_v35  ;;  %v1421_v50 = vshll.u32 %v4900_v31, 16 }
  0xa6   : > { %3545 = vmatmul.mubr.msk.bf16.gmra.mrb[12].mxu0 %vm475_vm3, %v3275_v51  ;;  %v4899_v51 = vld [vmem:[#allocation3_spill] sm:$0xff]  ;;  %v3157_v20 = vcombine.low %v1366_v46, %v1376_v11  ;;  %v3298_v54 = vrot.slane %v3290_v58, 9  ;;  %v2549_v29 = vrot.slane %v4538_v12, 5  ;;  %v2548_v17 = vrot.slane %v2546_v55, 4 }
  0xa7   : > { %3465 = vmatmul.mubr.msk.bf16.gmra.mrb[4].mxu1 %vm475_vm3, %v3775_v21  ;;  %3550 = vmatprep.mubr.msk.bf16.mxu0 %vm475_vm3, %v3303_v16  ;;  %v1435_v16 = vshll.u32 %v4899_v51, 16  ;;  %v1439_v13 = vshrl.u32 %v4899_v51, 16  ;;  %v1408_v21 = vor.u32 %v1407_v32, %v1404_v53  ;;  %v3299_v5 = vrot.slane %v3291_v23, 9 }
  0xa8   : > { %3468 = vmatprep.mubr.msk.bf16.mxu1 %vm475_vm3, %v3776_v1  ;;  %v3307_v1 = vcombine.low %v2540_v9, %v2543_v36  ;;  %v2555_v26 = vrot.slane %v2553_v28, 4  ;;  %v2556_v61 = vrot.slane %v4558_v57, 5  ;;  %v1428_v34 = vrot.slane %v1426_v19, 4 }
  0xa9   : > { %v1431_v25 = vrot.slane %v1429_v7, 5  ;;  %v1437_v49 = vrot.slane %v1435_v16, 5  ;;  %v1441_v6 = vrot.slane %v1439_v13, 4  ;;  %v1409_v15 = vrot.slane %v1408_v21, 4 }
  0xaa   : > { %v1419_v42 = vrot.slane %v1418_v43, 4  ;;  %v2547_v12 = vsel %vm4091_vm7, %v3298_v54, %v2546_v55  ;;  %v2550_v57 = vsel %vm4091_vm7, %v2548_v17, %v2549_v29  ;;  %v2554_v56 = vsel %vm4091_vm7, %v3299_v5, %v2553_v28 }
  0xab   : > { %v2560_v59 = vrot.slane %v4549_v22, 5  ;;  %v2557_v40 = vsel %vm4091_vm7, %v2555_v26, %v2556_v61  ;;  %v1432_v47 = vor.u32 %v1431_v25, %v1428_v34  ;;  %v1442_v62 = vor.u32 %v1441_v6, %v1437_v49 }
  0xac   : > { %v1414_v18 = vsel %vm3932_vm4, %v1409_v15, %v1413_v35  ;;  %v3309_v45 = vcombine.low %v2554_v56, %v2557_v40  ;;  %v3300_v2 = vrot.slane %v3292_v33, 9  ;;  %v2563_v41 = vrot.slane %v4585_v8, 5 }
  0xad   : > { %v2562_v22 = vrot.slane %v2560_v59, 4  ;;  %v1443_v53 = vrot.slane %v1442_v62, 4 }
  0xae   : > { %3551 = vmatmul.mubr.msk.bf16.vlgmr.msra.gmra.mrb[0].mxu0 %vm475_vm3, %v3304_v24  ;;  %v1423_v24 = vrot.slane %v1421_v50, 5  ;;  %v2561_v35 = vsel %vm4091_vm7, %v3300_v2, %v2560_v59 }
  0xaf   : > { %3469 = vmatmul.mubr.msk.bf16.gmra.mrb[8].mxu1 %vm475_vm3, %v3777_v48  ;;  %3554 = vmatprep.mubr.msk.bf16.mxu0 %vm475_vm3, %v3305_v52  ;;  %v1445_v52 = vshll.u32 %v4901_v37, 16  ;;  %v3308_v48 = vcombine.low %v2547_v12, %v2550_v57  ;;  %v2564_v27 = vsel %vm4091_vm7, %v2562_v22, %v2563_v41 }
  0xb0   : > { %3472 = vmatprep.mubr.msk.bf16.mxu1 %vm475_vm3, %v3778_v39  ;;  %v1424_v38 = vsel %vm3932_vm4, %v1419_v42, %v1423_v24  ;;  %v1433_v39 = vrot.slane %v1432_v47, 4  ;;  %v3310_v63 = vcombine.low %v2561_v35, %v2564_v27 }
  0xb1   : > { %v3159_v14 = vcombine.low %v1414_v18, %v1424_v38  ;;  %v1447_v32 = vrot.slane %v1445_v52, 5 }
  0xb2   : > { %v1438_v8 = vsel %vm3932_vm4, %v1433_v39, %v1437_v49 }
  0xb3   : > { %v1448_v4 = vsel %vm3932_vm4, %v1443_v53, %v1447_v32 }
  0xb4   : > { %v3160_v60 = vcombine.low %v1438_v8, %v1448_v4 }
  0xb6   : > { %3555 = vmatmul.mubr.msk.bf16.gmra.mrb[4].mxu0 %vm475_vm3, %v3306_v3 }
  0xb7   : > { %3473 = vmatmul.mubr.msk.bf16.gmra.mrb[12].mxu1 %vm475_vm3, %v3779_v10  ;;  %3558 = vmatprep.mubr.msk.bf16.mxu0 %vm475_vm3, %v3307_v1 }
  0xb8   : > { %3486 = vmatprep.mubr.msk.bf16.mxu1 %vm475_vm3, %v3157_v20 }
  0xbe   : > { %3559 = vmatmul.mubr.msk.bf16.gmra.mrb[8].mxu0 %vm475_vm3, %v3308_v48 }
  0xbf   : > { %3487 = vmatmul.mubr.msk.bf16.vlgmr.msra.gmra.mrb[8].mxu1 %vm475_vm3, %v4642_v44  ;;  %3562 = vmatprep.mubr.msk.bf16.mxu0 %vm475_vm3, %v3309_v45 }
  0xc0   : > { %3490 = vmatprep.mubr.msk.bf16.mxu1 %vm475_vm3, %v3159_v14 }
  0xc6   : > { %3563 = vmatmul.mubr.msk.bf16.gmra.mrb[12].mxu0 %vm475_vm3, %v3310_v63 }
  0xc7   : > { %3491 = vmatmul.mubr.msk.bf16.gmra.mrb[12].mxu1 %vm475_vm3, %v3160_v60 }
 0x172   : > { %v3462_v44 = vpop.f32.mrb[0].mxu1 }
 0x173   : > { %v1154_v0 = vpop.f32.mrb[1].mxu1 }
 0x174   : > { %v3463_v9 = vpop.f32.mrb[2].mxu1 }
 0x175   : > { %v1157_v55 = vpop.f32.mrb[3].mxu1 }
 0x17a   : > { %v3466_v46 = vpop.f32.mrb[4].mxu1 }
 0x17b   : > { %v1170_v11 = vpop.f32.mrb[5].mxu1 }
 0x17c   : > { %v3467_v30 = vpop.f32.mrb[6].mxu1 }
 0x17d   : > { %v1173_v36 = vpop.f32.mrb[7].mxu1 }
 0x181   : > { %v3552_v58 = vpop.f32.mrb[0].mxu0 }
 0x182   : > { %v4744_v28 = vadd.f32 %v3552_v58, %v3462_v44  ;;  %v2658_v23 = vpop.f32.mrb[1].mxu0 }
 0x183   : > { %v4746_v19 = vadd.f32 %v2658_v23, %v1154_v0  ;;  %v3553_v7 = vpop.f32.mrb[2].mxu0 }
 0x184   : > { %2740 = vst.msk [vmem:[%s4742_s5 + $0x10] sm:$0xff] %vm2737_vm8, %v4744_v28  ;;  %v4751_v51 = vadd.f32 %v3553_v7, %v3463_v9  ;;  %v2661_v16 = vpop.f32.mrb[3].mxu0  ;;  %v2757_v31 = vsel %vm2737_vm8, %v4744_v28, 0.0 }
 0x185   : > { %2738 = vst.msk [vmem:[%s4742_s5] sm:$0xff] %vm2737_vm8, %v4746_v19  ;;  %v4756_v13 = vadd.f32 %v2661_v16, %v1157_v55  ;;  %v2754_v3 = vsel %vm2737_vm8, %v4746_v19, 0.0 }
 0x186   : > { %2741 = vst.msk [vmem:[%s4742_s5 + $0x18] sm:$0xff] %vm2737_vm8, %v4751_v51  ;;  %v2759_v29 = vsel %vm2737_vm8, %v4751_v51, 0.0 }
 0x187   : > { %2739 = vst.msk [vmem:[%s4742_s5 + $0x8] sm:$0xff] %vm2737_vm8, %v4756_v13  ;;  %v2755_v21 = vsel %vm2737_vm8, %v4756_v13, 0.0 }
 0x188   : > { %v2756_v43 = vadd.f32 %v2755_v21, %v2754_v3 }
 0x189   : > { %v3556_v50 = vpop.f32.mrb[4].mxu0 }
 0x18a   : > { %v2758_v20 = vadd.f32 %v2757_v31, %v2756_v43  ;;  %v4770_v1 = vadd.f32 %v3556_v50, %v3466_v46  ;;  %v2674_v54 = vpop.f32.mrb[5].mxu0 }
 0x18b   : > { %v4774_v10 = vadd.f32 %v2674_v54, %v1170_v11  ;;  %v3557_v17 = vpop.f32.mrb[6].mxu0 }
 0x18c   : > { %2744 = vst.msk [vmem:[%s4742_s5 + $0x30] sm:$0xff] %vm2737_vm8, %v4770_v1  ;;  %v2760_v5 = vadd.f32 %v2759_v29, %v2758_v20  ;;  %v4779_v26 = vadd.f32 %v3557_v17, %v3467_v30  ;;  %v2677_v61 = vpop.f32.mrb[7].mxu0  ;;  %v2765_v42 = vsel %vm2737_vm8, %v4770_v1, 0.0 }
 0x18d   : > { %2742 = vst.msk [vmem:[%s4742_s5 + $0x20] sm:$0xff] %vm2737_vm8, %v4774_v10  ;;  %v2761_v34 = vsel %vm2737_vm8, %v4774_v10, 0.0  ;;  %v4786_v25 = vadd.f32 %v2677_v61, %v1173_v36 }
 0x18e   : > { %v2762_v49 = vadd.f32 %v2761_v34, %v2760_v5  ;;  %2745 = vst.msk [vmem:[%s4742_s5 + $0x38] sm:$0xff] %vm2737_vm8, %v4779_v26  ;;  %v2767_v59 = vsel %vm2737_vm8, %v4779_v26, 0.0 }
 0x18f   : > { %2743 = vst.msk [vmem:[%s4742_s5 + $0x28] sm:$0xff] %vm2737_vm8, %v4786_v25  ;;  %v2763_v6 = vsel %vm2737_vm8, %v4786_v25, 0.0 }
 0x190   : > { %v2764_v15 = vadd.f32 %v2763_v6, %v2762_v49 }
 0x191   : > { %v3560_v24 = vpop.f32.mrb[8].mxu0 }
 0x192   : > { %v2766_v12 = vadd.f32 %v2765_v42, %v2764_v15  ;;  %v3488_v57 = vpop.f32.mrb[8].mxu1  ;;  %v2690_v56 = vpop.f32.mrb[9].mxu0 }
 0x193   : > { %v4800_v40 = vadd.f32 %v3560_v24, %v3488_v57  ;;  %v1574_v47 = vpop.f32.mrb[9].mxu1  ;;  %v3561_v62 = vpop.f32.mrb[10].mxu0 }
 0x194   : > { %v3577_v37 = vadd.f32 %v2690_v56, %v1574_v47  ;;  %v2768_v52 = vadd.f32 %v2767_v59, %v2766_v12  ;;  %v3489_v33 = vpop.f32.mrb[10].mxu1  ;;  %v2693_v18 = vpop.f32.mrb[11].mxu0 }
 0x195   : > { %2748 = vst.msk [vmem:[%s4742_s5 + $0x50] sm:$0xff] %vm2737_vm8, %v4800_v40  ;;  %v3578_v38 = vadd.f32 %v3561_v62, %v3489_v33  ;;  %v1577_v48 = vpop.f32.mrb[11].mxu1  ;;  %v2773_v53 = vsel %vm2737_vm8, %v4800_v40, 0.0 }
 0x196   : > { %2746 = vst.msk [vmem:[%s4742_s5 + $0x40] sm:$0xff] %vm2737_vm8, %v3577_v37  ;;  %v2769_v45 = vsel %vm2737_vm8, %v3577_v37, 0.0  ;;  %v3579_v2 = vadd.f32 %v2693_v18, %v1577_v48 }
 0x197   : > { %v2770_v22 = vadd.f32 %v2769_v45, %v2768_v52  ;;  %2749 = vst.msk [vmem:[%s4742_s5 + $0x58] sm:$0xff] %vm2737_vm8, %v3578_v38  ;;  %v2775_v60 = vsel %vm2737_vm8, %v3578_v38, 0.0 }
 0x198   : > { %2747 = vst.msk [vmem:[%s4742_s5 + $0x48] sm:$0xff] %vm2737_vm8, %v3579_v2  ;;  %v2771_v41 = vsel %vm2737_vm8, %v3579_v2, 0.0 }
 0x199   : > { %v2772_v14 = vadd.f32 %v2771_v41, %v2770_v22  ;;  %v3564_v39 = vpop.f32.mrb[12].mxu0 }
 0x19a   : > { %v3492_v32 = vpop.f32.mrb[12].mxu1  ;;  %v2706_v35 = vpop.f32.mrb[13].mxu0 }
 0x19b   : > { %v2774_v27 = vadd.f32 %v2773_v53, %v2772_v14  ;;  %v3580_v8 = vadd.f32 %v3564_v39, %v3492_v32  ;;  %v1590_v4 = vpop.f32.mrb[13].mxu1  ;;  %v3565_v63 = vpop.f32.mrb[14].mxu0 }
 0x19c   : > { %v3581_v44 = vadd.f32 %v2706_v35, %v1590_v4  ;;  %v3493_v0 = vpop.f32.mrb[14].mxu1  ;;  %v2709_v9 = vpop.f32.mrb[15].mxu0 }
 0x19d   : > { %2752 = vst.msk [vmem:[%s4742_s5 + $0x70] sm:$0xff] %vm2737_vm8, %v3580_v8  ;;  %v2776_v55 = vadd.f32 %v2775_v60, %v2774_v27  ;;  %v3582_v46 = vadd.f32 %v3565_v63, %v3493_v0  ;;  %v1593_v11 = vpop.f32.mrb[15].mxu1  ;;  %v2781_v16 = vsel %vm2737_vm8, %v3580_v8, 0.0 }
 0x19e   : > { %2750 = vst.msk [vmem:[%s4742_s5 + $0x60] sm:$0xff] %vm2737_vm8, %v3581_v44  ;;  %v2777_v30 = vsel %vm2737_vm8, %v3581_v44, 0.0  ;;  %v3583_v36 = vadd.f32 %v2709_v9, %v1593_v11 }
 0x19f   : > { %v2778_v58 = vadd.f32 %v2777_v30, %v2776_v55  ;;  %2753 = vst.msk [vmem:[%s4742_s5 + $0x78] sm:$0xff] %vm2737_vm8, %v3582_v46  ;;  %v2783_v21 = vsel %vm2737_vm8, %v3582_v46, 0.0 }
 0x1a0   : > { %2751 = vst.msk [vmem:[%s4742_s5 + $0x68] sm:$0xff] %vm2737_vm8, %v3583_v36  ;;  %v2779_v23 = vsel %vm2737_vm8, %v3583_v36, 0.0 }
 0x1a1   : > { %v2780_v7 = vadd.f32 %v2779_v23, %v2778_v58 }
 0x1a3   : > { %v2782_v3 = vadd.f32 %v2781_v16, %v2780_v7 }
 0x1a5   : > { %v2784_v43 = vadd.f32 %v2783_v21, %v2782_v3 }
 0x1a7   : > { %v2785_v31 = vrot.slane %v2784_v43, 4 }
 0x1a9   : > { %v2786_v50 = vadd.f32 %v2785_v31, %v2784_v43 }
 0x1ab   : > { %v2787_v20 = vrot.slane %v2786_v50, 2 }
 0x1ad   : > { %v2788_v54 = vadd.f32 %v2787_v20, %v2786_v50 }
 0x1af   : > { %v2789_v29 = vrot.slane %v2788_v54, 1 }
 0x1b1   : > { %v4828_v17 = vadd.f32 %v2789_v29, %v2788_v54 }
 0x1b3   : > { %v2791_v5 = vmul.f32 0.0078125, %v4828_v17 }
 0x1b5   : > { %v2792_v61 = vsub.f32 %v4746_v19, %v2791_v5  ;;  %v2793_v34 = vsub.f32 %v4756_v13, %v2791_v5  ;;  %v2794_v49 = vsub.f32 %v4744_v28, %v2791_v5  ;;  %v2795_v6 = vsub.f32 %v4751_v51, %v2791_v5 }
 0x1b6   : > { %v2796_v15 = vsub.f32 %v4774_v10, %v2791_v5  ;;  %v2797_v42 = vsub.f32 %v4786_v25, %v2791_v5  ;;  %v2798_v24 = vsub.f32 %v4770_v1, %v2791_v5  ;;  %v2799_v12 = vsub.f32 %v4779_v26, %v2791_v5 }
 0x1b7   : > { %v2800_v57 = vsub.f32 %v3577_v37, %v2791_v5  ;;  %v2801_v56 = vsub.f32 %v3579_v2, %v2791_v5  ;;  %v2802_v59 = vsub.f32 %v4800_v40, %v2791_v5  ;;  %v2803_v47 = vsub.f32 %v3578_v38, %v2791_v5 }
 0x1b8   : > { %v2804_v19 = vsub.f32 %v3581_v44, %v2791_v5  ;;  %v2805_v62 = vsub.f32 %v3583_v36, %v2791_v5  ;;  %v2806_v13 = vsub.f32 %v3580_v8, %v2791_v5  ;;  %v2807_v52 = vsub.f32 %v3582_v46, %v2791_v5 }
 0x1b9   : > { %v2808_v28 = vmul.f32 %v2792_v61, %v2792_v61  ;;  %v2809_v33 = vmul.f32 %v2793_v34, %v2793_v34  ;;  %v2810_v51 = vmul.f32 %v2794_v49, %v2794_v49  ;;  %v2811_v18 = vmul.f32 %v2795_v6, %v2795_v6 }
 0x1ba   : > { %v2813_v10 = vmul.f32 %v2797_v42, %v2797_v42  ;;  %v2814_v48 = vmul.f32 %v2798_v24, %v2798_v24  ;;  %v2815_v25 = vmul.f32 %v2799_v12, %v2799_v12  ;;  %v2816_v45 = vmul.f32 %v2800_v57, %v2800_v57 }
 0x1bb   : > { %v2817_v1 = vmul.f32 %v2801_v56, %v2801_v56  ;;  %v2818_v22 = vmul.f32 %v2802_v59, %v2802_v59  ;;  %v2812_v26 = vmul.f32 %v2796_v15, %v2796_v15  ;;  %v2819_v37 = vmul.f32 %v2803_v47, %v2803_v47 }
 0x1bc   : > { %v2820_v2 = vmul.f32 %v2804_v19, %v2804_v19  ;;  %v2821_v41 = vmul.f32 %v2805_v62, %v2805_v62  ;;  %v2822_v40 = vmul.f32 %v2806_v13, %v2806_v13  ;;  %v2823_v38 = vmul.f32 %v2807_v52, %v2807_v52 }
 0x1bd   : > { %v2824_v14 = vsel %vm2737_vm8, %v2808_v28, 0.0  ;;  %v2825_v39 = vsel %vm2737_vm8, %v2809_v33, 0.0  ;;  %v2827_v32 = vsel %vm2737_vm8, %v2810_v51, 0.0  ;;  %v2833_v35 = vsel %vm2737_vm8, %v2813_v10, 0.0 }
 0x1be   : > { %v2826_v53 = vadd.f32 %v2825_v39, %v2824_v14  ;;  %v2835_v27 = vsel %vm2737_vm8, %v2814_v48, 0.0  ;;  %v2837_v8 = vsel %vm2737_vm8, %v2815_v25, 0.0  ;;  %v2839_v4 = vsel %vm2737_vm8, %v2816_v45, 0.0 }
 0x1bf   : > { %v2841_v63 = vsel %vm2737_vm8, %v2817_v1, 0.0  ;;  %v2843_v60 = vsel %vm2737_vm8, %v2818_v22, 0.0  ;;  %v2845_v0 = vsel %vm2737_vm8, %v2819_v37, 0.0  ;;  %v2847_v9 = vsel %vm2737_vm8, %v2820_v2, 0.0 }
 0x1c0   : > { %v2828_v44 = vadd.f32 %v2827_v32, %v2826_v53  ;;  %v2849_v55 = vsel %vm2737_vm8, %v2821_v41, 0.0  ;;  %v2829_v46 = vsel %vm2737_vm8, %v2811_v18, 0.0  ;;  %v2851_v11 = vsel %vm2737_vm8, %v2822_v40, 0.0 }
 0x1c1   : > { %v2853_v30 = vsel %vm2737_vm8, %v2823_v38, 0.0  ;;  %v2831_v58 = vsel %vm2737_vm8, %v2812_v26, 0.0 }
 0x1c2   : > { %v2830_v36 = vadd.f32 %v2829_v46, %v2828_v44 }
 0x1c4   : > { %v2832_v23 = vadd.f32 %v2831_v58, %v2830_v36 }
 0x1c6   : > { %v2834_v7 = vadd.f32 %v2833_v35, %v2832_v23 }
 0x1c8   : > { %v2836_v16 = vadd.f32 %v2835_v27, %v2834_v7 }
 0x1ca   : > { %v2838_v3 = vadd.f32 %v2837_v8, %v2836_v16 }
 0x1cc   : > { %v2840_v21 = vadd.f32 %v2839_v4, %v2838_v3 }
 0x1ce   : > { %v2842_v43 = vadd.f32 %v2841_v63, %v2840_v21 }
 0x1d0   : > { %v2844_v31 = vadd.f32 %v2843_v60, %v2842_v43 }
 0x1d2   : > { %v2846_v50 = vadd.f32 %v2845_v0, %v2844_v31 }
 0x1d4   : > { %v2848_v20 = vadd.f32 %v2847_v9, %v2846_v50 }
 0x1d6   : > { %v2850_v54 = vadd.f32 %v2849_v55, %v2848_v20 }
 0x1d8   : > { %v2852_v29 = vadd.f32 %v2851_v11, %v2850_v54 }
 0x1da   : > { %v2854_v5 = vadd.f32 %v2853_v30, %v2852_v29 }
 0x1dc   : > { %v2855_v61 = vrot.slane %v2854_v5, 4 }
 0x1de   : > { %v2856_v34 = vadd.f32 %v2855_v61, %v2854_v5 }
 0x1e0   : > { %v2857_v49 = vrot.slane %v2856_v34, 2 }
 0x1e2   : > { %v2858_v6 = vadd.f32 %v2857_v49, %v2856_v34 }
 0x1e4   : > { %v2859_v15 = vrot.slane %v2858_v6, 1 }
 0x1e6   : > { %v2860_v42 = vadd.f32 %v2859_v15, %v2858_v6 }
 0x1e8   : > { %v2862_v24 = vsel %vm2861_vm9, %v4828_v17, %v2860_v42 }
 0x1e9   : > { %2864 = vst.msk [vmem:[%s216_s11] sm:$0x3] %vm2863_vm10, %v2862_v24 }
 0x1ea PF: > { %s14_s16 = sadd.s32 1, %s3819_s16   ;;  %s4902_s12 = smov %s3811_s14 }
 0x1eb   : > { %p11_p8 = scmp.ge.s32.totalorder %s14_s16, 6   ;;  %s4903_s13 = smov %s3815_s15 }
 0x1ec   : > { %s4904_s14 = smov %s4907_s17  ;;  %s4905_s15 = smov %s4911_s18 }
 0x1ed   :  { %13 = sbr.rel (!%p11_p8) target bundleno = 3 (0x3), region = 81 }

// kernel: tfc_forward.11
= control target key start
LH: loop header
LB: loop body
LE: loop exit
PB: predicated region body
PF: predicated region fallthrough
CT: control target
= control target key end

     0   :  { %s301_s12 = smov 0   ;;  %s318_s0 = inlined_call_operand.vmem [shape: f32[2,16,128], index: 0, kind: input, shape index: {}]   ;;  %s319_s1 = inlined_call_operand.vmem [shape: f32[1,1,128], index: 1, kind: input, shape index: {}]   ;;  %s320_s2 = inlined_call_operand.vmem [shape: f32[1,1,128], index: 2, kind: input, shape index: {}]   ;;  %s321_s3 = inlined_call_operand.vmem [shape: f32[2,16,128], index: 3, kind: output, shape index: {}]  }
   0x1 LB: > { %s250_s13 = sadd.s32 4294967295, %s279_s12   ;;  %p254_p0 = scmp.ge.s32.totalorder %s279_s12, 1  ;;  %s279_s12 = sphi %s301_s12, %s13_s12  }
   0x2   : > { %p137_p1 = scmp.lt.s32.totalorder %s279_s12, 3 }
   0x4   : > { %p138_p2 = pnand %p254_p0, %p137_p1 }
   0x5   : > { %p161_p3 = scmp.lt.s32.totalorder (!%p138_p2), %s250_s13, 1  ;;  %v259_v0 = vld [vmem:[%s319_s1] ss:$0 sm:$0xff] (!%p138_p2) }
   0x6   : > { %141 = sbr.rel (%p138_p2) target bundleno = 24 (0x18), region = 32  ;;  %v260_v3 = vld [vmem:[%s320_s2] ss:$0 sm:$0xff] (!%p138_p2) }
   0xd   : > { %s323_s13 = smov (!%p161_p3, %s250_s13), 1 }
   0xe   : > { %s263_s14 = sshll.u32 %s323_s13, 4 }
   0xf   : > { %s165_s19 = scalar_lea.vmem %s318_s0, %s263_s14  ;;  %s170_s24 = scalar_lea.vmem %s321_s3, %s263_s14 }
  0x10   : > { %v171_v1 = vld [vmem:[%s165_s19] sm:$0xff]  ;;  %v172_v2 = vld [vmem:[%s165_s19 + $0x8] sm:$0xff] }
  0x11   : > { %v180_v4 = vmul.f32 %v259_v0, %v171_v1  ;;  %v181_v5 = vmul.f32 %v259_v0, %v172_v2 }
  0x13   : > { %v189_v6 = vadd.f32 %v260_v3, %v180_v4  ;;  %v190_v7 = vadd.f32 %v260_v3, %v181_v5 }
  0x15   : > { %v191_v8 = vmax.f32 %v189_v6, 0.0  ;;  %v192_v9 = vmax.f32 %v190_v7, 0.0 }
  0x17   : > { %193 = vst [vmem:[%s170_s24] sm:$0xff] %v191_v8  ;;  %194 = vst [vmem:[%s170_s24 + $0x8] sm:$0xff] %v192_v9 }
  0x18 PF: > { %s13_s12 = sadd.s32 1, %s279_s12  }
  0x19   : > { %p10_p4 = scmp.ge.s32.totalorder %s13_s12, 4  }
  0x1b   :  { %12 = sbr.rel (!%p10_p4) target bundleno = 1 (0x1), region = 62 }

// kernel: tfc_forward.10
= control target key start
LH: loop header
LB: loop body
LE: loop exit
PB: predicated region body
PF: predicated region fallthrough
CT: control target
= control target key end

     0   :  { %s3942_s12 = smov 0   ;;  %s3944_s13 = smov 0   ;;  %s5033_s0 = inlined_call_operand.vmem [shape: bf16[2,18,18,20], index: 0, kind: input, shape index: {}]   ;;  %s5034_s1 = inlined_call_operand.vmem [shape: bf16[3,3,20,8], index: 1, kind: input, shape index: {}]   ;;  %s5035_s2 = inlined_call_operand.vmem [shape: f32[2,16,16,8], index: 2, kind: output, shape index: {0}]   ;;  %s5036_s3 = inlined_call_operand.vmem [shape: f32[2,2,2,8], index: 3, kind: output, shape index: {1}]  }
   0x1   :  { %s3946_s14 = smov 0   ;;  %s3948_s15 = smov 0  }
   0x2   :  { %s3950_s16 = smov 0  }
   0x3 LB: > { %s23_s17 = sadd.s32 1, %s3912_s14  ;;  %s26_s18 = sadd.s32 1, %s3916_s15  ;;  %s3920_s16 = sphi %s3950_s16, %s14_s16   ;;  %s3916_s15 = sphi %s3948_s15, %s5065_s15   ;;  %s3912_s14 = sphi %s3946_s14, %s5064_s14   ;;  %s3908_s13 = sphi %s3944_s13, %s5063_s13   ;;  %s3904_s12 = sphi %s3942_s12, %s5062_s12  }
   0x4   : > { %p24_p0 = scmp.ge.s32.totalorder %s23_s17, 2  ;;  %p3061_p1 = scmp.ge.s32.totalorder %s3920_s16, 1 }
   0x5   : > { %p156_p2 = scmp.lt.s32.totalorder %s3920_s16, 5 }
   0x6   : > { %s5067_s17 = smov (%p24_p0, %s23_s17), 0  ;;  %s5069_s18 = smov (!%p24_p0, %s26_s18), %s3916_s15 }
   0x7   : > { %p157_p3 = pnand %p3061_p1, %p156_p2  ;;  %p28_p4 = scmp.ge.s32.totalorder %s5069_s18, 2 }
   0x9   : > { %s5071_s18 = smov (%p28_p4, %s5069_s18), 0  ;;  %160 = sbr.rel (%p157_p3) target bundleno = 490 (0x1ea), region = 28 }
  0x10   : > { %v3838_v0 = vld [vmem:[%s5034_s1 + $0xc] sm:$0xff]   ;;  %vm506_vm0 = vcmask 1041408   ;;  %p193_p5 = scmp.lt.s32.totalorder %s3908_s13, 1  ;;  %v3840_v2 = vld [vmem:[%s5034_s1 + $0x14] ss:$0 sps:$4 sm:$0x33]  }
  0x11   : > { %v3839_v1 = vld [vmem:[%s5034_s1 + $0x30] sm:$0xff]   ;;  %3475 = vmatprep.subr.bf16.mxu1 %v3838_v0  ;;  %v3841_v3 = vld [vmem:[%s5034_s1 + $0x38] ss:$0 sps:$4 sm:$0x33]   ;;  %v508_v4 = vsel %vm506_vm0, %v3840_v2, 0  ;;  %s3384_s27 = smul.u32 96, %s3904_s12 }
  0x12   : > { %3555 = vmatprep.subr.bf16.mxu0 %v3839_v1  ;;  %3476 = vmatpush3.bf16.msra.mxu1 %v3838_v0  ;;  %s5073_s13 = smov (!%p193_p5, %s3908_s13), 1  ;;  %v3993_v5 = vsel %vm506_vm0, %v3841_v3, 0  ;;  %v3999_v6 = vld [vmem:[%s5034_s1] sm:$0xff]   ;;  %vm249_vm1 = vsmask.f32 3328  ;;  %vm481_vm4 = vcmask 162816  }
  0x13   : > { %3556 = vmatpush3.bf16.msra.mxu0 %v3839_v1  ;;  %3787 = vmatprep.subr.msk.bf16.mxu1 %vm506_vm0, %v3840_v2  ;;  %s3797_s28 = smul.u32 216, %s5073_s13  ;;  %v4007_v7 = vld [vmem:[%s5034_s1 + $0x3c] sm:$0xff]   ;;  %vm250_vm2 = vsmask.f32 7440  ;;  %vm804_vm5 = vcmask 1042432   ;;  %vm805_vm6 = vcmask 1046532  }
  0x14   : > { %3791 = vmatprep.subr.msk.bf16.mxu0 %vm506_vm0, %v3841_v3  ;;  %vm4043_vm3 = vmor %vm249_vm1, %vm250_vm2  ;;  %vm2782_vm8 = vcmask 64512   ;;  %p211_p7 = scmp.lt.s32.totalorder %s3904_s12, 1  ;;  %vm2906_vm9 = vcmask 1040384   ;;  %vm2908_vm10 = vcmask 58368  }
  0x15   : > { %s197_s6 = scalar_lea.vmem %s5033_s0, %s3797_s28  ;;  %vm4204_vm7 = vmor %vm804_vm5, %vm805_vm6 }
  0x16   : > { %3478 = vmatpush3.bf16.msra.mxu1 %v508_v4  ;;  %s4010_s9 = scalar_lea.vmem %s197_s6, %s3384_s27  ;;  %s3065_s27 = sshll.u32 %s5073_s13, 5 }
  0x17   : > { %3558 = vmatpush3.bf16.msra.mxu0 %v3993_v5  ;;  %3495 = vmatprep.subr.bf16.mxu1 %v3999_v6  ;;  %v4014_v8 = vld [vmem:[%s4010_s9] sm:$0xf]  ;;  %v4017_v9 = vld [vmem:[%s4010_s9 + $0x4] sm:$0xf]  ;;  %v4020_v10 = vld [vmem:[%s4010_s9 + $0x8] sm:$0x1] }
  0x18   : > { %3575 = vmatprep.subr.bf16.mxu0 %v4007_v7  ;;  %v253_v11 = vshrl.u32 %v4014_v8, 16  ;;  %v256_v12 = vshll.u32 %v4014_v8, 16  ;;  %v262_v13 = vshll.u32 %v4017_v9, 16  ;;  %v266_v14 = vshrl.u32 %v4017_v9, 16  ;;  %v3179_v15 = vld [vmem:[%s4010_s9 + $0xc] sm:$0xf] }
  0x19   : > { %v272_v16 = vshll.u32 %v4020_v10, 16  ;;  %v4030_v17 = vld [vmem:[%s4010_s9 + $0x10] sm:$0xf]  ;;  %v4033_v18 = vld [vmem:[%s4010_s9 + $0x14] sm:$0x1]  ;;  %v1278_v24 = vshrl.u32 %v3179_v15, 16 }
  0x1a   : > { %v255_v19 = vrot.slane %v253_v11, 4  ;;  %v258_v20 = vrot.slane %v256_v12, 5  ;;  %v264_v21 = vrot.slane %v262_v13, 5  ;;  %v268_v22 = vrot.slane %v266_v14, 4  ;;  %v4039_v31 = vld [vmem:[%s4010_s9 + $0xc] sm:$0xf] }
  0x1b   : > { %v274_v23 = vrot.slane %v272_v16, 5  ;;  %v1281_v25 = vshll.u32 %v3179_v15, 16  ;;  %v1287_v26 = vshll.u32 %v4030_v17, 16  ;;  %v1291_v29 = vshrl.u32 %v4030_v17, 16  ;;  %v4048_v36 = vld [vmem:[%s4010_s9 + $0x10] sm:$0xf] }
  0x1c   : > { %v259_v27 = vor.u32 %v258_v20, %v255_v19  ;;  %v269_v28 = vor.u32 %v268_v22, %v264_v21  ;;  %v1297_v30 = vshll.u32 %v4033_v18, 16  ;;  %v1280_v33 = vrot.slane %v1278_v24, 4  ;;  %v4051_v42 = vld [vmem:[%s4010_s9 + $0x14] sm:$0x1]  ;;  %v3182_v53 = vld [vmem:[%s4010_s9 + $0x18] sm:$0xf] }
  0x1d   : > { %v1283_v34 = vrot.slane %v1281_v25, 5  ;;  %v1289_v35 = vrot.slane %v1287_v26, 5  ;;  %v1293_v39 = vrot.slane %v1291_v29, 4  ;;  %v277_v43 = vshrl.u32 %v4039_v31, 16  ;;  %v4064_v58 = vld [vmem:[%s4010_s9 + $0x1c] sm:$0xf] }
  0x1e   : > { %v260_v37 = vrot.slane %v259_v27, 4  ;;  %v270_v38 = vrot.slane %v269_v28, 4  ;;  %v1299_v41 = vrot.slane %v1297_v30, 5  ;;  %v280_v44 = vshll.u32 %v4039_v31, 16  ;;  %v4072_v63 = vld [vmem:[%s4010_s9 + $0x20] sm:$0x1] }
  0x1f   : > { %v1284_v40 = vor.u32 %v1283_v34, %v1280_v33  ;;  %v1294_v47 = vor.u32 %v1293_v39, %v1289_v35  ;;  %v286_v48 = vshll.u32 %v4048_v36, 16  ;;  %v279_v51 = vrot.slane %v277_v43, 4  ;;  %v4080_v20 = vld [vmem:[%s4010_s9 + $0x18] sm:$0xf]  ;;  %v4087_v25 = vld [vmem:[%s4010_s9 + $0x1c] sm:$0xf] }
  0x20   : > { %v265_v45 = vsel %vm4043_vm3, %v260_v37, %v264_v21  ;;  %v275_v46 = vsel %vm4043_vm3, %v270_v38, %v274_v23  ;;  %v282_v52 = vrot.slane %v280_v44, 5  ;;  %v290_v56 = vshrl.u32 %v4048_v36, 16  ;;  %v4095_v34 = vld [vmem:[%s4010_s9 + $0x20] sm:$0x1]  ;;  %v3185_v44 = vld [vmem:[%s4010_s9 + $0x24] sm:$0xf] }
  0x21   : > { %v3075_v49 = vcombine.low %v265_v45, %v275_v46  ;;  %v1285_v50 = vrot.slane %v1284_v40, 4  ;;  %v1295_v54 = vrot.slane %v1294_v47, 4  ;;  %v288_v55 = vrot.slane %v286_v48, 5  ;;  %v4102_v38 = vld [vmem:[%s5034_s1 + $0x8] ss:$0 sps:$4 sm:$0x33]  }
  0x22   : > { %v296_v57 = vshll.u32 %v4051_v42, 16  ;;  %v1680_v60 = vrot.slane %v4030_v17, 5  ;;  %v1683_v61 = vrot.slane %v4033_v18, 5  ;;  %v283_v62 = vor.u32 %v282_v52, %v279_v51  ;;  %v4237_v17 = vld [vmem:[%s5034_s1 + $0x18] sm:$0xff]   ;;  %v4242_v18 = vld [vmem:[%s4010_s9 + $0x4c] sm:$0xf] }
  0x23   : > { %3479 = vmatprep.mubr.msk.bf16.mxu1 %vm481_vm4, %v3075_v49  ;;  %v1290_v59 = vsel %vm4043_vm3, %v1285_v50, %v1289_v35  ;;  %v1300_v0 = vsel %vm4043_vm3, %v1295_v54, %v1299_v41  ;;  %v292_v1 = vrot.slane %v290_v56, 4  ;;  %v1302_v3 = vshrl.u32 %v3182_v53, 16  ;;  %v4110_v49 = vld [vmem:[%s4010_s9 + $0x28] sm:$0xf]  ;;  %v4117_v56 = vld [vmem:[%s4010_s9 + $0x2c] sm:$0x1] }
  0x24   : > { %v298_v2 = vrot.slane %v296_v57, 5  ;;  %v3206_v4 = vcombine.low %v1290_v59, %v1300_v0  ;;  %v284_v11 = vrot.slane %v283_v62, 4  ;;  %v1305_v12 = vshll.u32 %v3182_v53, 16  ;;  %v4122_v62 = vld [vmem:[%s5034_s1 + $0x44] ss:$0 sps:$4 sm:$0x33]  }
  0x25   : > { %v1311_v13 = vshll.u32 %v4064_v58, 16  ;;  %v293_v14 = vor.u32 %v292_v1, %v288_v55  ;;  %v1304_v15 = vrot.slane %v1302_v3, 4  ;;  %v1315_v16 = vshrl.u32 %v4064_v58, 16  ;;  %s3067_s6 = sshll.u32 %s5073_s13, 1 }
  0x26   : > { %v1321_v19 = vshll.u32 %v4072_v63, 16  ;;  %3559 = vmatprep.mubr.msk.bf16.mxu0 %vm481_vm4, %v3206_v4  ;;  %v289_v21 = vsel %vm4043_vm3, %v284_v11, %v288_v55  ;;  %v1307_v22 = vrot.slane %v1305_v12, 5  ;;  %v1687_v24 = vrot.slane %v4064_v58, 5  ;;  %v4129_v4 = vld [vmem:[%s4010_s9 + $0x24] sm:$0xf] }
  0x27   : > { %v1313_v23 = vrot.slane %v1311_v13, 5  ;;  %v294_v26 = vrot.slane %v293_v14, 4  ;;  %v1317_v27 = vrot.slane %v1315_v16, 4  ;;  %v1690_v29 = vrot.slane %v4072_v63, 5  ;;  %v4277_v58 = vld [vmem:[%s4010_s9 + $0x54] sm:$0xf] }
  0x28   : > { %v1323_v28 = vrot.slane %v1321_v19, 5  ;;  %v1308_v30 = vor.u32 %v1307_v22, %v1304_v15  ;;  %v4092_v33 = vrot.slane %v1687_v24, 4  ;;  %v301_v35 = vshrl.u32 %v4080_v20, 16  ;;  %v4132_v15 = vld [vmem:[%s4010_s9 + $0x28] sm:$0xf] }
  0x29   : > { %v304_v37 = vshll.u32 %v4080_v20, 16  ;;  %v299_v39 = vsel %vm4043_vm3, %v294_v26, %v298_v2  ;;  %v1318_v40 = vor.u32 %v1317_v27, %v1313_v23  ;;  %v310_v41 = vshll.u32 %v4087_v25, 16  ;;  %v4142_v26 = vld [vmem:[%s4010_s9 + $0x2c] sm:$0x1] }
  0x2a   : > { %v314_v43 = vshrl.u32 %v4087_v25, 16  ;;  %v3076_v45 = vcombine.low %v289_v21, %v299_v39  ;;  %v1309_v46 = vrot.slane %v1308_v30, 4  ;;  %v303_v47 = vrot.slane %v301_v35, 4  ;;  %v4271_v63 = vld [vmem:[%s5034_s1 + $0x50] ss:$0 sps:$4 sm:$0x33]  }
  0x2b   : > { %v306_v48 = vrot.slane %v304_v37, 5  ;;  %v1319_v50 = vrot.slane %v1318_v40, 4  ;;  %v312_v51 = vrot.slane %v310_v41, 5  ;;  %v320_v53 = vshll.u32 %v4095_v34, 16  ;;  %v3188_v40 = vld [vmem:[%s4010_s9 + $0x30] sm:$0xf] }
  0x2c   : > { %v316_v52 = vrot.slane %v314_v43, 4  ;;  %3480 = vmatmul.mubr.msk.bf16.vlgmr.msra.gmra.mrb[0].mxu1 %vm481_vm4, %v3076_v45  ;;  %v1314_v54 = vsel %vm4043_vm3, %v1309_v46, %v1313_v23  ;;  %v1326_v57 = vshrl.u32 %v3185_v44, 16  ;;  %v1329_v59 = vshll.u32 %v3185_v44, 16 }
  0x2d   : > { %v307_v55 = vor.u32 %v306_v48, %v303_v47  ;;  %3496 = vmatpush3.bf16.msra.mxu1 %v3999_v6  ;;  %v1324_v0 = vsel %vm4043_vm3, %v1319_v50, %v1323_v28  ;;  %v322_v2 = vrot.slane %v320_v53, 5  ;;  %v1335_v3 = vshll.u32 %v4110_v49, 16  ;;  %v4162_v53 = vld [vmem:[%s4010_s9 + $0x38] sm:$0x1] }
  0x2e   : > { %v317_v1 = vor.u32 %v316_v52, %v312_v51  ;;  %v3207_v11 = vcombine.low %v1314_v54, %v1324_v0  ;;  %v1328_v13 = vrot.slane %v1326_v57, 4  ;;  %v1331_v14 = vrot.slane %v1329_v59, 5  ;;  %3788 = vmatprep.subr.msk.bf16.mxu1 %vm506_vm0, %v4102_v38  ;;  %v4165_v57 = vld [vmem:[%s4010_s9 + $0x30] sm:$0xf] }
  0x2f   : > { %v308_v12 = vrot.slane %v307_v55, 4  ;;  %v1337_v16 = vrot.slane %v1335_v3, 5  ;;  %v1339_v19 = vshrl.u32 %v4110_v49, 16  ;;  %v1345_v21 = vshll.u32 %v4117_v56, 16 }
  0x30   : > { %v318_v6 = vrot.slane %v317_v1, 4  ;;  %3560 = vmatmul.mubr.msk.bf16.vlgmr.msra.gmra.mrb[0].mxu0 %vm481_vm4, %v3207_v11  ;;  %v1332_v23 = vor.u32 %v1331_v14, %v1328_v13  ;;  %v325_v27 = vshrl.u32 %v4129_v4, 16  ;;  %v328_v28 = vshll.u32 %v4129_v4, 16 }
  0x31   : > { %v313_v22 = vsel %vm4043_vm3, %v308_v12, %v312_v51  ;;  %3576 = vmatpush3.bf16.msra.mxu0 %v4007_v7  ;;  %v1341_v35 = vrot.slane %v1339_v19, 4  ;;  %v1347_v37 = vrot.slane %v1345_v21, 5  ;;  %v334_v39 = vshll.u32 %v4132_v15, 16  ;;  %v4154_v7 = vld [vmem:[%s4010_s9 + $0x34] sm:$0xf] }
  0x32   : > { %v323_v30 = vsel %vm4043_vm3, %v318_v6, %v322_v2  ;;  %v1333_v43 = vrot.slane %v1332_v23, 4  ;;  %3793 = vmatprep.subr.msk.bf16.mxu0 %vm506_vm0, %v4122_v62  ;;  %v327_v44 = vrot.slane %v325_v27, 4  ;;  %v330_v45 = vrot.slane %v328_v28, 5  ;;  %v4173_v21 = vld [vmem:[%s4010_s9 + $0x34] sm:$0xf] }
  0x33   : > { %v3077_v41 = vcombine.low %v313_v22, %v323_v30  ;;  %v1342_v46 = vor.u32 %v1341_v35, %v1337_v16  ;;  %v336_v47 = vrot.slane %v334_v39, 5  ;;  %v338_v48 = vshrl.u32 %v4132_v15, 16  ;;  %v4178_v22 = vld [vmem:[%s5034_s1 + $0x48] sm:$0xff]   ;;  %v4183_v35 = vld [vmem:[%s4010_s9 + $0x38] sm:$0x1] }
  0x34   : > { %v344_v50 = vshll.u32 %v4142_v26, 16  ;;  %v1338_v51 = vsel %vm4043_vm3, %v1333_v43, %v1337_v16  ;;  %v331_v52 = vor.u32 %v330_v45, %v327_v44  ;;  %v1350_v54 = vshrl.u32 %v3188_v40, 16 }
  0x35   : > { %3483 = vmatprep.mubr.msk.bf16.mxu1 %vm481_vm4, %v3077_v41  ;;  %v1353_v55 = vshll.u32 %v3188_v40, 16  ;;  %v1343_v59 = vrot.slane %v1342_v46, 4  ;;  %v340_v0 = vrot.slane %v338_v48, 4  ;;  %v1359_v2 = vshll.u32 %v4154_v7, 16 }
  0x36   : > { %v346_v1 = vrot.slane %v344_v50, 5  ;;  %v332_v3 = vrot.slane %v331_v52, 4  ;;  %v1352_v11 = vrot.slane %v1350_v54, 4  ;;  %v1363_v13 = vshrl.u32 %v4154_v7, 16  ;;  %v4198_v52 = vld [vmem:[%s4010_s9 + $0x3c] sm:$0xf] }
  0x37   : > { %v1355_v12 = vrot.slane %v1353_v55, 5  ;;  %v1348_v14 = vsel %vm4043_vm3, %v1343_v59, %v1347_v37  ;;  %v341_v6 = vor.u32 %v340_v0, %v336_v47  ;;  %v1361_v16 = vrot.slane %v1359_v2, 5 }
  0x38   : > { %v1369_v19 = vshll.u32 %v4162_v53, 16  ;;  %v3208_v23 = vcombine.low %v1338_v51, %v1348_v14  ;;  %v337_v27 = vsel %vm4043_vm3, %v332_v3, %v336_v47  ;;  %v1365_v30 = vrot.slane %v1363_v13, 4  ;;  %v3224_v47 = vld [vmem:[%s4010_s9 + $0xc] sm:$0xe]  ;;  %v4209_v13 = vld [vmem:[%s4010_s9 + $0x40] sm:$0xf] }
  0x39   : > { %v1356_v28 = vor.u32 %v1355_v12, %v1352_v11  ;;  %v342_v37 = vrot.slane %v341_v6, 4  ;;  %v1796_v40 = vsel %vm506_vm0, %v4122_v62, 0  ;;  %v349_v41 = vshrl.u32 %v4165_v57, 16 }
  0x3a   : > { %v1371_v39 = vrot.slane %v1369_v19, 5  ;;  %3563 = vmatprep.mubr.msk.bf16.mxu0 %vm481_vm4, %v3208_v23  ;;  %v1366_v44 = vor.u32 %v1365_v30, %v1361_v16  ;;  %3578 = vmatpush3.bf16.msra.mxu0 %v1796_v40  ;;  %v352_v45 = vshll.u32 %v4165_v57, 16  ;;  %v358_v46 = vshll.u32 %v4173_v21, 16  ;;  %v4217_v19 = vld [vmem:[%s4010_s9 + $0x44] sm:$0x1] }
  0x3b   : > { %v1357_v43 = vrot.slane %v1356_v28, 4  ;;  %v347_v48 = vsel %vm4043_vm3, %v342_v37, %v346_v1  ;;  %v351_v50 = vrot.slane %v349_v41, 4  ;;  %v362_v51 = vshrl.u32 %v4173_v21, 16  ;;  %3595 = vmatprep.subr.bf16.mxu0 %v4178_v22  ;;  %v3225_v40 = vld [vmem:[%s4010_s9 + $0x18] sm:$0xe] }
  0x3c   : > { %v368_v62 = vshll.u32 %v4183_v35, 16  ;;  %v3078_v54 = vcombine.low %v337_v27, %v347_v48  ;;  %v1367_v59 = vrot.slane %v1366_v44, 4  ;;  %v354_v0 = vrot.slane %v352_v45, 5 }
  0x3d   : > { %v1362_v55 = vsel %vm4043_vm3, %v1357_v43, %v1361_v16  ;;  %v360_v2 = vrot.slane %v358_v46, 5  ;;  %v364_v3 = vrot.slane %v362_v51, 4  ;;  %v3232_v12 = vrot.slane %v3224_v47, 9 }
  0x3e   : > { %v370_v11 = vrot.slane %v368_v62, 5  ;;  %3484 = vmatmul.mubr.msk.bf16.gmra.mrb[4].mxu1 %vm481_vm4, %v3078_v54  ;;  %v1372_v14 = vsel %vm4043_vm3, %v1367_v59, %v1371_v39  ;;  %v355_v6 = vor.u32 %v354_v0, %v351_v50  ;;  %v1682_v16 = vrot.slane %v1680_v60, 4  ;;  %v4227_v39 = vld [vmem:[%s4010_s9 + $0x48] sm:$0xf]  ;;  %v4250_v54 = vld [vmem:[%s4010_s9 + $0x50] sm:$0x1] }
  0x3f   : > { %v373_v23 = vshrl.u32 %v4198_v52, 16  ;;  %v3209_v27 = vcombine.low %v1362_v55, %v1372_v14  ;;  %v365_v28 = vor.u32 %v364_v3, %v360_v2  ;;  %v1681_v30 = vsel %vm4204_vm7, %v3232_v12, %v1680_v60  ;;  %v3226_v12 = vld [vmem:[%s4010_s9 + $0x24] sm:$0xe] }
  0x40   : > { %v376_v37 = vshll.u32 %v4198_v52, 16  ;;  %v356_v41 = vrot.slane %v355_v6, 4  ;;  %v1684_v43 = vsel %vm4204_vm7, %v1682_v16, %v1683_v61  ;;  %v382_v45 = vshll.u32 %v4209_v13, 16 }
  0x41   : > { %v375_v44 = vrot.slane %v373_v23, 4  ;;  %3564 = vmatmul.mubr.msk.bf16.gmra.mrb[4].mxu0 %vm481_vm4, %v3209_v27  ;;  %v366_v60 = vrot.slane %v365_v28, 4  ;;  %v3243_v46 = vcombine.low %v1681_v30, %v1684_v43  ;;  %v386_v48 = vshrl.u32 %v4209_v13, 16 }
  0x42   : > { %v378_v47 = vrot.slane %v376_v37, 5  ;;  %v361_v61 = vsel %vm4043_vm3, %v356_v41, %v360_v2  ;;  %v384_v50 = vrot.slane %v382_v45, 5  ;;  %v392_v51 = vshll.u32 %v4217_v19, 16  ;;  %v4280_v37 = vld [vmem:[%s4010_s9 + $0x58] sm:$0xf] }
  0x43   : > { %v681_v62 = vsel %vm506_vm0, %v4102_v38, 0  ;;  %v371_v55 = vsel %vm4043_vm3, %v366_v60, %v370_v11  ;;  %3579 = vmatprep.mubr.msk.bf16.mxu0 %vm481_vm4, %v3243_v46  ;;  %v388_v0 = vrot.slane %v386_v48, 4  ;;  %v3233_v3 = vrot.slane %v3225_v40, 9 }
  0x44   : > { %v379_v59 = vor.u32 %v378_v47, %v375_v44  ;;  %3498 = vmatpush3.bf16.msra.mxu1 %v681_v62  ;;  %v3079_v2 = vcombine.low %v361_v61, %v371_v55  ;;  %v394_v14 = vrot.slane %v392_v51, 5  ;;  %v1691_v38 = vsel %vm4204_vm7, %v4092_v33, %v1690_v29 }
  0x45   : > { %v397_v6 = vshrl.u32 %v4227_v39, 16  ;;  %3515 = vmatprep.subr.bf16.mxu1 %v4237_v17  ;;  %v389_v16 = vor.u32 %v388_v0, %v384_v50  ;;  %v1688_v23 = vsel %vm4204_vm7, %v3233_v3, %v1687_v24  ;;  %v400_v27 = vshll.u32 %v4227_v39, 16 }
  0x46   : > { %v380_v11 = vrot.slane %v379_v59, 4  ;;  %3487 = vmatprep.mubr.msk.bf16.mxu1 %vm481_vm4, %v3079_v2  ;;  %v3244_v29 = vcombine.low %v1688_v23, %v1691_v38  ;;  %v406_v28 = vshll.u32 %v4242_v18, 16  ;;  %v410_v30 = vshrl.u32 %v4242_v18, 16 }
  0x47   : > { %v399_v33 = vrot.slane %v397_v6, 4  ;;  %v390_v40 = vrot.slane %v389_v16, 4  ;;  %v402_v41 = vrot.slane %v400_v27, 5  ;;  %v416_v43 = vshll.u32 %v4250_v54, 16 }
  0x48   : > { %v385_v24 = vsel %vm4043_vm3, %v380_v11, %v384_v50  ;;  %v408_v44 = vrot.slane %v406_v28, 5  ;;  %v412_v45 = vrot.slane %v410_v30, 4  ;;  %v3234_v60 = vrot.slane %v3226_v12, 9  ;;  %v4291_v50 = vld [vmem:[%s4010_s9 + $0x5c] sm:$0x1] }
  0x49   : > { %v1694_v46 = vrot.slane %v4110_v49, 5  ;;  %v395_v47 = vsel %vm4043_vm3, %v390_v40, %v394_v14  ;;  %3580 = vmatmul.mubr.msk.bf16.vlgmr.msra.gmra.mrb[0].mxu0 %vm481_vm4, %v3244_v29  ;;  %v403_v48 = vor.u32 %v402_v41, %v399_v33  ;;  %v418_v61 = vrot.slane %v416_v43, 5  ;;  %v3227_v49 = vld [vmem:[%s4010_s9 + $0x30] sm:$0xe]  ;;  %v4310_v29 = vld [vmem:[%s4010_s9 + $0x40] sm:$0xf] }
  0x4a   : > { %v1697_v51 = vrot.slane %v4117_v56, 5  ;;  %v3080_v62 = vcombine.low %v385_v24, %v395_v47  ;;  %3596 = vmatpush3.bf16.msra.mxu0 %v4178_v22  ;;  %v413_v55 = vor.u32 %v412_v45, %v408_v44  ;;  %v421_v12 = vshrl.u32 %v4277_v58, 16  ;;  %v3228_v33 = vld [vmem:[%s4010_s9 + $0x3c] sm:$0xe]  ;;  %v4316_v41 = vld [vmem:[%s4010_s9 + $0x44] sm:$0x1] }
  0x4b   : > { %v1695_v59 = vsel %vm4204_vm7, %v3234_v60, %v1694_v46  ;;  %v1696_v0 = vrot.slane %v1694_v46, 4  ;;  %v404_v3 = vrot.slane %v403_v48, 4  ;;  %v424_v2 = vshll.u32 %v4277_v58, 16  ;;  %3794 = vmatprep.subr.msk.bf16.mxu0 %vm506_vm0, %v4271_v63 }
  0x4c   : > { %v430_v56 = vshll.u32 %v4280_v37, 16  ;;  %3488 = vmatmul.mubr.msk.bf16.gmra.mrb[8].mxu1 %vm481_vm4, %v3080_v62  ;;  %v414_v22 = vrot.slane %v413_v55, 4  ;;  %v434_v38 = vshrl.u32 %v4280_v37, 16  ;;  %v440_v6 = vshll.u32 %v4291_v50, 16 }
  0x4d   : > { %v1698_v14 = vsel %vm4204_vm7, %v1696_v0, %v1697_v51  ;;  %v409_v11 = vsel %vm4043_vm3, %v404_v3, %v408_v44  ;;  %v423_v23 = vrot.slane %v421_v12, 4  ;;  %v426_v27 = vrot.slane %v424_v2, 5  ;;  %v4327_v0 = vld [vmem:[%s4010_s9 + $0x4c] sm:$0xf]  ;;  %v4332_v3 = vld [vmem:[%s4010_s9 + $0x50] sm:$0x1] }
  0x4e   : > { %v3245_v16 = vcombine.low %v1695_v59, %v1698_v14  ;;  %v419_v28 = vsel %vm4043_vm3, %v414_v22, %v418_v61  ;;  %v432_v30 = vrot.slane %v430_v56, 5  ;;  %v436_v24 = vrot.slane %v434_v38, 4  ;;  %v3229_v56 = vld [vmem:[%s4010_s9 + $0x48] sm:$0xe] }
  0x4f   : > { %v442_v40 = vrot.slane %v440_v6, 5  ;;  %v3081_v43 = vcombine.low %v409_v11, %v419_v28  ;;  %v427_v45 = vor.u32 %v426_v27, %v423_v23  ;;  %v3235_v44 = vrot.slane %v3227_v49, 9  ;;  %v3230_v11 = vld [vmem:[%s4010_s9 + $0x54] sm:$0xe]  ;;  %v4347_v27 = vld [vmem:[%s4010_s9 + $0x58] sm:$0xf] }
  0x50   : > { %3583 = vmatprep.mubr.msk.bf16.mxu0 %vm481_vm4, %v3245_v16  ;;  %v1701_v60 = vrot.slane %v4154_v7, 5  ;;  %v437_v46 = vor.u32 %v436_v24, %v432_v30  ;;  %v1704_v47 = vrot.slane %v4162_v53, 5  ;;  %v3236_v48 = vrot.slane %v3228_v33, 9  ;;  %v4350_v33 = vld [vmem:[%s4010_s9 + $0x5c] sm:$0x1]  ;;  %v4355_v28 = vld [vmem:[%s5034_s1 + $0x54] sm:$0xff]  }
  0x51   : > { %v1708_v61 = vrot.slane %v4310_v29, 5  ;;  %3491 = vmatprep.mubr.msk.bf16.mxu1 %vm481_vm4, %v3081_v43  ;;  %v428_v51 = vrot.slane %v427_v45, 4  ;;  %v1711_v59 = vrot.slane %v4316_v41, 5  ;;  %v3093_v38 = vcombine.low %v4014_v8, %v4017_v9  ;;  %5046 = vst [vmem:[#allocation2_spill] sm:$0xff] %v4350_v33 }
  0x52   : > { %v1702_v62 = vsel %vm4204_vm7, %v3235_v44, %v1701_v60  ;;  %v1703_v55 = vrot.slane %v1701_v60, 4  ;;  %v438_v7 = vrot.slane %v437_v46, 4  ;;  %v3237_v8 = vrot.slane %v3229_v56, 9  ;;  %v4368_v44 = vld [vmem:[%s4010_s9 + $0x68] sm:$0x1] }
  0x53   : > { %v1709_v53 = vsel %vm4204_vm7, %v3236_v48, %v1708_v61  ;;  %v1710_v49 = vrot.slane %v1708_v61, 4  ;;  %v433_v12 = vsel %vm4043_vm3, %v428_v51, %v432_v30  ;;  %v1715_v30 = vrot.slane %v4327_v0, 5  ;;  %5048 = vst [vmem:[#allocation4_spill] sm:$0xff] %v4368_v44  ;;  %v3231_v60 = vld [vmem:[%s4010_s9 + $0x60] sm:$0xe] }
  0x54   : > { %v1705_v2 = vsel %vm4204_vm7, %v1703_v55, %v1704_v47  ;;  %v443_v22 = vsel %vm4043_vm3, %v438_v7, %v442_v40  ;;  %v1718_v24 = vrot.slane %v4332_v3, 5  ;;  %v4361_v40 = vld [vmem:[%s4010_s9 + $0x64] sm:$0xf]  ;;  %v2009_v43 = vsel %vm506_vm0, %v4271_v63, 0  ;;  %v781_v56 = vld [vmem:[%s4010_s9 + $0xc] sm:$0xe] }
  0x55   : > { %v3246_v14 = vcombine.low %v1702_v62, %v1705_v2  ;;  %v1712_v6 = vsel %vm4204_vm7, %v1710_v49, %v1711_v59  ;;  %v3082_v16 = vcombine.low %v433_v12, %v443_v22  ;;  %5047 = vst [vmem:[#allocation3_spill] sm:$0xff] %v4361_v40  ;;  %v3238_v45 = vrot.slane %v3230_v11, 9  ;;  %3598 = vmatpush3.bf16.msra.mxu0 %v2009_v43  ;;  %v782_v11 = vld [vmem:[%s4010_s9 + $0x18] sm:$0xe]  ;;  %v784_v43 = vld [vmem:[%s4010_s9 + $0x30] sm:$0xe] }
  0x56   : > { %v3247_v23 = vcombine.low %v1709_v53, %v1712_v6  ;;  %v1716_v46 = vsel %vm4204_vm7, %v3237_v8, %v1715_v30  ;;  %v1717_v47 = vrot.slane %v1715_v30, 4  ;;  %v1722_v48 = vrot.slane %v4347_v27, 5  ;;  %3615 = vmatprep.subr.bf16.mxu0 %v4355_v28  ;;  %v3854_v6 = vld [vmem:[%s5034_s1 + $0x20] ss:$0 sps:$4 sm:$0x33]  }
  0x57   : > { %3584 = vmatmul.mubr.msk.bf16.gmra.mrb[4].mxu0 %vm481_vm4, %v3246_v14  ;;  %3492 = vmatmul.mubr.msk.bf16.gmra.mrb[12].mxu1 %vm481_vm4, %v3082_v16  ;;  %v1725_v61 = vrot.slane %v4350_v33, 5  ;;  %v816_v51 = vrot.slane %v4048_v36, 5  ;;  %v1729_v63 = vrot.slane %v4361_v40, 5  ;;  %v3239_v7 = vrot.slane %v3231_v60, 9  ;;  %v4413_v60 = vld [vmem:[%s5034_s1 + $0x24] sm:$0xff]  }
  0x58   : > { %3587 = vmatprep.mubr.msk.bf16.mxu0 %vm481_vm4, %v3247_v23  ;;  %3499 = vmatprep.mubr.msk.bf16.mxu1 %vm481_vm4, %v3093_v38  ;;  %v1719_v62 = vsel %vm4204_vm7, %v1717_v47, %v1718_v24  ;;  %v1723_v55 = vsel %vm4204_vm7, %v3238_v45, %v1722_v48  ;;  %v1724_v59 = vrot.slane %v1722_v48, 4  ;;  %v3094_v53 = vcombine.low %v4039_v31, %v4048_v36  ;;  %v783_v23 = vld [vmem:[%s4010_s9 + $0x24] sm:$0xe]  ;;  %v4691_v40 = vld [vmem:[%s4010_s9 + $0x70] sm:$0xf] }
  0x59   : > { %v3248_v49 = vcombine.low %v1716_v46, %v1719_v62  ;;  %v1731_v12 = vrot.slane %v1729_v63, 4  ;;  %v1732_v2 = vrot.slane %v4368_v44, 5  ;;  %v819_v22 = vrot.slane %v4051_v42, 5 }
  0x5a   : > { %v3095_v14 = vcombine.low %v4080_v20, %v4087_v25  ;;  %v1726_v38 = vsel %vm4204_vm7, %v1724_v59, %v1725_v61  ;;  %v1730_v36 = vsel %vm4204_vm7, %v3239_v7, %v1729_v63  ;;  %v3112_v16 = vrot.slane %v781_v56, 9  ;;  %v3855_v59 = vld [vmem:[%s4010_s9 + $0x18] sm:$0xff]  }
  0x5b   : > { %v3249_v31 = vcombine.low %v1723_v55, %v1726_v38  ;;  %v818_v42 = vrot.slane %v816_v51, 4  ;;  %v1733_v20 = vsel %vm4204_vm7, %v1731_v12, %v1732_v2  ;;  %v3113_v8 = vrot.slane %v782_v11, 9  ;;  %v785_v56 = vld [vmem:[%s4010_s9 + $0x3c] sm:$0xe] }
  0x5c   : > { %v823_v30 = vrot.slane %v4087_v25, 5  ;;  %v826_v24 = vrot.slane %v4095_v34, 5  ;;  %v925_v45 = vsel %vm506_vm0, %v3854_v6, 0  ;;  %v4417_v46 = vsel %vm4204_vm7, %v3112_v16, %v816_v51  ;;  %v4470_v38 = vld [vmem:[%s4010_s9 + $0x1c] sm:$0xf] }
  0x5d   : > { %v4421_v25 = vsel %vm4204_vm7, %v818_v42, %v819_v22  ;;  %v3114_v48 = vrot.slane %v783_v23, 9  ;;  %v3250_v61 = vcombine.low %v1730_v36, %v1733_v20  ;;  %v830_v63 = vrot.slane %v4132_v15, 5 }
  0x5e   : > { %v3123_v34 = vcombine.low %v4417_v46, %v4421_v25  ;;  %v825_v47 = vrot.slane %v823_v30, 4  ;;  %v833_v51 = vrot.slane %v4142_v26, 5  ;;  %v3115_v62 = vrot.slane %v784_v43, 9 }
  0x5f   : > { %3588 = vmatmul.mubr.msk.bf16.gmra.mrb[8].mxu0 %vm481_vm4, %v3248_v49  ;;  %3500 = vmatmul.mubr.msk.bf16.vlgmr.msra.gmra.mrb[0].mxu1 %vm481_vm4, %v3094_v53  ;;  %v3096_v55 = vcombine.low %v4129_v4, %v4132_v15  ;;  %v837_v53 = vrot.slane %v4173_v21, 5  ;;  %v840_v49 = vrot.slane %v4183_v35, 5  ;;  %v3097_v12 = vcombine.low %v4165_v57, %v4173_v21  ;;  %v3300_v21 = vld [vmem:[%s4010_s9 + $0x18] sm:$0xf] }
  0x60   : > { %3591 = vmatprep.mubr.msk.bf16.mxu0 %vm481_vm4, %v3249_v31  ;;  %3516 = vmatpush3.bf16.msra.mxu1 %v4237_v17  ;;  %v4428_v17 = vsel %vm4204_vm7, %v3113_v8, %v823_v30  ;;  %v4437_v7 = vsel %vm4204_vm7, %v825_v47, %v826_v24  ;;  %v4447_v4 = vsel %vm4204_vm7, %v3114_v48, %v830_v63  ;;  %v832_v15 = vrot.slane %v830_v63, 4  ;;  %v3858_v8 = vld [vmem:[%s4010_s9 + $0x24] sm:$0xff]   ;;  %v4603_v31 = vld [vmem:[%s4010_s9 + $0x4c] sm:$0xf] }
  0x61   : > { %3503 = vmatprep.mubr.msk.bf16.mxu1 %vm481_vm4, %v3095_v14  ;;  %3789 = vmatprep.subr.msk.bf16.mxu1 %vm506_vm0, %v3854_v6  ;;  %v3124_v26 = vcombine.low %v4428_v17, %v4437_v7  ;;  %v4452_v2 = vsel %vm4204_vm7, %v3115_v62, %v837_v53  ;;  %v839_v35 = vrot.slane %v837_v53, 4  ;;  %v780_v6 = vld [vmem:[%s4010_s9] sm:$0xe]  ;;  %v809_v11 = vrot.slane %v4017_v9, 5  ;;  %v786_v48 = vld [vmem:[%s4010_s9 + $0x48] sm:$0xe] }
  0x62   : > { %v4458_v57 = vsel %vm4204_vm7, %v832_v15, %v833_v51  ;;  %v3116_v36 = vrot.slane %v785_v56, 9  ;;  %v2149_v16 = vshrl.u32 %v3300_v21, 16  ;;  %v2152_v42 = vshll.u32 %v3300_v21, 16  ;;  %v4497_v62 = vld [vmem:[%s4010_s9 + $0x20] sm:$0x1] }
  0x63   : > { %v4467_v14 = vsel %vm4204_vm7, %v839_v35, %v840_v49  ;;  %v844_v23 = vrot.slane %v4209_v13, 5  ;;  %v847_v20 = vrot.slane %v4217_v19, 5  ;;  %v2158_v30 = vshll.u32 %v4470_v38, 16  ;;  %v3860_v19 = vld [vmem:[%s4010_s9 + $0x30] sm:$0xff]   ;;  %v4514_v15 = vld [vmem:[%s5034_s1 + $0x60] sm:$0xff]  }
  0x64   : > { %3518 = vmatpush3.bf16.msra.mxu1 %v925_v45  ;;  %v2162_v24 = vshrl.u32 %v4470_v38, 16  ;;  %v812_v43 = vrot.slane %v4020_v10, 5  ;;  %v3098_v9 = vcombine.low %v4198_v52, %v4209_v13  ;;  %v3111_v63 = vrot.slane %v780_v6, 9  ;;  %v3865_v10 = vld [vmem:[%s5034_s1 + $0x5c] ss:$0 sps:$4 sm:$0x33]  }
  0x65   : > { %3535 = vmatprep.subr.bf16.mxu1 %v4413_v60  ;;  %v4487_v45 = vsel %vm4204_vm7, %v3116_v36, %v844_v23  ;;  %v846_v47 = vrot.slane %v844_v23, 4  ;;  %v811_v51 = vrot.slane %v809_v11, 4  ;;  %v2151_v52 = vrot.slane %v2149_v16, 4  ;;  %v3303_v35 = vld [vmem:[%s4010_s9 + $0x24] sm:$0xf]  ;;  %v3862_v21 = vld [vmem:[%s4010_s9 + $0x3c] sm:$0xff]  }
  0x66   : > { %v2154_v13 = vrot.slane %v2152_v42, 5  ;;  %v3117_v49 = vrot.slane %v786_v48, 9  ;;  %v851_v56 = vrot.slane %v4242_v18, 5  ;;  %v810_v6 = vsel %vm4204_vm7, %v3111_v63, %v809_v11  ;;  %v4527_v16 = vld [vmem:[%s4010_s9 + $0x28] sm:$0xf] }
  0x67   : > { %3592 = vmatmul.mubr.msk.bf16.gmra.mrb[12].mxu0 %vm481_vm4, %v3250_v61  ;;  %3504 = vmatmul.mubr.msk.bf16.gmra.mrb[4].mxu1 %vm481_vm4, %v3096_v55  ;;  %v3099_v61 = vcombine.low %v4227_v39, %v4242_v18  ;;  %v4501_v55 = vsel %vm4204_vm7, %v846_v47, %v847_v20  ;;  %v4504_v39 = vrot.slane %v2158_v30, 5  ;;  %v2402_v36 = vsel %vm506_vm0, %v3865_v10, 0  ;;  %v3306_v11 = vld [vmem:[%s4010_s9 + $0x30] sm:$0xf]  ;;  %v3864_v30 = vld [vmem:[%s4010_s9 + $0x48] sm:$0xff]  }
  0x68   : > { %3599 = vmatprep.mubr.msk.bf16.mxu0 %vm481_vm4, %v3855_v59  ;;  %3507 = vmatprep.mubr.msk.bf16.mxu1 %vm481_vm4, %v3097_v12  ;;  %v2164_v59 = vrot.slane %v2162_v24, 4  ;;  %v854_v42 = vrot.slane %v4250_v54, 5  ;;  %v2168_v18 = vshll.u32 %v4497_v62, 16  ;;  %v4534_v23 = vsel %vm4204_vm7, %v3117_v49, %v851_v56  ;;  %v4542_v47 = vld [vmem:[%s4010_s9 + $0x34] sm:$0xf] }
  0x69   : > { %v853_v20 = vrot.slane %v851_v56, 4  ;;  %v2155_v24 = vor.u32 %v2154_v13, %v2151_v52  ;;  %v787_v54 = vld [vmem:[%s4010_s9 + $0x54] sm:$0xe]  ;;  %v2200_v52 = vshll.u32 %v3306_v11, 16  ;;  %v858_v49 = vrot.slane %v4280_v37, 5 }
  0x6a   : > { %v2170_v13 = vrot.slane %v2168_v18, 5  ;;  %v4631_v17 = vld [vmem:[%s4010_s9 + $0x44] sm:$0x1] }
  0x6b   : > { %v4548_v63 = vsel %vm4204_vm7, %v853_v20, %v854_v42  ;;  %v2156_v56 = vrot.slane %v2155_v24, 4  ;;  %v2210_v42 = vshrl.u32 %v4542_v47, 16 }
  0x6f   : > { %3600 = vmatmul.mubr.msk.bf16.vlgmr.msra.gmra.mrb[0].mxu0 %vm481_vm4, %v3858_v8  ;;  %3508 = vmatmul.mubr.msk.bf16.gmra.mrb[8].mxu1 %vm481_vm4, %v3098_v9  ;;  %v3100_v8 = vcombine.low %v4277_v58, %v4280_v37  ;;  %v2173_v9 = vshrl.u32 %v3303_v35, 16  ;;  %v2186_v58 = vshrl.u32 %v4527_v16, 16 }
  0x70   : > { %3616 = vmatpush3.bf16.msra.mxu0 %v4355_v28  ;;  %3511 = vmatprep.mubr.msk.bf16.mxu1 %vm481_vm4, %v3099_v61  ;;  %v813_v28 = vsel %vm4204_vm7, %v811_v51, %v812_v43  ;;  %v2165_v43 = vor.u32 %v2164_v59, %v4504_v39  ;;  %v2176_v61 = vshll.u32 %v3303_v35, 16  ;;  %v3118_v59 = vrot.slane %v787_v54, 9  ;;  %v4577_v54 = vld [vmem:[%s4010_s9 + $0x38] sm:$0x1] }
  0x71   : > { %3603 = vmatprep.mubr.msk.bf16.mxu0 %vm481_vm4, %v3860_v19  ;;  %3795 = vmatprep.subr.msk.bf16.mxu0 %vm506_vm0, %v3865_v10  ;;  %v3122_v48 = vcombine.low %v810_v6, %v813_v28  ;;  %v2182_v19 = vshll.u32 %v4527_v16, 16  ;;  %v2197_v10 = vshrl.u32 %v3306_v11, 16  ;;  %v861_v35 = vrot.slane %v4291_v50, 5  ;;  %v4558_v28 = vld [vmem:[%s4010_s9 + $0x2c] sm:$0x1] }
  0x72   : > { %v2166_v6 = vrot.slane %v2165_v43, 4  ;;  %v2175_v18 = vrot.slane %v2173_v9, 4  ;;  %v2178_v20 = vrot.slane %v2176_v61, 5  ;;  %v4566_v37 = vsel %vm4204_vm7, %v3118_v59, %v858_v49  ;;  %v3869_v9 = vld [vmem:[%s5034_s1 + $0x2c] ss:$0 sps:$4 sm:$0x33]  }
  0x73   : > { %v860_v50 = vrot.slane %v858_v49, 4  ;;  %v4570_v11 = vrot.slane %v2182_v19, 5  ;;  %v2188_v24 = vrot.slane %v2186_v58, 4  ;;  %v2199_v43 = vrot.slane %v2197_v10, 4  ;;  %v3309_v10 = vld [vmem:[%s4010_s9 + $0x3c] sm:$0xf] }
  0x74   : > { %3618 = vmatpush3.bf16.msra.mxu0 %v2402_v36  ;;  %v2206_v36 = vshll.u32 %v4542_v47, 16  ;;  %v2212_v19 = vrot.slane %v2210_v42, 4  ;;  %v3867_v49 = vld [vmem:[%s4010_s9 + $0x60] sm:$0xff]   ;;  %v2161_v51 = vsel %vm4043_vm3, %v2156_v56, %v4504_v39  ;;  %v2179_v42 = vor.u32 %v2178_v20, %v2175_v18 }
  0x75   : > { %3635 = vmatprep.subr.bf16.mxu0 %v4514_v15  ;;  %v4581_v61 = vsel %vm4204_vm7, %v860_v50, %v861_v35  ;;  %v2171_v35 = vsel %vm4043_vm3, %v2166_v6, %v2170_v13  ;;  %v3312_v50 = vld [vmem:[%s4010_s9 + $0x48] sm:$0xf]  ;;  %v2189_v53 = vor.u32 %v2188_v24, %v4570_v11  ;;  %v2221_v59 = vshrl.u32 %v3309_v10, 16 }
  0x76   : > { %v2224_v22 = vshll.u32 %v3309_v10, 16  ;;  %v1138_v13 = vsel %vm506_vm0, %v3869_v9, 0  ;;  %v2245_v6 = vshrl.u32 %v3312_v50, 16  ;;  %v2248_v18 = vshll.u32 %v3312_v50, 16  ;;  %v3868_v10 = vld [vmem:[%s4010_s9 + $0x6c] sm:$0xff]  }
  0x77   : > { %3604 = vmatmul.mubr.msk.bf16.gmra.mrb[4].mxu0 %vm481_vm4, %v3862_v21  ;;  %3512 = vmatmul.mubr.msk.bf16.gmra.mrb[12].mxu1 %vm481_vm4, %v3100_v8  ;;  %v3866_v21 = vld [vmem:[%s4010_s9 + $0x54] sm:$0xff]   ;;  %v2202_v8 = vrot.slane %v2200_v52, 5  ;;  %v4589_v52 = vld [vmem:[%s4010_s9 + $0x40] sm:$0xf]  ;;  %v3327_v20 = vcombine.low %v2161_v51, %v2171_v35  ;;  %v2180_v46 = vrot.slane %v2179_v42, 4  ;;  %v2190_v25 = vrot.slane %v2189_v53, 4 }
  0x78   : > { %3607 = vmatprep.mubr.msk.bf16.mxu0 %vm481_vm4, %v3864_v30  ;;  %3519 = vmatprep.mubr.msk.bf16.mxu1 %vm481_vm4, %v3122_v48  ;;  %v4583_v48 = vrot.slane %v2206_v36, 5  ;;  %v2192_v36 = vshll.u32 %v4558_v28, 16  ;;  %v2216_v30 = vshll.u32 %v4577_v54, 16  ;;  %v2230_v12 = vshll.u32 %v4589_v52, 16  ;;  %v4624_v51 = vld [vmem:[%s4010_s9 + $0x58] sm:$0xf] }
  0x79   : > { %v2203_v58 = vor.u32 %v2202_v8, %v2199_v43  ;;  %v2234_v39 = vshrl.u32 %v4589_v52, 16  ;;  %v2254_v43 = vshll.u32 %v4603_v31, 16  ;;  %v3315_v8 = vld [vmem:[%s4010_s9 + $0x54] sm:$0xf]  ;;  %v2226_v35 = vrot.slane %v2224_v22, 5 }
  0x7a   : > { %v2213_v56 = vor.u32 %v2212_v19, %v4583_v48  ;;  %v2194_v24 = vrot.slane %v2192_v36, 5  ;;  %v2218_v19 = vrot.slane %v2216_v30, 5  ;;  %v4628_v36 = vrot.slane %v2230_v12, 5  ;;  %v4634_v53 = vld [vmem:[%s4010_s9 + $0x50] sm:$0x1] }
  0x7b   : > { %v2247_v7 = vrot.slane %v2245_v6, 4  ;;  %v2269_v42 = vshrl.u32 %v3315_v8, 16  ;;  %v4636_v30 = vrot.slane %v2254_v43, 5  ;;  %v2272_v44 = vshll.u32 %v3315_v8, 16  ;;  %v3318_v6 = vld [vmem:[%s4010_s9 + $0x60] sm:$0xf] }
  0x7c   : > { %v2214_v50 = vrot.slane %v2213_v56, 4  ;;  %v5049_v22 = vshll.u32 %v4327_v0, 16  ;;  %v2282_v56 = vshrl.u32 %v4624_v51, 16  ;;  %v2240_v8 = vshll.u32 %v4631_v17, 16 }
  0x7e   : > { %v4641_v12 = vrot.slane %v5049_v22, 5 }
  0x7f   : > { %3608 = vmatmul.mubr.msk.bf16.gmra.mrb[8].mxu0 %vm481_vm4, %v3866_v21  ;;  %3520 = vmatmul.mubr.msk.bf16.vlgmr.msra.gmra.mrb[0].mxu1 %vm481_vm4, %v3123_v34  ;;  %v2258_v21 = vshrl.u32 %v4603_v31, 16  ;;  %v2204_v34 = vrot.slane %v2203_v58, 4 }
  0x80   : > { %3611 = vmatprep.mubr.msk.bf16.mxu0 %vm481_vm4, %v3867_v49  ;;  %3536 = vmatpush3.bf16.msra.mxu1 %v4413_v60  ;;  %v2223_v49 = vrot.slane %v2221_v59, 4  ;;  %v2236_v60 = vrot.slane %v2234_v39, 4  ;;  %v2185_v59 = vsel %vm4043_vm3, %v2180_v46, %v4570_v11  ;;  %v2195_v39 = vsel %vm4043_vm3, %v2190_v25, %v2194_v24  ;;  %v4658_v11 = vld [vmem:[%s5034_s1 + $0x30] sm:$0xff]  }
  0x81   : > { %3523 = vmatprep.mubr.msk.bf16.mxu1 %vm481_vm4, %v3124_v26  ;;  %3790 = vmatprep.subr.msk.bf16.mxu1 %vm506_vm0, %v3869_v9  ;;  %v2250_v26 = vrot.slane %v2248_v18, 5  ;;  %v2260_v58 = vrot.slane %v2258_v21, 4  ;;  %v2278_v9 = vshll.u32 %v4624_v51, 16  ;;  %v2209_v18 = vsel %vm4043_vm3, %v2204_v34, %v4583_v48 }
  0x82   : > { %v2227_v43 = vor.u32 %v2226_v35, %v2223_v49  ;;  %v2237_v21 = vor.u32 %v2236_v60, %v4628_v36  ;;  %v2219_v48 = vsel %vm4043_vm3, %v2214_v50, %v2218_v19  ;;  %v2264_v46 = vshll.u32 %v4634_v53, 16  ;;  %v4681_v50 = vld [vmem:[%s4010_s9 + $0x5c] sm:$0x1] }
  0x83   : > { %v2251_v24 = vor.u32 %v2250_v26, %v2247_v7  ;;  %v2271_v25 = vrot.slane %v2269_v42, 4  ;;  %v5051_v34 = vcombine.low %v4447_v4, %v4458_v57  ;;  %v2261_v49 = vor.u32 %v2260_v58, %v4636_v30  ;;  %v3872_v58 = vld [vmem:[%s5034_s1 + $0x68] ss:$0 sps:$4 sm:$0x33]  }
  0x84   : > { %3538 = vmatpush3.bf16.msra.mxu1 %v1138_v13  ;;  %v4662_v13 = vld [vmem:[%s4010_s9 + $0x64] sm:$0xf]  ;;  %v2274_v35 = vrot.slane %v2272_v44, 5  ;;  %v4674_v60 = vrot.slane %v2278_v9, 5  ;;  %v5052_v19 = vcombine.low %v4452_v2, %v4467_v14  ;;  %v2284_v7 = vrot.slane %v2282_v56, 4 }
  0x85   : > { %3655 = vmatprep.subr.bf16.mxu1 %v4658_v11  ;;  %5050 = vst [vmem:[#allocation5_spill] sm:$0xff] %v4662_v13  ;;  %v2296_v4 = vshll.u32 %v3318_v6, 16  ;;  %v2302_v57 = vshll.u32 %v4662_v13, 16  ;;  %v2228_v26 = vrot.slane %v2227_v43, 4  ;;  %v2238_v44 = vrot.slane %v2237_v21, 4 }
  0x86   : > { %v2242_v42 = vrot.slane %v2240_v8, 5  ;;  %v3328_v9 = vcombine.low %v2185_v59, %v2195_v39  ;;  %v3329_v2 = vcombine.low %v2209_v18, %v2219_v48  ;;  %v2252_v14 = vrot.slane %v2251_v24, 4 }
  0x87   : > { %3612 = vmatmul.mubr.msk.bf16.gmra.mrb[12].mxu0 %vm481_vm4, %v3868_v10  ;;  %3524 = vmatmul.mubr.msk.bf16.gmra.mrb[4].mxu1 %vm481_vm4, %v5051_v34  ;;  %v2293_v10 = vshrl.u32 %v3318_v6, 16  ;;  %v2266_v22 = vrot.slane %v2264_v46, 5  ;;  %v3321_v34 = vld [vmem:[%s4010_s9 + $0x6c] sm:$0xf]  ;;  %v2262_v56 = vrot.slane %v2261_v49, 4  ;;  %v2275_v6 = vor.u32 %v2274_v35, %v2271_v25 }
  0x88   : > { %3619 = vmatprep.mubr.msk.bf16.mxu0 %vm481_vm4, %v3327_v20  ;;  %3527 = vmatprep.mubr.msk.bf16.mxu1 %vm481_vm4, %v5052_v19  ;;  %v2306_v20 = vshrl.u32 %v4662_v13, 16  ;;  %v2288_v19 = vshll.u32 %v4681_v50, 16  ;;  %v2285_v43 = vor.u32 %v2284_v7, %v4674_v60  ;;  %v2298_v21 = vrot.slane %v2296_v4, 5  ;;  %v4705_v46 = vld [vmem:[%s4010_s9 + $0x68] sm:$0x1] }
  0x89   : > { %v2295_v33 = vrot.slane %v2293_v10, 4  ;;  %v4694_v8 = vrot.slane %v2302_v57, 5  ;;  %v5053_v59 = vshrl.u32 %v4327_v0, 16  ;;  %v2233_v18 = vsel %vm4043_vm3, %v2228_v26, %v4628_v36 }
  0x8a   : > { %v2308_v13 = vrot.slane %v2306_v20, 4  ;;  %v2243_v48 = vsel %vm4043_vm3, %v2238_v44, %v2242_v42  ;;  %v2667_v24 = vsel %vm506_vm0, %v3872_v58, 0  ;;  %v2317_v25 = vshrl.u32 %v3321_v34, 16  ;;  %v4730_v42 = vld [vmem:[%s4010_s9 + $0x74] sm:$0x1] }
  0x8b   : > { %v1413_v39 = vrot.slane %v5053_v59, 4  ;;  %v2320_v49 = vshll.u32 %v3321_v34, 16  ;;  %v2326_v35 = vshll.u32 %v4691_v40, 16  ;;  %v2330_v0 = vshrl.u32 %v4691_v40, 16  ;;  %v3345_v59 = vld [vmem:[%s4010_s9 + $0x18] sm:$0xe] }
  0x8c   : > { %v5054_v10 = vcombine.low %v4487_v45, %v4501_v55  ;;  %v2257_v36 = vsel %vm4043_vm3, %v2252_v14, %v4636_v30  ;;  %v2267_v7 = vsel %vm4043_vm3, %v2262_v56, %v2266_v22  ;;  %v2276_v4 = vrot.slane %v2275_v6, 4 }
  0x8d   : > { %v2290_v57 = vrot.slane %v2288_v19, 5  ;;  %v5055_v20 = vcombine.low %v4534_v23, %v4548_v63  ;;  %v2286_v45 = vrot.slane %v2285_v43, 4  ;;  %v2299_v55 = vor.u32 %v2298_v21, %v2295_v33 }
  0x8e   : > { %v2312_v26 = vshll.u32 %v4705_v46, 16  ;;  %v1414_v30 = vor.u32 %v1413_v39, %v4641_v12  ;;  %v3330_v44 = vcombine.low %v2233_v18, %v2243_v48  ;;  %v2319_v23 = vrot.slane %v2317_v25, 4 }
  0x8f   : > { %3620 = vmatmul.mubr.msk.bf16.vlgmr.msra.gmra.mrb[0].mxu0 %vm481_vm4, %v3328_v9  ;;  %3528 = vmatmul.mubr.msk.bf16.gmra.mrb[8].mxu1 %vm481_vm4, %v5054_v10  ;;  %v2322_v63 = vrot.slane %v2320_v49, 5  ;;  %v4732_v9 = vrot.slane %v2326_v35, 5  ;;  %v5056_v33 = vshll.u32 %v4332_v3, 16  ;;  %v2281_v22 = vsel %vm4043_vm3, %v2276_v4, %v4674_v60  ;;  %v3194_v3 = vld [vmem:[%s4010_s9 + $0x48] sm:$0xf] }
  0x90   : > { %3636 = vmatpush3.bf16.msra.mxu0 %v4514_v15  ;;  %3531 = vmatprep.mubr.msk.bf16.mxu1 %vm481_vm4, %v5055_v20  ;;  %v2309_v15 = vor.u32 %v2308_v13, %v4694_v8  ;;  %v3331_v13 = vcombine.low %v2257_v36, %v2267_v7  ;;  %v2291_v34 = vsel %vm4043_vm3, %v2286_v45, %v2290_v57  ;;  %v2300_v56 = vrot.slane %v2299_v55, 4  ;;  %v3346_v57 = vld [vmem:[%s4010_s9 + $0x24] sm:$0xe]  ;;  %v3191_v55 = vld [vmem:[%s4010_s9 + $0x3c] sm:$0xf] }
  0x91   : > { %3623 = vmatprep.mubr.msk.bf16.mxu0 %vm481_vm4, %v3329_v2  ;;  %3796 = vmatprep.subr.msk.bf16.mxu0 %vm506_vm0, %v3872_v58  ;;  %v2332_v2 = vrot.slane %v2330_v0, 4  ;;  %v4736_v14 = vrot.slane %v5056_v33, 5  ;;  %v3871_v58 = vld [vmem:[%s4010_s9 + $0xc] sm:$0xff]   ;;  %v2314_v19 = vrot.slane %v2312_v26, 5  ;;  %v1415_v43 = vrot.slane %v1414_v30, 4  ;;  %v3874_v26 = vld [vmem:[%s4010_s9 + $0x24] sm:$0xff]  }
  0x92   : > { %v2310_v6 = vrot.slane %v2309_v15, 4  ;;  %v2336_v21 = vshll.u32 %v4730_v42, 16  ;;  %v2323_v39 = vor.u32 %v2322_v63, %v2319_v23  ;;  %v2551_v60 = vrot.slane %v4470_v38, 5 }
  0x93   : > { %v2333_v18 = vor.u32 %v2332_v2, %v4732_v9  ;;  %v5057_v48 = vcombine.low %v4566_v37, %v4581_v61  ;;  %v2305_v25 = vsel %vm4043_vm3, %v2300_v56, %v4694_v8  ;;  %v3353_v49 = vrot.slane %v3345_v59, 9  ;;  %v3873_v8 = vld [vmem:[%s4010_s9 + $0x18] sm:$0xff]  }
  0x94   : > { %3638 = vmatpush3.bf16.msra.mxu0 %v2667_v24  ;;  %v3332_v24 = vcombine.low %v2281_v22, %v2291_v34  ;;  %v2315_v38 = vsel %vm4043_vm3, %v2310_v6, %v2314_v19  ;;  %v1398_v37 = vshrl.u32 %v3194_v3, 16  ;;  %v2338_v61 = vrot.slane %v2336_v21, 5  ;;  %v3881_v6 = vld [vmem:[%s5034_s1 + $0x38] ss:$0 sps:$4 sm:$0x33]  }
  0x95   : > { %v2554_v35 = vrot.slane %v4497_v62, 5  ;;  %v1401_v0 = vshll.u32 %v3194_v3, 16  ;;  %v1420_v10 = vsel %vm4043_vm3, %v1415_v43, %v4736_v14  ;;  %v2324_v36 = vrot.slane %v2323_v39, 4  ;;  %v3347_v19 = vld [vmem:[%s4010_s9 + $0x30] sm:$0xe] }
  0x96   : > { %v2334_v7 = vrot.slane %v2333_v18, 4  ;;  %v2553_v4 = vrot.slane %v2551_v60, 4  ;;  %v1400_v20 = vrot.slane %v1398_v37, 4  ;;  %v3333_v45 = vcombine.low %v2305_v25, %v2315_v38  ;;  %v3348_v38 = vld [vmem:[%s4010_s9 + $0x3c] sm:$0xe] }
  0x97   : > { %3624 = vmatmul.mubr.msk.bf16.gmra.mrb[4].mxu0 %vm481_vm4, %v3330_v44  ;;  %3532 = vmatmul.mubr.msk.bf16.gmra.mrb[12].mxu1 %vm481_vm4, %v5057_v48  ;;  %v1403_v15 = vrot.slane %v1401_v0, 5  ;;  %v2558_v30 = vrot.slane %v4527_v16, 5  ;;  %v2552_v62 = vsel %vm4204_vm7, %v3353_v49, %v2551_v60  ;;  %v3354_v44 = vrot.slane %v3346_v57, 9  ;;  %v3876_v60 = vld [vmem:[%s4010_s9 + $0x3c] sm:$0xff]  }
  0x98   : > { %3627 = vmatprep.mubr.msk.bf16.mxu0 %vm481_vm4, %v3331_v13  ;;  %3539 = vmatprep.mubr.msk.bf16.mxu1 %vm481_vm4, %v3871_v58  ;;  %v2329_v63 = vsel %vm4043_vm3, %v2324_v36, %v4732_v9  ;;  %v2339_v2 = vsel %vm4043_vm3, %v2334_v7, %v2338_v61  ;;  %v2555_v33 = vsel %vm4204_vm7, %v2553_v4, %v2554_v35  ;;  %v1374_v14 = vshrl.u32 %v3191_v55, 16  ;;  %v3197_v61 = vld [vmem:[%s4010_s9 + $0x54] sm:$0xf] }
  0x99   : > { %v1404_v23 = vor.u32 %v1403_v15, %v1400_v20  ;;  %v1377_v16 = vshll.u32 %v3191_v55, 16  ;;  %v1383_v13 = vshll.u32 %v4310_v29, 16  ;;  %v1387_v22 = vshrl.u32 %v4310_v29, 16 }
  0x9a   : > { %v2560_v9 = vrot.slane %v2558_v30, 4  ;;  %v2561_v34 = vrot.slane %v4558_v28, 5  ;;  %v2565_v56 = vrot.slane %v4542_v47, 5  ;;  %v3364_v43 = vcombine.low %v2552_v62, %v2555_v33  ;;  %v3875_v47 = vld [vmem:[%s4010_s9 + $0x30] sm:$0xff]  }
  0x9b   : > { %v1405_v58 = vrot.slane %v1404_v23, 4  ;;  %v2559_v21 = vsel %vm4204_vm7, %v3354_v44, %v2558_v30  ;;  %v1376_v59 = vrot.slane %v1374_v14, 4  ;;  %v1379_v3 = vrot.slane %v1377_v16, 5  ;;  %v3200_v16 = vld [vmem:[%s4010_s9 + $0x60] sm:$0xf] }
  0x9c   : > { %v4801_v39 = vrot.slane %v1383_v13, 5  ;;  %v1389_v18 = vrot.slane %v1387_v22, 4  ;;  %v3355_v48 = vrot.slane %v3347_v19, 9  ;;  %v2568_v25 = vrot.slane %v4577_v54, 5  ;;  %v3349_v54 = vld [vmem:[%s4010_s9 + $0x48] sm:$0xe] }
  0x9d   : > { %v1410_v29 = vsel %vm4043_vm3, %v1405_v58, %v4641_v12  ;;  %v2562_v12 = vsel %vm4204_vm7, %v2560_v9, %v2561_v34  ;;  %v2572_v49 = vrot.slane %v4589_v52, 5  ;;  %v2579_v37 = vrot.slane %v4603_v31, 5  ;;  %v3350_v34 = vld [vmem:[%s4010_s9 + $0x54] sm:$0xe] }
  0x9e   : > { %v4798_v28 = vcombine.low %v1410_v29, %v1420_v10  ;;  %v1380_v35 = vor.u32 %v1379_v3, %v1376_v59  ;;  %v1390_v0 = vor.u32 %v1389_v18, %v4801_v39  ;;  %v1393_v10 = vshll.u32 %v4316_v41, 16  ;;  %v3351_v29 = vld [vmem:[%s4010_s9 + $0x60] sm:$0xe] }
  0x9f   : > { %3628 = vmatmul.mubr.msk.bf16.gmra.mrb[8].mxu0 %vm481_vm4, %v3332_v24  ;;  %3540 = vmatmul.mubr.msk.bf16.vlgmr.msra.gmra.mrb[0].mxu1 %vm481_vm4, %v3873_v8  ;;  %v2567_v24 = vrot.slane %v2565_v56, 4  ;;  %v2566_v52 = vsel %vm4204_vm7, %v3355_v48, %v2565_v56  ;;  %v3356_v36 = vrot.slane %v3348_v38, 9  ;;  %v2575_v7 = vrot.slane %v4631_v17, 5  ;;  %v3879_v38 = vld [vmem:[%s4010_s9 + $0x60] sm:$0xff]  }
  0xa0   : > { %3631 = vmatprep.mubr.msk.bf16.mxu0 %vm481_vm4, %v3333_v45  ;;  %3657 = vmatpush3.bf16.msra.mxu1 %v4658_v11  ;;  %v3334_v11 = vcombine.low %v2329_v63, %v2339_v2  ;;  %v1422_v4 = vshrl.u32 %v3197_v61, 16  ;;  %v1425_v57 = vshll.u32 %v3197_v61, 16  ;;  %v1431_v20 = vshll.u32 %v4347_v27, 16  ;;  %v3878_v63 = vld [vmem:[%s4010_s9 + $0x54] sm:$0xff]  }
  0xa1   : > { %3543 = vmatprep.mubr.msk.bf16.mxu1 %vm481_vm4, %v3874_v26  ;;  %3792 = vmatprep.subr.msk.bf16.mxu1 %vm506_vm0, %v3881_v6  ;;  %v2569_v31 = vsel %vm4204_vm7, %v2567_v24, %v2568_v25  ;;  %v1435_v41 = vshrl.u32 %v4347_v27, 16  ;;  %v2574_v8 = vrot.slane %v2572_v49, 4  ;;  %v3357_v45 = vrot.slane %v3349_v54, 9  ;;  %v3877_v26 = vld [vmem:[%s4010_s9 + $0x48] sm:$0xff]   ;;  %v5058_v6 = vld [vmem:[#allocation5_spill] sm:$0xff] }
  0xa2   : > { %v2581_v55 = vrot.slane %v2579_v37, 4  ;;  %v2582_v15 = vrot.slane %v4634_v53, 5  ;;  %v3366_v30 = vcombine.low %v2566_v52, %v2569_v31  ;;  %v1381_v62 = vrot.slane %v1380_v35, 4 }
  0xa3   : > { %v1391_v44 = vrot.slane %v1390_v0, 4  ;;  %v1395_v23 = vrot.slane %v1393_v10, 5  ;;  %v1424_v17 = vrot.slane %v1422_v4, 4  ;;  %v1427_v2 = vrot.slane %v1425_v57, 5 }
  0xa4   : > { %3658 = vmatpush3.bf16.msra.mxu1 %v3993_v5  ;;  %v3365_v5 = vcombine.low %v2559_v21, %v2562_v12  ;;  %v1433_v33 = vrot.slane %v1431_v20, 5  ;;  %v1437_v14 = vrot.slane %v1435_v41, 4  ;;  %v2573_v27 = vsel %vm4204_vm7, %v3356_v36, %v2572_v49  ;;  %v5059_v21 = vld [vmem:[#allocation3_spill] sm:$0xff] }
  0xa5   : > { %v2576_v53 = vsel %vm4204_vm7, %v2574_v8, %v2575_v7  ;;  %v2580_v13 = vsel %vm4204_vm7, %v3357_v45, %v2579_v37  ;;  %v2583_v22 = vsel %vm4204_vm7, %v2581_v55, %v2582_v15  ;;  %v1386_v58 = vsel %vm4043_vm3, %v1381_v62, %v4801_v39  ;;  %v5061_v8 = vld [vmem:[#allocation4_spill] sm:$0xff]  ;;  %v3352_v55 = vld [vmem:[%s4010_s9 + $0x6c] sm:$0xe]  ;;  %s3063_s9 = sshll.u32 %s3904_s12, 3  ;;  %s5077_s12 = smov (!%p211_p7, %s3904_s12), 1 }
  0xa6   : > { %v1396_v9 = vsel %vm4043_vm3, %v1391_v44, %v1395_v23  ;;  %v2586_v56 = vrot.slane %v4624_v51, 5  ;;  %v2593_v19 = vrot.slane %v5058_v6, 5  ;;  %v1459_v59 = vshrl.u32 %v5059_v21, 16  ;;  %p201_p6 = scmp.lt.s32.totalorder %s3063_s9, 15  ;;  %s214_s7 = sadd.s32 %s3067_s6, %s5077_s12 }
  0xa7   : > { %3632 = vmatmul.mubr.msk.bf16.gmra.mrb[12].mxu0 %vm481_vm4, %v3334_v11  ;;  %3544 = vmatmul.mubr.msk.bf16.gmra.mrb[4].mxu1 %vm481_vm4, %v3875_v47  ;;  %v1446_v11 = vshrl.u32 %v3200_v16, 16  ;;  %v1455_v47 = vshll.u32 %v5059_v21, 16  ;;  %v3367_v3 = vcombine.low %v2573_v27, %v2576_v53  ;;  %v1428_v39 = vor.u32 %v1427_v2, %v1424_v17  ;;  %s3068_s8 = sshll.u32 %s214_s7, 1 }
  0xa8   : > { %3639 = vmatprep.mubr.msk.bf16.mxu0 %vm481_vm4, %v3364_v43  ;;  %3547 = vmatprep.mubr.msk.bf16.mxu1 %vm481_vm4, %v3876_v60  ;;  %v1449_v43 = vshll.u32 %v3200_v16, 16  ;;  %v1438_v18 = vor.u32 %v1437_v14, %v1433_v33  ;;  %v5060_v60 = vld [vmem:[#allocation2_spill] sm:$0xff]  ;;  %v3210_v48 = vcombine.low %v1386_v58, %v1396_v9  ;;  %v3368_v24 = vcombine.low %v2580_v13, %v2583_v22  ;;  %s5075_s9 = smov (!%p201_p6, %s3063_s9), 15  ;;  %s216_s19 = scalar_lea.vmem %s5036_s3, %s3068_s8 }
  0xa9   : > { %v1441_v12 = vshll.u32 %v5060_v60, 16  ;;  %v3358_v51 = vrot.slane %v3350_v34, 9  ;;  %v2589_v25 = vrot.slane %v4681_v50, 5  ;;  %v2588_v49 = vrot.slane %v2586_v56, 4  ;;  %s3064_s26 = sshll.u32 %s5075_s9, 1 }
  0xaa   : > { %v3359_v37 = vrot.slane %v3351_v29, 9  ;;  %v2595_v61 = vrot.slane %v2593_v19, 4  ;;  %v1448_v35 = vrot.slane %v1446_v11, 4  ;;  %v1451_v0 = vrot.slane %v1449_v43, 5  ;;  %s205_s28 = sadd.s32 %s3065_s27, %s3064_s26 }
  0xab   : > { %v1457_v10 = vrot.slane %v1455_v47, 5  ;;  %v1461_v54 = vrot.slane %v1459_v59, 4  ;;  %v1429_v52 = vrot.slane %v1428_v39, 4  ;;  %v1439_v31 = vrot.slane %v1438_v18, 4  ;;  %s3066_s29 = sshll.u32 %s205_s28, 3 }
  0xac   : > { %v1443_v36 = vrot.slane %v1441_v12, 5  ;;  %v2587_v50 = vsel %vm4204_vm7, %v3358_v51, %v2586_v56  ;;  %v2594_v7 = vsel %vm4204_vm7, %v3359_v37, %v2593_v19  ;;  %v2600_v4 = vrot.slane %v4691_v40, 5  ;;  %s4897_s5 = scalar_lea.vmem %s5035_s2, %s3066_s29 }
  0xad   : > { %v1452_v20 = vor.u32 %v1451_v0, %v1448_v35  ;;  %v1462_v41 = vor.u32 %v1461_v54, %v1457_v10  ;;  %v1465_v45 = vshll.u32 %v5061_v8, 16  ;;  %v1434_v15 = vsel %vm4043_vm3, %v1429_v52, %v1433_v33 }
  0xae   : > { %v3360_v44 = vrot.slane %v3352_v55, 9  ;;  %v2602_v40 = vrot.slane %v2600_v4, 4  ;;  %v2603_v23 = vrot.slane %v4730_v42, 5 }
  0xaf   : > { %3640 = vmatmul.mubr.msk.bf16.vlgmr.msra.gmra.mrb[0].mxu0 %vm481_vm4, %v3365_v5  ;;  %3548 = vmatmul.mubr.msk.bf16.gmra.mrb[8].mxu1 %vm481_vm4, %v3877_v26  ;;  %v2596_v5 = vrot.slane %v4705_v46, 5  ;;  %v2590_v46 = vsel %vm4204_vm7, %v2588_v49, %v2589_v25  ;;  %v1444_v26 = vsel %vm4043_vm3, %v1439_v31, %v1443_v36  ;;  %v1453_v17 = vrot.slane %v1452_v20, 4 }
  0xb0   : > { %3643 = vmatprep.mubr.msk.bf16.mxu0 %vm481_vm4, %v3366_v30  ;;  %3551 = vmatprep.mubr.msk.bf16.mxu1 %vm481_vm4, %v3878_v63  ;;  %v3369_v30 = vcombine.low %v2587_v50, %v2590_v46  ;;  %v3212_v63 = vcombine.low %v1434_v15, %v1444_v26  ;;  %v1463_v2 = vrot.slane %v1462_v41, 4  ;;  %v1467_v14 = vrot.slane %v1465_v45, 5 }
  0xb1   : > { %v2597_v57 = vsel %vm4204_vm7, %v2595_v61, %v2596_v5  ;;  %v2601_v33 = vsel %vm4204_vm7, %v3360_v44, %v2600_v4  ;;  %v2604_v16 = vsel %vm4204_vm7, %v2602_v40, %v2603_v23  ;;  %v1458_v42 = vsel %vm4043_vm3, %v1453_v17, %v1457_v10 }
  0xb2   : > { %v3370_v62 = vcombine.low %v2594_v7, %v2597_v57  ;;  %v1468_v27 = vsel %vm4043_vm3, %v1463_v2, %v1467_v14  ;;  %v3371_v53 = vcombine.low %v2601_v33, %v2604_v16 }
  0xb3   : > { %v3213_v13 = vcombine.low %v1458_v42, %v1468_v27 }
  0xb7   : > { %3644 = vmatmul.mubr.msk.bf16.gmra.mrb[4].mxu0 %vm481_vm4, %v3367_v3  ;;  %3552 = vmatmul.mubr.msk.bf16.gmra.mrb[12].mxu1 %vm481_vm4, %v3879_v38 }
  0xb8   : > { %3647 = vmatprep.mubr.msk.bf16.mxu0 %vm481_vm4, %v3368_v24  ;;  %3567 = vmatprep.mubr.msk.bf16.mxu1 %vm481_vm4, %v3210_v48 }
  0xbf   : > { %3648 = vmatmul.mubr.msk.bf16.gmra.mrb[8].mxu0 %vm481_vm4, %v3369_v30  ;;  %3568 = vmatmul.mubr.msk.bf16.vlgmr.msra.gmra.mrb[8].mxu1 %vm481_vm4, %v4798_v28 }
  0xc0   : > { %3651 = vmatprep.mubr.msk.bf16.mxu0 %vm481_vm4, %v3370_v62  ;;  %3571 = vmatprep.mubr.msk.bf16.mxu1 %vm481_vm4, %v3212_v63 }
  0xc7   : > { %3652 = vmatmul.mubr.msk.bf16.gmra.mrb[12].mxu0 %vm481_vm4, %v3371_v53  ;;  %3572 = vmatmul.mubr.msk.bf16.gmra.mrb[12].mxu1 %vm481_vm4, %v3213_v13 }
 0x172   : > { %v3541_v28 = vpop.f32.mrb[0].mxu1 }
 0x173   : > { %v1174_v1 = vpop.f32.mrb[1].mxu1 }
 0x174   : > { %v3542_v22 = vpop.f32.mrb[2].mxu1 }
 0x175   : > { %v1177_v58 = vpop.f32.mrb[3].mxu1 }
 0x17a   : > { %v3545_v9 = vpop.f32.mrb[4].mxu1 }
 0x17b   : > { %v1190_v34 = vpop.f32.mrb[5].mxu1 }
 0x17c   : > { %v3546_v32 = vpop.f32.mrb[6].mxu1 }
 0x17d   : > { %v1193_v56 = vpop.f32.mrb[7].mxu1 }
 0x182   : > { %v3641_v6 = vpop.f32.mrb[0].mxu0 }
 0x183   : > { %v4899_v19 = vadd.f32 %v3641_v6, %v3541_v28  ;;  %v2703_v29 = vpop.f32.mrb[1].mxu0 }
 0x184   : > { %v4901_v11 = vadd.f32 %v2703_v29, %v1174_v1  ;;  %v3642_v43 = vpop.f32.mrb[2].mxu0 }
 0x185   : > { %2785 = vst.msk [vmem:[%s4897_s5 + $0x10] sm:$0xff] %vm2782_vm8, %v4899_v19  ;;  %v4906_v21 = vadd.f32 %v3642_v43, %v3542_v22  ;;  %v2706_v47 = vpop.f32.mrb[3].mxu0  ;;  %v2802_v60 = vsel %vm2782_vm8, %v4899_v19, 0.0 }
 0x186   : > { %2783 = vst.msk [vmem:[%s4897_s5] sm:$0xff] %vm2782_vm8, %v4901_v11  ;;  %v4911_v59 = vadd.f32 %v2706_v47, %v1177_v58  ;;  %v2799_v3 = vsel %vm2782_vm8, %v4901_v11, 0.0 }
 0x187   : > { %2786 = vst.msk [vmem:[%s4897_s5 + $0x18] sm:$0xff] %vm2782_vm8, %v4906_v21  ;;  %v2804_v25 = vsel %vm2782_vm8, %v4906_v21, 0.0 }
 0x188   : > { %2784 = vst.msk [vmem:[%s4897_s5 + $0x8] sm:$0xff] %vm2782_vm8, %v4911_v59  ;;  %v2800_v39 = vsel %vm2782_vm8, %v4911_v59, 0.0 }
 0x189   : > { %v2801_v18 = vadd.f32 %v2800_v39, %v2799_v3 }
 0x18a   : > { %v3645_v12 = vpop.f32.mrb[4].mxu0 }
 0x18b   : > { %v2803_v48 = vadd.f32 %v2802_v60, %v2801_v18  ;;  %v4925_v24 = vadd.f32 %v3645_v12, %v3545_v9  ;;  %v2719_v51 = vpop.f32.mrb[5].mxu0 }
 0x18c   : > { %v4929_v38 = vadd.f32 %v2719_v51, %v1190_v34  ;;  %v3646_v49 = vpop.f32.mrb[6].mxu0 }
 0x18d   : > { %2789 = vst.msk [vmem:[%s4897_s5 + $0x30] sm:$0xff] %vm2782_vm8, %v4925_v24  ;;  %v2805_v37 = vadd.f32 %v2804_v25, %v2803_v48  ;;  %v4934_v61 = vadd.f32 %v3646_v49, %v3546_v32  ;;  %v2722_v5 = vpop.f32.mrb[7].mxu0  ;;  %v2810_v31 = vsel %vm2782_vm8, %v4925_v24, 0.0 }
 0x18e   : > { %2787 = vst.msk [vmem:[%s4897_s5 + $0x20] sm:$0xff] %vm2782_vm8, %v4929_v38  ;;  %v2806_v35 = vsel %vm2782_vm8, %v4929_v38, 0.0  ;;  %v4941_v0 = vadd.f32 %v2722_v5, %v1193_v56 }
 0x18f   : > { %v2807_v10 = vadd.f32 %v2806_v35, %v2805_v37  ;;  %2790 = vst.msk [vmem:[%s4897_s5 + $0x38] sm:$0xff] %vm2782_vm8, %v4934_v61  ;;  %v2812_v4 = vsel %vm2782_vm8, %v4934_v61, 0.0 }
 0x190   : > { %2788 = vst.msk [vmem:[%s4897_s5 + $0x28] sm:$0xff] %vm2782_vm8, %v4941_v0  ;;  %v2808_v54 = vsel %vm2782_vm8, %v4941_v0, 0.0 }
 0x191   : > { %v2809_v52 = vadd.f32 %v2808_v54, %v2807_v10 }
 0x192   : > { %v3649_v36 = vpop.f32.mrb[8].mxu0  ;;  %v3569_v46 = vpop.f32.mrb[8].mxu1 }
 0x193   : > { %v2811_v50 = vadd.f32 %v2810_v31, %v2809_v52  ;;  %v2735_v7 = vpop.f32.mrb[9].mxu0  ;;  %v4955_v57 = vadd.f32 %v3649_v36, %v3569_v46  ;;  %v1599_v20 = vpop.f32.mrb[9].mxu1 }
 0x194   : > { %v3650_v41 = vpop.f32.mrb[10].mxu0  ;;  %v3668_v8 = vadd.f32 %v2735_v7, %v1599_v20  ;;  %v3570_v55 = vpop.f32.mrb[10].mxu1 }
 0x195   : > { %v2813_v45 = vadd.f32 %v2812_v4, %v2811_v50  ;;  %v2738_v15 = vpop.f32.mrb[11].mxu0  ;;  %2793 = vst.msk [vmem:[%s4897_s5 + $0x50] sm:$0xff] %vm2782_vm8, %v4955_v57  ;;  %v3669_v26 = vadd.f32 %v3650_v41, %v3570_v55  ;;  %v1602_v30 = vpop.f32.mrb[11].mxu1  ;;  %v2818_v2 = vsel %vm2782_vm8, %v4955_v57, 0.0 }
 0x196   : > { %2791 = vst.msk [vmem:[%s4897_s5 + $0x40] sm:$0xff] %vm2782_vm8, %v3668_v8  ;;  %v2814_v62 = vsel %vm2782_vm8, %v3668_v8, 0.0  ;;  %v3670_v44 = vadd.f32 %v2738_v15, %v1602_v30 }
 0x197   : > { %v2815_v40 = vadd.f32 %v2814_v62, %v2813_v45  ;;  %2794 = vst.msk [vmem:[%s4897_s5 + $0x58] sm:$0xff] %vm2782_vm8, %v3669_v26  ;;  %v2820_v13 = vsel %vm2782_vm8, %v3669_v26, 0.0 }
 0x198   : > { %2792 = vst.msk [vmem:[%s4897_s5 + $0x48] sm:$0xff] %vm2782_vm8, %v3670_v44  ;;  %v2816_v23 = vsel %vm2782_vm8, %v3670_v44, 0.0 }
 0x199   : > { %v2817_v63 = vadd.f32 %v2816_v23, %v2815_v40 }
 0x19a   : > { %v3653_v17 = vpop.f32.mrb[12].mxu0  ;;  %v3573_v14 = vpop.f32.mrb[12].mxu1 }
 0x19b   : > { %v2751_v33 = vpop.f32.mrb[13].mxu0  ;;  %v2819_v16 = vadd.f32 %v2818_v2, %v2817_v63  ;;  %v3671_v42 = vadd.f32 %v3653_v17, %v3573_v14  ;;  %v1615_v27 = vpop.f32.mrb[13].mxu1 }
 0x19c   : > { %v3654_v53 = vpop.f32.mrb[14].mxu0  ;;  %v3672_v28 = vadd.f32 %v2751_v33, %v1615_v27  ;;  %v3574_v1 = vpop.f32.mrb[14].mxu1 }
 0x19d   : > { %v2754_v22 = vpop.f32.mrb[15].mxu0  ;;  %2797 = vst.msk [vmem:[%s4897_s5 + $0x70] sm:$0xff] %vm2782_vm8, %v3671_v42  ;;  %v2821_v58 = vadd.f32 %v2820_v13, %v2819_v16  ;;  %v3673_v9 = vadd.f32 %v3654_v53, %v3574_v1  ;;  %v1618_v34 = vpop.f32.mrb[15].mxu1  ;;  %v2826_v47 = vsel %vm2782_vm8, %v3671_v42, 0.0 }
 0x19e   : > { %2795 = vst.msk [vmem:[%s4897_s5 + $0x60] sm:$0xff] %vm2782_vm8, %v3672_v28  ;;  %v2822_v32 = vsel %vm2782_vm8, %v3672_v28, 0.0  ;;  %v3674_v56 = vadd.f32 %v2754_v22, %v1618_v34 }
 0x19f   : > { %v2823_v6 = vadd.f32 %v2822_v32, %v2821_v58  ;;  %2798 = vst.msk [vmem:[%s4897_s5 + $0x78] sm:$0xff] %vm2782_vm8, %v3673_v9  ;;  %v2828_v39 = vsel %vm2782_vm8, %v3673_v9, 0.0 }
 0x1a0   : > { %2796 = vst.msk [vmem:[%s4897_s5 + $0x68] sm:$0xff] %vm2782_vm8, %v3674_v56  ;;  %v2824_v29 = vsel %vm2782_vm8, %v3674_v56, 0.0 }
 0x1a1   : > { %v2825_v43 = vadd.f32 %v2824_v29, %v2823_v6 }
 0x1a3   : > { %v2827_v3 = vadd.f32 %v2826_v47, %v2825_v43 }
 0x1a5   : > { %v2829_v18 = vadd.f32 %v2828_v39, %v2827_v3 }
 0x1a7   : > { %v2830_v60 = vrot.slane %v2829_v18, 4 }
 0x1a9   : > { %v2831_v12 = vadd.f32 %v2830_v60, %v2829_v18 }
 0x1ab   : > { %v2832_v48 = vrot.slane %v2831_v12, 2 }
 0x1ad   : > { %v2833_v51 = vadd.f32 %v2832_v48, %v2831_v12 }
 0x1af   : > { %v2834_v25 = vrot.slane %v2833_v51, 1 }
 0x1b1   : > { %v4983_v49 = vadd.f32 %v2834_v25, %v2833_v51 }
 0x1b3   : > { %v2836_v37 = vmul.f32 0.0078125, %v4983_v49 }
 0x1b5   : > { %v2837_v5 = vsub.f32 %v4901_v11, %v2836_v37  ;;  %v2838_v35 = vsub.f32 %v4911_v59, %v2836_v37  ;;  %v2839_v10 = vsub.f32 %v4899_v19, %v2836_v37  ;;  %v2840_v54 = vsub.f32 %v4906_v21, %v2836_v37 }
 0x1b6   : > { %v2841_v52 = vsub.f32 %v4929_v38, %v2836_v37  ;;  %v2842_v31 = vsub.f32 %v4941_v0, %v2836_v37  ;;  %v2843_v36 = vsub.f32 %v4925_v24, %v2836_v37  ;;  %v2844_v50 = vsub.f32 %v4934_v61, %v2836_v37 }
 0x1b7   : > { %v2845_v46 = vsub.f32 %v3668_v8, %v2836_v37  ;;  %v2846_v7 = vsub.f32 %v3670_v44, %v2836_v37  ;;  %v2847_v4 = vsub.f32 %v4955_v57, %v2836_v37  ;;  %v2848_v20 = vsub.f32 %v3669_v26, %v2836_v37 }
 0x1b8   : > { %v2849_v11 = vsub.f32 %v3672_v28, %v2836_v37  ;;  %v2850_v41 = vsub.f32 %v3674_v56, %v2836_v37  ;;  %v2851_v59 = vsub.f32 %v3671_v42, %v2836_v37  ;;  %v2852_v45 = vsub.f32 %v3673_v9, %v2836_v37 }
 0x1b9   : > { %v2853_v19 = vmul.f32 %v2837_v5, %v2837_v5  ;;  %v2854_v55 = vmul.f32 %v2838_v35, %v2838_v35  ;;  %v2855_v21 = vmul.f32 %v2839_v10, %v2839_v10  ;;  %v2856_v15 = vmul.f32 %v2840_v54, %v2840_v54 }
 0x1ba   : > { %v2858_v38 = vmul.f32 %v2842_v31, %v2842_v31  ;;  %v2859_v30 = vmul.f32 %v2843_v36, %v2843_v36  ;;  %v2860_v0 = vmul.f32 %v2844_v50, %v2844_v50  ;;  %v2861_v62 = vmul.f32 %v2845_v46, %v2845_v46 }
 0x1bb   : > { %v2862_v24 = vmul.f32 %v2846_v7, %v2846_v7  ;;  %v2863_v40 = vmul.f32 %v2847_v4, %v2847_v4  ;;  %v2857_v61 = vmul.f32 %v2841_v52, %v2841_v52  ;;  %v2864_v8 = vmul.f32 %v2848_v20, %v2848_v20 }
 0x1bc   : > { %v2865_v44 = vmul.f32 %v2849_v11, %v2849_v11  ;;  %v2866_v23 = vmul.f32 %v2850_v41, %v2850_v41  ;;  %v2867_v57 = vmul.f32 %v2851_v59, %v2851_v59  ;;  %v2868_v26 = vmul.f32 %v2852_v45, %v2852_v45 }
 0x1bd   : > { %v2869_v63 = vsel %vm2782_vm8, %v2853_v19, 0.0  ;;  %v2870_v17 = vsel %vm2782_vm8, %v2854_v55, 0.0  ;;  %v2872_v14 = vsel %vm2782_vm8, %v2855_v21, 0.0  ;;  %v2878_v33 = vsel %vm2782_vm8, %v2858_v38, 0.0 }
 0x1be   : > { %v2871_v2 = vadd.f32 %v2870_v17, %v2869_v63  ;;  %v2880_v16 = vsel %vm2782_vm8, %v2859_v30, 0.0  ;;  %v2882_v42 = vsel %vm2782_vm8, %v2860_v0, 0.0  ;;  %v2884_v27 = vsel %vm2782_vm8, %v2861_v62, 0.0 }
 0x1bf   : > { %v2886_v53 = vsel %vm2782_vm8, %v2862_v24, 0.0  ;;  %v2888_v13 = vsel %vm2782_vm8, %v2863_v40, 0.0  ;;  %v2890_v1 = vsel %vm2782_vm8, %v2864_v8, 0.0  ;;  %v2892_v22 = vsel %vm2782_vm8, %v2865_v44, 0.0 }
 0x1c0   : > { %v2873_v28 = vadd.f32 %v2872_v14, %v2871_v2  ;;  %v2894_v58 = vsel %vm2782_vm8, %v2866_v23, 0.0  ;;  %v2874_v9 = vsel %vm2782_vm8, %v2856_v15, 0.0  ;;  %v2896_v34 = vsel %vm2782_vm8, %v2867_v57, 0.0 }
 0x1c1   : > { %v2898_v32 = vsel %vm2782_vm8, %v2868_v26, 0.0  ;;  %v2876_v6 = vsel %vm2782_vm8, %v2857_v61, 0.0 }
 0x1c2   : > { %v2875_v56 = vadd.f32 %v2874_v9, %v2873_v28 }
 0x1c4   : > { %v2877_v29 = vadd.f32 %v2876_v6, %v2875_v56 }
 0x1c6   : > { %v2879_v43 = vadd.f32 %v2878_v33, %v2877_v29 }
 0x1c8   : > { %v2881_v47 = vadd.f32 %v2880_v16, %v2879_v43 }
 0x1ca   : > { %v2883_v3 = vadd.f32 %v2882_v42, %v2881_v47 }
 0x1cc   : > { %v2885_v39 = vadd.f32 %v2884_v27, %v2883_v3 }
 0x1ce   : > { %v2887_v18 = vadd.f32 %v2886_v53, %v2885_v39 }
 0x1d0   : > { %v2889_v60 = vadd.f32 %v2888_v13, %v2887_v18 }
 0x1d2   : > { %v2891_v12 = vadd.f32 %v2890_v1, %v2889_v60 }
 0x1d4   : > { %v2893_v48 = vadd.f32 %v2892_v22, %v2891_v12 }
 0x1d6   : > { %v2895_v51 = vadd.f32 %v2894_v58, %v2893_v48 }
 0x1d8   : > { %v2897_v25 = vadd.f32 %v2896_v34, %v2895_v51 }
 0x1da   : > { %v2899_v37 = vadd.f32 %v2898_v32, %v2897_v25 }
 0x1dc   : > { %v2900_v5 = vrot.slane %v2899_v37, 4 }
 0x1de   : > { %v2901_v35 = vadd.f32 %v2900_v5, %v2899_v37 }
 0x1e0   : > { %v2902_v10 = vrot.slane %v2901_v35, 2 }
 0x1e2   : > { %v2903_v54 = vadd.f32 %v2902_v10, %v2901_v35 }
 0x1e4   : > { %v2904_v52 = vrot.slane %v2903_v54, 1 }
 0x1e6   : > { %v2905_v31 = vadd.f32 %v2904_v52, %v2903_v54 }
 0x1e8   : > { %v2907_v36 = vsel %vm2906_vm9, %v4983_v49, %v2905_v31 }
 0x1e9   : > { %2909 = vst.msk [vmem:[%s216_s19] sm:$0x3] %vm2908_vm10, %v2907_v36 }
 0x1ea PF: > { %s14_s16 = sadd.s32 1, %s3920_s16   ;;  %s5062_s12 = smov %s3912_s14 }
 0x1eb   : > { %p11_p8 = scmp.ge.s32.totalorder %s14_s16, 6   ;;  %s5063_s13 = smov %s3916_s15 }
 0x1ec   : > { %s5064_s14 = smov %s5067_s17  ;;  %s5065_s15 = smov %s5071_s18 }
 0x1ed   :  { %13 = sbr.rel (!%p11_p8) target bundleno = 3 (0x3), region = 81 }

</bundles_post_ra>
